<compile_context>
chip_gen: v5e
topology: v5e:2x2
jax: 0.10.0
libtpu: 0.0.40
codegen_flags: <defaults>
</compile_context>

<pallas_src>
import jax
import jax.numpy as jnp
import numpy as np
from jax.experimental import pallas as pl
from jax.experimental.pallas import tpu as pltpu


_VMEM_LIMIT = 32 * 1024 * 1024  # explicit budget; safe on v5e/v6e (128 MiB) and v7x (64 MiB)


# ----------------------------- Pallas kernels ------------------------------ #

def _kv_proj_kernel(xf_ref, wkT_ref, wvT_ref, k_ref, v_ref):
    # xf_ref: (1, TN, C) f32 slice of first_group (channels-last)
    # wkT/wvT: (C, C) bf16 (wvT already carries 1/(sqrt(C)*(group-1)))
    x = xf_ref[0].astype(jnp.bfloat16)                                   # (TN, C)
    k = jnp.dot(x, wkT_ref[...], preferred_element_type=jnp.float32)
    v = jnp.dot(x, wvT_ref[...], preferred_element_type=jnp.float32)
    k_ref[0] = k.astype(jnp.bfloat16)
    v_ref[0] = v.astype(jnp.bfloat16)


def _cross_attn_kernel(xl_ref, k_ref, v_ref, wqT_ref, o_ref):
    # grid = (batch_out, group-1, N // TQ); the last two axes are reductions that
    # accumulate directly into the resident output block (fused vstack/view/mean).
    j = pl.program_id(1)    # group index inside the fused mean
    qt = pl.program_id(2)   # query tile index (output sums over query points)

    @pl.when(jnp.logical_and(j == 0, qt == 0))
    def _():
        o_ref[...] = jnp.zeros_like(o_ref)

    # q projection for this query tile: bf16 MXU operands, f32 accumulation.
    q = jnp.dot(xl_ref[0].astype(jnp.bfloat16), wqT_ref[...],
                preferred_element_type=jnp.float32)                      # (TQ, C)

    # energy^T: (N_k, TQ) = K . q^T  -- NT dot_general, no explicit transpose.
    sT = jax.lax.dot_general(k_ref[0], q.astype(jnp.bfloat16),
                             (((1,), (1,)), ((), ())),
                             preferred_element_type=jnp.float32)         # (N_k, TQ)

    # softmax over the key axis (axis 0 here); the full key range is resident, exact.
    m = jnp.max(sT, axis=0, keepdims=True)
    e = jnp.exp(sT - m)
    p = e * pl.reciprocal(jnp.sum(e, axis=0, keepdims=True), approx=True)

    # x_r contribution (N_k, C) = p @ v_tile; 1/sqrt(C) and 1/(group-1) folded into v.
    o_ref[0] += jnp.dot(p.astype(jnp.bfloat16), v_ref[0],
                        preferred_element_type=jnp.float32)


def _ln_ffn_kernel(res_ref, xr_ref, g1_ref, b1_ref, w1_ref, fb1_ref,
                   w2_ref, fb2_ref, g2_ref, b2_ref, o_ref):
    # res_ref, xr_ref: (1, TN, C) f32 channels-last; weights bf16, biases/affine f32.
    y = res_ref[0] + xr_ref[0]                                           # (TN, C)

    # LayerNorm1 over C (lane axis), eps=1e-6 as in the module.
    mu = jnp.mean(y, axis=-1, keepdims=True)
    var = jnp.mean((y - mu) ** 2, axis=-1, keepdims=True)
    y = (y - mu) * jax.lax.rsqrt(var + 1e-6) * g1_ref[...] + b1_ref[...]

    # FFN: x + fc2(relu(fc1(x))) -- bf16 MXU operands, f32 accumulation.
    h = jnp.dot(y.astype(jnp.bfloat16), w1_ref[...],
                preferred_element_type=jnp.float32) + fb1_ref[...]
    h = jnp.maximum(h, 0.0)
    y = y + jnp.dot(h.astype(jnp.bfloat16), w2_ref[...],
                    preferred_element_type=jnp.float32) + fb2_ref[...]

    # relu(LayerNorm2(x)) -- eps=1e-5 (PyTorch default; module passes no eps here).
    mu2 = jnp.mean(y, axis=-1, keepdims=True)
    var2 = jnp.mean((y - mu2) ** 2, axis=-1, keepdims=True)
    y = (y - mu2) * jax.lax.rsqrt(var2 + 1e-5) * g2_ref[...] + b2_ref[...]
    o_ref[0] = jnp.maximum(y, 0.0)


# ------------------------------- wrappers ---------------------------------- #

def _expand_grouped_weight(w, shared_gp):
    """Conv1d(C, C, 1, groups=shared_gp) weight (C, C//sg) -> dense (C, C)."""
    C, cg = w.shape
    full = jnp.zeros((C, C), dtype=w.dtype)
    for g in range(shared_gp):
        full = full.at[g * cg:(g + 1) * cg, g * cg:(g + 1) * cg].set(
            w[g * cg:(g + 1) * cg])
    return full


def kv_projection(xf_nc, wkT, wvT, tn):
    B, N, C = xf_nc.shape
    row = lambda b, n: (b, n, 0)
    full = lambda b, n: (0, 0)
    return pl.pallas_call(
        _kv_proj_kernel,
        out_shape=(jax.ShapeDtypeStruct((B, N, C), jnp.bfloat16),
                   jax.ShapeDtypeStruct((B, N, C), jnp.bfloat16)),
        grid=(B, N // tn),
        in_specs=[pl.BlockSpec((1, tn, C), row),
                  pl.BlockSpec((C, C), full),
                  pl.BlockSpec((C, C), full)],
        out_specs=(pl.BlockSpec((1, tn, C), row),
                   pl.BlockSpec((1, tn, C), row)),
        compiler_params=pltpu.CompilerParams(
            dimension_semantics=("parallel", "parallel"),
            vmem_limit_bytes=_VMEM_LIMIT),
    )(xf_nc, wkT, wvT)


def cross_attention(xl_nc, k_nc, v_nc, wqT, batch, g1, tq):
    _, N, C = xl_nc.shape
    # Row r = bp*g1 + j of last_group supplies the queries; k/v come from
    # first_group batch r % batch.  This reproduces torch's vstack -> view(batch,-1)
    # -> mean(dim=1), which mixes group AND batch rows.
    return pl.pallas_call(
        _cross_attn_kernel,
        out_shape=jax.ShapeDtypeStruct((batch, N, C), jnp.float32),
        grid=(batch, g1, N // tq),
        in_specs=[
            pl.BlockSpec((1, tq, C), lambda bp, j, qt: (bp * g1 + j, qt, 0)),
            pl.BlockSpec((1, N, C), lambda bp, j, qt: ((bp * g1 + j) % batch, 0, 0)),
            pl.BlockSpec((1, tq, C), lambda bp, j, qt: ((bp * g1 + j) % batch, qt, 0)),
            pl.BlockSpec((C, C), lambda bp, j, qt: (0, 0)),
        ],
        out_specs=pl.BlockSpec((1, N, C), lambda bp, j, qt: (bp, 0, 0)),
        compiler_params=pltpu.CompilerParams(
            dimension_semantics=("parallel", "arbitrary", "arbitrary"),
            vmem_limit_bytes=_VMEM_LIMIT),
    )(xl_nc, k_nc, v_nc, wqT)


def ln_ffn(res_nc, xr_nc, params, tn):
    B, N, C = res_nc.shape
    H = params["w1"].shape[1]
    row = lambda b, n: (b, n, 0)
    full = lambda b, n: (0, 0)
    return pl.pallas_call(
        _ln_ffn_kernel,
        out_shape=jax.ShapeDtypeStruct((B, N, C), jnp.float32),
        grid=(B, N // tn),
        in_specs=[pl.BlockSpec((1, tn, C), row),
                  pl.BlockSpec((1, tn, C), row),
                  pl.BlockSpec((1, C), full),
                  pl.BlockSpec((1, C), full),
                  pl.BlockSpec((C, H), full),
                  pl.BlockSpec((1, H), full),
                  pl.BlockSpec((H, C), full),
                  pl.BlockSpec((1, C), full),
                  pl.BlockSpec((1, C), full),
                  pl.BlockSpec((1, C), full)],
        out_specs=pl.BlockSpec((1, tn, C), row),
        compiler_params=pltpu.CompilerParams(
            dimension_semantics=("parallel", "parallel"),
            vmem_limit_bytes=_VMEM_LIMIT),
    )(res_nc, xr_nc,
      params["ln1_g"], params["ln1_b"],
      params["w1"].astype(jnp.bfloat16), params["b1"],
      params["w2"].astype(jnp.bfloat16), params["b2"],
      params["ln2_g"], params["ln2_b"])


def cross_sa_layer(x, params, group, shared_gp, tq=128, tn=128):
    """x: (group*B, C, N) float32; returns (group*B, C, N) float32."""
    bs, C, N = x.shape
    assert bs % group == 0 and C % shared_gp == 0 and C % 4 == 0
    batch = bs // group
    g1 = group - 1
    if N % tq:
        tq = N
    if N % tn:
        tn = N

    first = x[:batch]                      # (B, C, N)    residual / k,v source
    last = x[batch:]                       # (g1*B, C, N) query source (passthrough)

    # Single layout change in the wrapper: channels-last for every kernel.
    xf_nc = jnp.transpose(first, (0, 2, 1))          # (B, N, C)
    xl_nc = jnp.transpose(last, (0, 2, 1))           # (g1*B, N, C)

    wqT = _expand_grouped_weight(params["wq"], shared_gp).T.astype(jnp.bfloat16)
    wkT = _expand_grouped_weight(params["wk"], shared_gp).T.astype(jnp.bfloat16)
    # Fold the 1/sqrt(C) attention scale and the 1/(group-1) mean into v.
    wvT = (params["wv"].T / (g1 * C ** 0.5)).astype(jnp.bfloat16)

    k_nc, v_nc = kv_projection(xf_nc, wkT, wvT, tn)                     # (B, N, C) bf16
    x_r = cross_attention(xl_nc, k_nc, v_nc, wqT, batch, g1, tq)        # (B, N, C) f32
    out_nc = ln_ffn(xf_nc, x_r, params, tn)                             # (B, N, C) f32

    out_first = jnp.transpose(out_nc, (0, 2, 1))                        # (B, C, N)
    return jnp.concatenate([out_first, last], axis=0)


# ------------------------- params & pure-JAX reference --------------------- #

def init_params(key, C, shared_gp):
    cg = C // shared_gp
    ks = jax.random.split(key, 6)
    return {
        "wq": jax.random.normal(ks[0], (C, cg), jnp.float32) / np.sqrt(cg),
        "wk": jax.random.normal(ks[1], (C, cg), jnp.float32) / np.sqrt(cg),
        "wv": jax.random.normal(ks[2], (C, C), jnp.float32) / np.sqrt(C),
        "ln1_g": jnp.ones((1, C), jnp.float32),
        "ln1_b": jnp.zeros((1, C), jnp.float32),
        # fc1 / fc2 stored pre-transposed: (C, 4C), (4C, C)
        "w1": jax.random.normal(ks[3], (C, 4 * C), jnp.float32) / np.sqrt(C),
        "b1": jax.random.normal(ks[4], (1, 4 * C), jnp.float32) * 0.1,
        "w2": jax.random.normal(ks[5], (4 * C, C), jnp.float32) / np.sqrt(4 * C),
        "b2": jnp.zeros((1, C), jnp.float32),
        "ln2_g": jnp.ones((1, C), jnp.float32),
        "ln2_b": jnp.zeros((1, C), jnp.float32),
    }


def reference(x, params, group, shared_gp):
    """Pure f32 JAX replica of the PyTorch forward (including the view/mean quirk)."""
    bs, C, N = x.shape
    batch = bs // group
    first, last = x[:batch], x[batch:]
    wq = _expand_grouped_weight(params["wq"], shared_gp)
    wk = _expand_grouped_weight(params["wk"], shared_gp)
    q = jnp.einsum("oc,bcn->bon", wq, last)
    k = jnp.einsum("oc,bcn->bon", wk, first)
    v = jnp.einsum("oc,bcn->bon", params["wv"], first)
    x_rs = []
    for i in range(group - 1):
        qi = q[batch * i:batch * i + batch]
        energy = jnp.einsum("bcm,bcn->bmn", qi, k)   # == sum over shared groups
        attn = jax.nn.softmax(energy, axis=-1)
        x_rs.append(jnp.einsum("bcn,bnm->bcm", v, attn) / (C ** 0.5))
    x_rs = jnp.concatenate(x_rs, axis=0)
    # torch: x_rs.view(batch, -1, ch, nums).mean(dim=1)  (raw row reinterpretation)
    x_r = x_rs.reshape(batch, group - 1, C, N).mean(axis=1)

    def ln(y, g, b, eps):
        mu = y.mean(-1, keepdims=True)
        var = ((y - mu) ** 2).mean(-1, keepdims=True)
        return (y - mu) / jnp.sqrt(var + eps) * g + b

    y = (first + x_r).transpose(0, 2, 1)
    y = ln(y, params["ln1_g"], params["ln1_b"], 1e-6)
    h = jax.nn.relu(y @ params["w1"] + params["b1"])
    y = y + h @ params["w2"] + params["b2"]
    y = jax.nn.relu(ln(y, params["ln2_g"], params["ln2_b"], 1e-5)).transpose(0, 2, 1)
    return jnp.concatenate([y, last], axis=0)


# ---------------------------------- main ------------------------------------ #

if __name__ == "__main__":
    group, shared_gp = 3, 2
    B, C, N = 2, 128, 256          # lane-dense C, two query/N tiles per batch
    key = jax.random.PRNGKey(0)
    kx, kp = jax.random.split(key)
    x = jax.random.normal(kx, (group * B, C, N), jnp.float32)
    params = init_params(kp, C, shared_gp)

    fwd = jax.jit(cross_sa_layer, static_argnames=("group", "shared_gp", "tq", "tn"))
    out = jax.block_until_ready(fwd(x, params, group=group, shared_gp=shared_gp))

    assert out.shape == (group * B, C, N)
    ref = reference(x, params, group, shared_gp)
    # bf16 MXU operands (f32 accumulation) vs a pure-f32 reference -> loose tolerance.
    np.testing.assert_allclose(np.asarray(out), np.asarray(ref),
                               atol=5e-2, rtol=5e-2)
    print("KERNEL_OK")
</pallas_src>

<mosaic_0001>
module attributes {stable_mosaic.version = 11 : i64} {
  func.func @_kv_proj_kernel(%arg0: i32, %arg1: i32, %arg2: memref<1x128x128xf32, #tpu.memory_space<vmem>>, %arg3: memref<128x128xbf16, #tpu.memory_space<vmem>>, %arg4: memref<128x128xbf16, #tpu.memory_space<vmem>>, %arg5: memref<1x128x128xbf16, #tpu.memory_space<vmem>>, %arg6: memref<1x128x128xbf16, #tpu.memory_space<vmem>>) attributes {dimension_semantics = [#tpu.dimension_semantics<parallel>, #tpu.dimension_semantics<parallel>], iteration_bounds = array<i64: 2, 2>, scalar_prefetch = 0 : i64, scratch_operands = 0 : i64, tpu.core_type = #tpu.core_type<tc>, window_params = [{transform_indices = @transform_0, window_bounds = array<i64: 1, 128, 128>}, {pipeline_mode = #tpu.pipeline_mode<synchronous>, transform_indices = @transform_1, window_bounds = array<i64: 128, 128>}, {pipeline_mode = #tpu.pipeline_mode<synchronous>, transform_indices = @transform_2, window_bounds = array<i64: 128, 128>}, {transform_indices = @transform_3, window_bounds = array<i64: 1, 128, 128>}, {transform_indices = @transform_4, window_bounds = array<i64: 1, 128, 128>}]} {
    %c0 = arith.constant 0 : index
    %c0_0 = arith.constant 0 : index
    %c0_1 = arith.constant 0 : index
    %0 = vector.load %arg2[%c0, %c0_0, %c0_1] : memref<1x128x128xf32, #tpu.memory_space<vmem>>, vector<1x128x128xf32>
    %1 = vector.shape_cast %0 : vector<1x128x128xf32> to vector<128x128xf32>
    %2 = arith.truncf %1 : vector<128x128xf32> to vector<128x128xbf16>
    %c0_2 = arith.constant 0 : index
    %c0_3 = arith.constant 0 : index
    %3 = vector.load %arg3[%c0_2, %c0_3] : memref<128x128xbf16, #tpu.memory_space<vmem>>, vector<128x128xbf16>
    %cst = arith.constant dense<0.000000e+00> : vector<128x128xf32>
    %4 = tpu.matmul %2, %3, %cst {dimension_numbers = #tpu.dot_dimension_numbers<[1], [0], [0], [1], [0, 0, 1, 1], [], []>} : vector<128x128xbf16>, vector<128x128xbf16>, vector<128x128xf32> -> vector<128x128xf32>
    %c0_4 = arith.constant 0 : index
    %c0_5 = arith.constant 0 : index
    %5 = vector.load %arg4[%c0_4, %c0_5] : memref<128x128xbf16, #tpu.memory_space<vmem>>, vector<128x128xbf16>
    %cst_6 = arith.constant dense<0.000000e+00> : vector<128x128xf32>
    %6 = tpu.matmul %2, %5, %cst_6 {dimension_numbers = #tpu.dot_dimension_numbers<[1], [0], [0], [1], [0, 0, 1, 1], [], []>} : vector<128x128xbf16>, vector<128x128xbf16>, vector<128x128xf32> -> vector<128x128xf32>
    %7 = arith.truncf %4 : vector<128x128xf32> to vector<128x128xbf16>
    %c0_7 = arith.constant 0 : index
    %c0_8 = arith.constant 0 : index
    %c0_9 = arith.constant 0 : index
    %8 = vector.load %arg5[%c0_7, %c0_8, %c0_9] : memref<1x128x128xbf16, #tpu.memory_space<vmem>>, vector<1x128x128xbf16>
    %9 = vector.shape_cast %8 : vector<1x128x128xbf16> to vector<128x128xbf16>
    %10 = vector.shape_cast %7 : vector<128x128xbf16> to vector<1x128x128xbf16>
    tpu.vector_store %arg5[%c0_7, %c0_8, %c0_9], %10 {strides = array<i32>} : memref<1x128x128xbf16, #tpu.memory_space<vmem>>, vector<1x128x128xbf16>,
    %11 = arith.truncf %6 : vector<128x128xf32> to vector<128x128xbf16>
    %c0_10 = arith.constant 0 : index
    %c0_11 = arith.constant 0 : index
    %c0_12 = arith.constant 0 : index
    %12 = vector.load %arg6[%c0_10, %c0_11, %c0_12] : memref<1x128x128xbf16, #tpu.memory_space<vmem>>, vector<1x128x128xbf16>
    %13 = vector.shape_cast %12 : vector<1x128x128xbf16> to vector<128x128xbf16>
    %14 = vector.shape_cast %11 : vector<128x128xbf16> to vector<1x128x128xbf16>
    tpu.vector_store %arg6[%c0_10, %c0_11, %c0_12], %14 {strides = array<i32>} : memref<1x128x128xbf16, #tpu.memory_space<vmem>>, vector<1x128x128xbf16>,
    return
  }
  func.func @transform_0(%arg0: i32, %arg1: i32) -> (i32, i32, i32) {
    %c0_i32 = arith.constant 0 : i32
    %c0_i32_0 = arith.constant 0 : i32
    return %arg0, %arg1, %c0_i32 : i32, i32, i32
  }
  func.func @transform_1(%arg0: i32, %arg1: i32) -> (i32, i32) {
    %c0_i32 = arith.constant 0 : i32
    %c0_i32_0 = arith.constant 0 : i32
    %c0_i32_1 = arith.constant 0 : i32
    return %c0_i32, %c0_i32_0 : i32, i32
  }
  func.func @transform_2(%arg0: i32, %arg1: i32) -> (i32, i32) {
    %c0_i32 = arith.constant 0 : i32
    %c0_i32_0 = arith.constant 0 : i32
    %c0_i32_1 = arith.constant 0 : i32
    return %c0_i32, %c0_i32_0 : i32, i32
  }
  func.func @transform_3(%arg0: i32, %arg1: i32) -> (i32, i32, i32) {
    %c0_i32 = arith.constant 0 : i32
    %c0_i32_0 = arith.constant 0 : i32
    return %arg0, %arg1, %c0_i32 : i32, i32, i32
  }
  func.func @transform_4(%arg0: i32, %arg1: i32) -> (i32, i32, i32) {
    %c0_i32 = arith.constant 0 : i32
    %c0_i32_0 = arith.constant 0 : i32
    return %arg0, %arg1, %c0_i32 : i32, i32, i32
  }
}

module attributes {stable_mosaic.version = 11 : i64} {
  func.func @_cross_attn_kernel(%arg0: i32, %arg1: i32, %arg2: i32, %arg3: memref<1x128x128xf32, #tpu.memory_space<vmem>>, %arg4: memref<1x256x128xbf16, #tpu.memory_space<vmem>>, %arg5: memref<1x128x128xbf16, #tpu.memory_space<vmem>>, %arg6: memref<128x128xbf16, #tpu.memory_space<vmem>>, %arg7: memref<1x256x128xf32, #tpu.memory_space<vmem>>) attributes {dimension_semantics = [#tpu.dimension_semantics<parallel>, #tpu.dimension_semantics<arbitrary>, #tpu.dimension_semantics<arbitrary>], iteration_bounds = array<i64: 2, 2, 2>, scalar_prefetch = 0 : i64, scratch_operands = 0 : i64, tpu.core_type = #tpu.core_type<tc>, window_params = [{transform_indices = @transform_0, window_bounds = array<i64: 1, 128, 128>}, {transform_indices = @transform_1, window_bounds = array<i64: 1, 256, 128>}, {transform_indices = @transform_2, window_bounds = array<i64: 1, 128, 128>}, {pipeline_mode = #tpu.pipeline_mode<synchronous>, transform_indices = @transform_3, window_bounds = array<i64: 128, 128>}, {transform_indices = @transform_4, window_bounds = array<i64: 1, 256, 128>}]} {
    %c0_i32 = arith.constant 0 : i32
    %0 = arith.cmpi eq, %arg1, %c0_i32 : i32
    %c0_i32_0 = arith.constant 0 : i32
    %1 = arith.cmpi eq, %arg2, %c0_i32_0 : i32
    %2 = arith.andi %0, %1 : i1
    %3 = arith.extui %2 : i1 to i32
    %c0_i32_1 = arith.constant 0 : i32
    %4 = arith.cmpi ne, %3, %c0_i32_1 : i32
    scf.if %4 {
      %cst_22 = arith.constant 0.000000e+00 : f32
      %34 = vector.broadcast %cst_22 : f32 to vector<1x256x128xf32>
      %c0_23 = arith.constant 0 : index
      %c0_24 = arith.constant 0 : index
      %c0_25 = arith.constant 0 : index
      %35 = vector.load %arg7[%c0_23, %c0_24, %c0_25] : memref<1x256x128xf32, #tpu.memory_space<vmem>>, vector<1x256x128xf32>
      tpu.vector_store %arg7[%c0_23, %c0_24, %c0_25], %34 {strides = array<i32>} : memref<1x256x128xf32, #tpu.memory_space<vmem>>, vector<1x256x128xf32>,
    } else {
    }
    %c0 = arith.constant 0 : index
    %c0_2 = arith.constant 0 : index
    %c0_3 = arith.constant 0 : index
    %5 = vector.load %arg3[%c0, %c0_2, %c0_3] : memref<1x128x128xf32, #tpu.memory_space<vmem>>, vector<1x128x128xf32>
    %6 = vector.shape_cast %5 : vector<1x128x128xf32> to vector<128x128xf32>
    %7 = arith.truncf %6 : vector<128x128xf32> to vector<128x128xbf16>
    %c0_4 = arith.constant 0 : index
    %c0_5 = arith.constant 0 : index
    %8 = vector.load %arg6[%c0_4, %c0_5] : memref<128x128xbf16, #tpu.memory_space<vmem>>, vector<128x128xbf16>
    %cst = arith.constant dense<0.000000e+00> : vector<128x128xf32>
    %9 = tpu.matmul %7, %8, %cst {dimension_numbers = #tpu.dot_dimension_numbers<[1], [0], [0], [1], [0, 0, 1, 1], [], []>} : vector<128x128xbf16>, vector<128x128xbf16>, vector<128x128xf32> -> vector<128x128xf32>
    %c0_6 = arith.constant 0 : index
    %c0_7 = arith.constant 0 : index
    %c0_8 = arith.constant 0 : index
    %10 = vector.load %arg4[%c0_6, %c0_7, %c0_8] : memref<1x256x128xbf16, #tpu.memory_space<vmem>>, vector<1x256x128xbf16>
    %11 = vector.shape_cast %10 : vector<1x256x128xbf16> to vector<256x128xbf16>
    %12 = arith.truncf %9 : vector<128x128xf32> to vector<128x128xbf16>
    %cst_9 = arith.constant dense<0.000000e+00> : vector<256x128xf32>
    %13 = tpu.matmul %11, %12, %cst_9 {dimension_numbers = #tpu.dot_dimension_numbers<[1], [1], [0], [0], [0, 0, 1, 0], [], []>} : vector<256x128xbf16>, vector<128x128xbf16>, vector<256x128xf32> -> vector<256x128xf32>
    %cst_10 = arith.constant dense<0xFF800000> : vector<128xf32>
    %14 = vector.multi_reduction <maximumf>, %13, %cst_10 [0] : vector<256x128xf32> to vector<128xf32>
    %15 = vector.shape_cast %14 : vector<128xf32> to vector<1x128xf32>
    %16 = vector.broadcast %15 : vector<1x128xf32> to vector<256x128xf32>
    %17 = arith.subf %13, %16 : vector<256x128xf32>
    %18 = math.exp %17 : vector<256x128xf32>
    %cst_11 = arith.constant dense<0.000000e+00> : vector<128xf32>
    %19 = vector.multi_reduction <add>, %18, %cst_11 [0] : vector<256x128xf32> to vector<128xf32>
    %20 = vector.shape_cast %19 : vector<128xf32> to vector<1x128xf32>
    %21 = tpu.reciprocal %20 {approx = true} : vector<1x128xf32> -> vector<1x128xf32>
    %22 = vector.broadcast %21 : vector<1x128xf32> to vector<256x128xf32>
    %23 = arith.mulf %18, %22 : vector<256x128xf32>
    %c0_12 = arith.constant 0 : index
    %c0_13 = arith.constant 0 : index
    %c0_14 = arith.constant 0 : index
    %24 = vector.load %arg7[%c0_12, %c0_13, %c0_14] : memref<1x256x128xf32, #tpu.memory_space<vmem>>, vector<1x256x128xf32>
    %25 = vector.shape_cast %24 : vector<1x256x128xf32> to vector<256x128xf32>
    %26 = arith.truncf %23 : vector<256x128xf32> to vector<256x128xbf16>
    %c0_15 = arith.constant 0 : index
    %c0_16 = arith.constant 0 : index
    %c0_17 = arith.constant 0 : index
    %27 = vector.load %arg5[%c0_15, %c0_16, %c0_17] : memref<1x128x128xbf16, #tpu.memory_space<vmem>>, vector<1x128x128xbf16>
    %28 = vector.shape_cast %27 : vector<1x128x128xbf16> to vector<128x128xbf16>
    %cst_18 = arith.constant dense<0.000000e+00> : vector<256x128xf32>
    %29 = tpu.matmul %26, %28, %cst_18 {dimension_numbers = #tpu.dot_dimension_numbers<[1], [0], [0], [1], [0, 0, 1, 1], [], []>} : vector<256x128xbf16>, vector<128x128xbf16>, vector<256x128xf32> -> vector<256x128xf32>
    %30 = arith.addf %25, %29 : vector<256x128xf32>
    %c0_19 = arith.constant 0 : index
    %c0_20 = arith.constant 0 : index
    %c0_21 = arith.constant 0 : index
    %31 = vector.load %arg7[%c0_19, %c0_20, %c0_21] : memref<1x256x128xf32, #tpu.memory_space<vmem>>, vector<1x256x128xf32>
    %32 = vector.shape_cast %31 : vector<1x256x128xf32> to vector<256x128xf32>
    %33 = vector.shape_cast %30 : vector<256x128xf32> to vector<1x256x128xf32>
    tpu.vector_store %arg7[%c0_19, %c0_20, %c0_21], %33 {strides = array<i32>} : memref<1x256x128xf32, #tpu.memory_space<vmem>>, vector<1x256x128xf32>,
    return
  }
  func.func @transform_0(%arg0: i32, %arg1: i32, %arg2: i32) -> (i32, i32, i32) {
    %c2_i32 = arith.constant 2 : i32
    %0 = arith.muli %arg0, %c2_i32 : i32
    %1 = arith.addi %0, %arg1 : i32
    %c0_i32 = arith.constant 0 : i32
    %c0_i32_0 = arith.constant 0 : i32
    return %1, %arg2, %c0_i32 : i32, i32, i32
  }
  func.func @transform_1(%arg0: i32, %arg1: i32, %arg2: i32) -> (i32, i32, i32) {
    %c2_i32 = arith.constant 2 : i32
    %0 = arith.muli %arg0, %c2_i32 : i32
    %1 = arith.addi %0, %arg1 : i32
    %c2_i32_0 = arith.constant 2 : i32
    %c0_i32 = arith.constant 0 : i32
    %2 = arith.cmpi eq, %c2_i32_0, %c0_i32 : i32
    %c1_i32 = arith.constant 1 : i32
    %3 = arith.select %2, %c1_i32, %c2_i32_0 : i32
    %4 = arith.remsi %1, %3 : i32
    %c0_i32_1 = arith.constant 0 : i32
    %5 = arith.cmpi ne, %4, %c0_i32_1 : i32
    %c0_i32_2 = arith.constant 0 : i32
    %6 = arith.cmpi slt, %4, %c0_i32_2 : i32
    %c0_i32_3 = arith.constant 0 : i32
    %7 = arith.cmpi slt, %3, %c0_i32_3 : i32
    %8 = arith.xori %6, %7 : i1
    %9 = arith.andi %8, %5 : i1
    %10 = arith.addi %4, %3 : i32
    %11 = arith.select %9, %10, %4 : i32
    %c0_i32_4 = arith.constant 0 : i32
    %c0_i32_5 = arith.constant 0 : i32
    %c0_i32_6 = arith.constant 0 : i32
    return %11, %c0_i32_4, %c0_i32_5 : i32, i32, i32
  }
  func.func @transform_2(%arg0: i32, %arg1: i32, %arg2: i32) -> (i32, i32, i32) {
    %c2_i32 = arith.constant 2 : i32
    %0 = arith.muli %arg0, %c2_i32 : i32
    %1 = arith.addi %0, %arg1 : i32
    %c2_i32_0 = arith.constant 2 : i32
    %c0_i32 = arith.constant 0 : i32
    %2 = arith.cmpi eq, %c2_i32_0, %c0_i32 : i32
    %c1_i32 = arith.constant 1 : i32
    %3 = arith.select %2, %c1_i32, %c2_i32_0 : i32
    %4 = arith.remsi %1, %3 : i32
    %c0_i32_1 = arith.constant 0 : i32
    %5 = arith.cmpi ne, %4, %c0_i32_1 : i32
    %c0_i32_2 = arith.constant 0 : i32
    %6 = arith.cmpi slt, %4, %c0_i32_2 : i32
    %c0_i32_3 = arith.constant 0 : i32
    %7 = arith.cmpi slt, %3, %c0_i32_3 : i32
    %8 = arith.xori %6, %7 : i1
    %9 = arith.andi %8, %5 : i1
    %10 = arith.addi %4, %3 : i32
    %11 = arith.select %9, %10, %4 : i32
    %c0_i32_4 = arith.constant 0 : i32
    %c0_i32_5 = arith.constant 0 : i32
    return %11, %arg2, %c0_i32_4 : i32, i32, i32
  }
  func.func @transform_3(%arg0: i32, %arg1: i32, %arg2: i32) -> (i32, i32) {
    %c0_i32 = arith.constant 0 : i32
    %c0_i32_0 = arith.constant 0 : i32
    %c0_i32_1 = arith.constant 0 : i32
    return %c0_i32, %c0_i32_0 : i32, i32
  }
  func.func @transform_4(%arg0: i32, %arg1: i32, %arg2: i32) -> (i32, i32, i32) {
    %c0_i32 = arith.constant 0 : i32
    %c0_i32_0 = arith.constant 0 : i32
    %c0_i32_1 = arith.constant 0 : i32
    return %arg0, %c0_i32, %c0_i32_0 : i32, i32, i32
  }
}

module attributes {stable_mosaic.version = 11 : i64} {
  func.func @_ln_ffn_kernel(%arg0: i32, %arg1: i32, %arg2: memref<1x128x128xf32, #tpu.memory_space<vmem>>, %arg3: memref<1x128x128xf32, #tpu.memory_space<vmem>>, %arg4: memref<1x128xf32, #tpu.memory_space<vmem>>, %arg5: memref<1x128xf32, #tpu.memory_space<vmem>>, %arg6: memref<128x512xbf16, #tpu.memory_space<vmem>>, %arg7: memref<1x512xf32, #tpu.memory_space<vmem>>, %arg8: memref<512x128xbf16, #tpu.memory_space<vmem>>, %arg9: memref<1x128xf32, #tpu.memory_space<vmem>>, %arg10: memref<1x128xf32, #tpu.memory_space<vmem>>, %arg11: memref<1x128xf32, #tpu.memory_space<vmem>>, %arg12: memref<1x128x128xf32, #tpu.memory_space<vmem>>) attributes {dimension_semantics = [#tpu.dimension_semantics<parallel>, #tpu.dimension_semantics<parallel>], iteration_bounds = array<i64: 2, 2>, scalar_prefetch = 0 : i64, scratch_operands = 0 : i64, tpu.core_type = #tpu.core_type<tc>, window_params = [{transform_indices = @transform_0, window_bounds = array<i64: 1, 128, 128>}, {transform_indices = @transform_1, window_bounds = array<i64: 1, 128, 128>}, {pipeline_mode = #tpu.pipeline_mode<synchronous>, transform_indices = @transform_2, window_bounds = array<i64: 1, 128>}, {pipeline_mode = #tpu.pipeline_mode<synchronous>, transform_indices = @transform_3, window_bounds = array<i64: 1, 128>}, {pipeline_mode = #tpu.pipeline_mode<synchronous>, transform_indices = @transform_4, window_bounds = array<i64: 128, 512>}, {pipeline_mode = #tpu.pipeline_mode<synchronous>, transform_indices = @transform_5, window_bounds = array<i64: 1, 512>}, {pipeline_mode = #tpu.pipeline_mode<synchronous>, transform_indices = @transform_6, window_bounds = array<i64: 512, 128>}, {pipeline_mode = #tpu.pipeline_mode<synchronous>, transform_indices = @transform_7, window_bounds = array<i64: 1, 128>}, {pipeline_mode = #tpu.pipeline_mode<synchronous>, transform_indices = @transform_8, window_bounds = array<i64: 1, 128>}, {pipeline_mode = #tpu.pipeline_mode<synchronous>, transform_indices = @transform_9, window_bounds = array<i64: 1, 128>}, {transform_indices = @transform_10, window_bounds = array<i64: 1, 128, 128>}]} {
    %c0 = arith.constant 0 : index
    %c0_0 = arith.constant 0 : index
    %c0_1 = arith.constant 0 : index
    %0 = vector.load %arg2[%c0, %c0_0, %c0_1] : memref<1x128x128xf32, #tpu.memory_space<vmem>>, vector<1x128x128xf32>
    %1 = vector.shape_cast %0 : vector<1x128x128xf32> to vector<128x128xf32>
    %c0_2 = arith.constant 0 : index
    %c0_3 = arith.constant 0 : index
    %c0_4 = arith.constant 0 : index
    %2 = vector.load %arg3[%c0_2, %c0_3, %c0_4] : memref<1x128x128xf32, #tpu.memory_space<vmem>>, vector<1x128x128xf32>
    %3 = vector.shape_cast %2 : vector<1x128x128xf32> to vector<128x128xf32>
    %4 = arith.addf %1, %3 : vector<128x128xf32>
    %cst = arith.constant dense<0.000000e+00> : vector<128xf32>
    %5 = vector.multi_reduction <add>, %4, %cst [1] : vector<128x128xf32> to vector<128xf32>
    %6 = vector.shape_cast %5 : vector<128xf32> to vector<128x1xf32>
    %cst_5 = arith.constant 1.280000e+02 : f32
    %7 = vector.broadcast %cst_5 : f32 to vector<128x1xf32>
    %8 = arith.divf %6, %7 : vector<128x1xf32>
    %9 = vector.broadcast %8 : vector<128x1xf32> to vector<128x128xf32>
    %10 = arith.subf %4, %9 : vector<128x128xf32>
    %11 = arith.mulf %10, %10 : vector<128x128xf32>
    %cst_6 = arith.constant dense<0.000000e+00> : vector<128xf32>
    %12 = vector.multi_reduction <add>, %11, %cst_6 [1] : vector<128x128xf32> to vector<128xf32>
    %13 = vector.shape_cast %12 : vector<128xf32> to vector<128x1xf32>
    %cst_7 = arith.constant 1.280000e+02 : f32
    %14 = vector.broadcast %cst_7 : f32 to vector<128x1xf32>
    %15 = arith.divf %13, %14 : vector<128x1xf32>
    %16 = vector.broadcast %8 : vector<128x1xf32> to vector<128x128xf32>
    %17 = arith.subf %4, %16 : vector<128x128xf32>
    %cst_8 = arith.constant 9.99999997E-7 : f32
    %18 = vector.broadcast %cst_8 : f32 to vector<128x1xf32>
    %19 = arith.addf %15, %18 : vector<128x1xf32>
    %20 = math.rsqrt %19 : vector<128x1xf32>
    %21 = vector.broadcast %20 : vector<128x1xf32> to vector<128x128xf32>
    %22 = arith.mulf %17, %21 : vector<128x128xf32>
    %c0_9 = arith.constant 0 : index
    %c0_10 = arith.constant 0 : index
    %23 = vector.load %arg4[%c0_9, %c0_10] : memref<1x128xf32, #tpu.memory_space<vmem>>, vector<1x128xf32>
    %24 = vector.broadcast %23 : vector<1x128xf32> to vector<128x128xf32>
    %25 = arith.mulf %22, %24 : vector<128x128xf32>
    %c0_11 = arith.constant 0 : index
    %c0_12 = arith.constant 0 : index
    %26 = vector.load %arg5[%c0_11, %c0_12] : memref<1x128xf32, #tpu.memory_space<vmem>>, vector<1x128xf32>
    %27 = vector.broadcast %26 : vector<1x128xf32> to vector<128x128xf32>
    %28 = arith.addf %25, %27 : vector<128x128xf32>
    %29 = arith.truncf %28 : vector<128x128xf32> to vector<128x128xbf16>
    %c0_13 = arith.constant 0 : index
    %c0_14 = arith.constant 0 : index
    %30 = vector.load %arg6[%c0_13, %c0_14] : memref<128x512xbf16, #tpu.memory_space<vmem>>, vector<128x512xbf16>
    %cst_15 = arith.constant dense<0.000000e+00> : vector<128x512xf32>
    %31 = tpu.matmul %29, %30, %cst_15 {dimension_numbers = #tpu.dot_dimension_numbers<[1], [0], [0], [1], [0, 0, 1, 1], [], []>} : vector<128x128xbf16>, vector<128x512xbf16>, vector<128x512xf32> -> vector<128x512xf32>
    %c0_16 = arith.constant 0 : index
    %c0_17 = arith.constant 0 : index
    %32 = vector.load %arg7[%c0_16, %c0_17] : memref<1x512xf32, #tpu.memory_space<vmem>>, vector<1x512xf32>
    %33 = vector.broadcast %32 : vector<1x512xf32> to vector<128x512xf32>
    %34 = arith.addf %31, %33 : vector<128x512xf32>
    %cst_18 = arith.constant 0.000000e+00 : f32
    %35 = vector.broadcast %cst_18 : f32 to vector<128x512xf32>
    %36 = arith.maximumf %34, %35 : vector<128x512xf32>
    %37 = arith.truncf %36 : vector<128x512xf32> to vector<128x512xbf16>
    %c0_19 = arith.constant 0 : index
    %c0_20 = arith.constant 0 : index
    %38 = vector.load %arg8[%c0_19, %c0_20] : memref<512x128xbf16, #tpu.memory_space<vmem>>, vector<512x128xbf16>
    %cst_21 = arith.constant dense<0.000000e+00> : vector<128x128xf32>
    %39 = tpu.matmul %37, %38, %cst_21 {dimension_numbers = #tpu.dot_dimension_numbers<[1], [0], [0], [1], [0, 0, 1, 1], [], []>} : vector<128x512xbf16>, vector<512x128xbf16>, vector<128x128xf32> -> vector<128x128xf32>
    %40 = arith.addf %28, %39 : vector<128x128xf32>
    %c0_22 = arith.constant 0 : index
    %c0_23 = arith.constant 0 : index
    %41 = vector.load %arg9[%c0_22, %c0_23] : memref<1x128xf32, #tpu.memory_space<vmem>>, vector<1x128xf32>
    %42 = vector.broadcast %41 : vector<1x128xf32> to vector<128x128xf32>
    %43 = arith.addf %40, %42 : vector<128x128xf32>
    %cst_24 = arith.constant dense<0.000000e+00> : vector<128xf32>
    %44 = vector.multi_reduction <add>, %43, %cst_24 [1] : vector<128x128xf32> to vector<128xf32>
    %45 = vector.shape_cast %44 : vector<128xf32> to vector<128x1xf32>
    %cst_25 = arith.constant 1.280000e+02 : f32
    %46 = vector.broadcast %cst_25 : f32 to vector<128x1xf32>
    %47 = arith.divf %45, %46 : vector<128x1xf32>
    %48 = vector.broadcast %47 : vector<128x1xf32> to vector<128x128xf32>
    %49 = arith.subf %43, %48 : vector<128x128xf32>
    %50 = arith.mulf %49, %49 : vector<128x128xf32>
    %cst_26 = arith.constant dense<0.000000e+00> : vector<128xf32>
    %51 = vector.multi_reduction <add>, %50, %cst_26 [1] : vector<128x128xf32> to vector<128xf32>
    %52 = vector.shape_cast %51 : vector<128xf32> to vector<128x1xf32>
    %cst_27 = arith.constant 1.280000e+02 : f32
    %53 = vector.broadcast %cst_27 : f32 to vector<128x1xf32>
    %54 = arith.divf %52, %53 : vector<128x1xf32>
    %55 = vector.broadcast %47 : vector<128x1xf32> to vector<128x128xf32>
    %56 = arith.subf %43, %55 : vector<128x128xf32>
    %cst_28 = arith.constant 9.99999974E-6 : f32
    %57 = vector.broadcast %cst_28 : f32 to vector<128x1xf32>
    %58 = arith.addf %54, %57 : vector<128x1xf32>
    %59 = math.rsqrt %58 : vector<128x1xf32>
    %60 = vector.broadcast %59 : vector<128x1xf32> to vector<128x128xf32>
    %61 = arith.mulf %56, %60 : vector<128x128xf32>
    %c0_29 = arith.constant 0 : index
    %c0_30 = arith.constant 0 : index
    %62 = vector.load %arg10[%c0_29, %c0_30] : memref<1x128xf32, #tpu.memory_space<vmem>>, vector<1x128xf32>
    %63 = vector.broadcast %62 : vector<1x128xf32> to vector<128x128xf32>
    %64 = arith.mulf %61, %63 : vector<128x128xf32>
    %c0_31 = arith.constant 0 : index
    %c0_32 = arith.constant 0 : index
    %65 = vector.load %arg11[%c0_31, %c0_32] : memref<1x128xf32, #tpu.memory_space<vmem>>, vector<1x128xf32>
    %66 = vector.broadcast %65 : vector<1x128xf32> to vector<128x128xf32>
    %67 = arith.addf %64, %66 : vector<128x128xf32>
    %cst_33 = arith.constant 0.000000e+00 : f32
    %68 = vector.broadcast %cst_33 : f32 to vector<128x128xf32>
    %69 = arith.maximumf %67, %68 : vector<128x128xf32>
    %c0_34 = arith.constant 0 : index
    %c0_35 = arith.constant 0 : index
    %c0_36 = arith.constant 0 : index
    %70 = vector.load %arg12[%c0_34, %c0_35, %c0_36] : memref<1x128x128xf32, #tpu.memory_space<vmem>>, vector<1x128x128xf32>
    %71 = vector.shape_cast %70 : vector<1x128x128xf32> to vector<128x128xf32>
    %72 = vector.shape_cast %69 : vector<128x128xf32> to vector<1x128x128xf32>
    tpu.vector_store %arg12[%c0_34, %c0_35, %c0_36], %72 {strides = array<i32>} : memref<1x128x128xf32, #tpu.memory_space<vmem>>, vector<1x128x128xf32>,
    return
  }
  func.func @transform_0(%arg0: i32, %arg1: i32) -> (i32, i32, i32) {
    %c0_i32 = arith.constant 0 : i32
    %c0_i32_0 = arith.constant 0 : i32
    return %arg0, %arg1, %c0_i32 : i32, i32, i32
  }
  func.func @transform_1(%arg0: i32, %arg1: i32) -> (i32, i32, i32) {
    %c0_i32 = arith.constant 0 : i32
    %c0_i32_0 = arith.constant 0 : i32
    return %arg0, %arg1, %c0_i32 : i32, i32, i32
  }
  func.func @transform_2(%arg0: i32, %arg1: i32) -> (i32, i32) {
    %c0_i32 = arith.constant 0 : i32
    %c0_i32_0 = arith.constant 0 : i32
    %c0_i32_1 = arith.constant 0 : i32
    return %c0_i32, %c0_i32_0 : i32, i32
  }
  func.func @transform_3(%arg0: i32, %arg1: i32) -> (i32, i32) {
    %c0_i32 = arith.constant 0 : i32
    %c0_i32_0 = arith.constant 0 : i32
    %c0_i32_1 = arith.constant 0 : i32
    return %c0_i32, %c0_i32_0 : i32, i32
  }
  func.func @transform_4(%arg0: i32, %arg1: i32) -> (i32, i32) {
    %c0_i32 = arith.constant 0 : i32
    %c0_i32_0 = arith.constant 0 : i32
    %c0_i32_1 = arith.constant 0 : i32
    return %c0_i32, %c0_i32_0 : i32, i32
  }
  func.func @transform_5(%arg0: i32, %arg1: i32) -> (i32, i32) {
    %c0_i32 = arith.constant 0 : i32
    %c0_i32_0 = arith.constant 0 : i32
    %c0_i32_1 = arith.constant 0 : i32
    return %c0_i32, %c0_i32_0 : i32, i32
  }
  func.func @transform_6(%arg0: i32, %arg1: i32) -> (i32, i32) {
    %c0_i32 = arith.constant 0 : i32
    %c0_i32_0 = arith.constant 0 : i32
    %c0_i32_1 = arith.constant 0 : i32
    return %c0_i32, %c0_i32_0 : i32, i32
  }
  func.func @transform_7(%arg0: i32, %arg1: i32) -> (i32, i32) {
    %c0_i32 = arith.constant 0 : i32
    %c0_i32_0 = arith.constant 0 : i32
    %c0_i32_1 = arith.constant 0 : i32
    return %c0_i32, %c0_i32_0 : i32, i32
  }
  func.func @transform_8(%arg0: i32, %arg1: i32) -> (i32, i32) {
    %c0_i32 = arith.constant 0 : i32
    %c0_i32_0 = arith.constant 0 : i32
    %c0_i32_1 = arith.constant 0 : i32
    return %c0_i32, %c0_i32_0 : i32, i32
  }
  func.func @transform_9(%arg0: i32, %arg1: i32) -> (i32, i32) {
    %c0_i32 = arith.constant 0 : i32
    %c0_i32_0 = arith.constant 0 : i32
    %c0_i32_1 = arith.constant 0 : i32
    return %c0_i32, %c0_i32_0 : i32, i32
  }
  func.func @transform_10(%arg0: i32, %arg1: i32) -> (i32, i32, i32) {
    %c0_i32 = arith.constant 0 : i32
    %c0_i32_0 = arith.constant 0 : i32
    return %arg0, %arg1, %c0_i32 : i32, i32, i32
  }
}

</mosaic_0001>

<bundles_post_ra>
// kernel: cross_sa_layer.3
= control target key start
LH: loop header
LB: loop body
LE: loop exit
PB: predicated region body
PF: predicated region fallthrough
CT: control target
= control target key end

     0   :  { %s1026_s15 = smov 0   ;;  %s1028_s16 = smov 0   ;;  %s1177_s0 = inlined_call_operand.vmem [shape: f32[2,256,128], index: 0, kind: input, shape index: {}]   ;;  %s1178_s1 = inlined_call_operand.vmem [shape: bf16[128,128], index: 1, kind: input, shape index: {}]   ;;  %s1179_s2 = inlined_call_operand.vmem [shape: bf16[128,128], index: 2, kind: input, shape index: {}]   ;;  %s1180_s3 = inlined_call_operand.vmem [shape: bf16[2,256,128], index: 3, kind: output, shape index: {0}]   ;;  %s1181_s4 = inlined_call_operand.vmem [shape: bf16[2,256,128], index: 4, kind: output, shape index: {1}]  }
   0x1   :  { %s1030_s17 = smov 0   ;;  %s1032_s18 = smov 0  }
   0x2   :  { %s1034_s19 = smov 0  }
   0x3 LB: > { %s24_s20 = sadd.s32 1, %s991_s17  ;;  %s27_s21 = sadd.s32 1, %s995_s18  ;;  %s999_s19 = sphi %s1034_s19, %s15_s19   ;;  %s995_s18 = sphi %s1032_s18, %s1185_s18   ;;  %s991_s17 = sphi %s1030_s17, %s1184_s17   ;;  %s987_s16 = sphi %s1028_s16, %s1183_s16   ;;  %s983_s15 = sphi %s1026_s15, %s1182_s15  }
   0x4   : > { %p25_p0 = scmp.ge.s32.totalorder %s24_s20, 2  ;;  %p719_p1 = scmp.ge.s32.totalorder %s999_s19, 1 }
   0x5   : > { %p188_p2 = scmp.lt.s32.totalorder %s999_s19, 5 }
   0x6   : > { %s1187_s20 = smov (%p25_p0, %s24_s20), 0  ;;  %s1189_s21 = smov (!%p25_p0, %s27_s21), %s995_s18 }
   0x7   : > { %p189_p3 = pnand %p719_p1, %p188_p2  ;;  %p29_p4 = scmp.ge.s32.totalorder %s1189_s21, 2 }
   0x8   : > { %s720_s30 = sshll.u32 (!%p189_p3), %s983_s15, 4  ;;  %p232_p5 = scmp.lt.s32.totalorder (!%p189_p3), %s987_s16, 1 }
   0x9   : > { %s1191_s21 = smov (%p29_p4, %s1189_s21), 0  ;;  %192 = sbr.rel (%p189_p3) target bundleno = 238 (0xee), region = 32 }
   0xa   : > { %p234_p6 = scmp.lt.s32.totalorder (!%p189_p3), %s720_s30, 31 }
   0xe   : > { %v802_v0 = vld [vmem:[%s1178_s1 + $0x38] sm:$0xff]  ;;  %v801_v2 = vld [vmem:[%s1178_s1 + $0x30] sm:$0xff]  ;;  %v800_v4 = vld [vmem:[%s1178_s1 + $0x28] sm:$0xff]  ;;  %s1193_s16 = smov (!%p232_p5, %s987_s16), 1  ;;  %s1195_s30 = smov (!%p234_p6, %s720_s30), 31 }
   0xf   : > { %v810_v1 = vld [vmem:[%s1179_s2 + $0x38] sm:$0xff]  ;;  %349 = vmatpush.bf16.msra.mxu0 %v802_v0  ;;  %905 = vmatpush.bf16.msra.mxu2 %v802_v0  ;;  %v809_v3 = vld [vmem:[%s1179_s2 + $0x30] sm:$0xff]  ;;  %v808_v5 = vld [vmem:[%s1179_s2 + $0x28] sm:$0xff]  ;;  %s721_s13 = sshll.u32 %s1193_s16, 5 }
  0x10   : > { %462 = vmatpush.bf16.msra.mxu1 %v810_v1  ;;  %913 = vmatpush.bf16.msra.mxu3 %v810_v1  ;;  %v799_v6 = vld [vmem:[%s1178_s1 + $0x20] sm:$0xff]  ;;  %v798_v8 = vld [vmem:[%s1178_s1 + $0x18] sm:$0xff]  ;;  %s1093_s24 = sadd.s32 %s721_s13, %s1195_s30  ;;  %v797_v10 = vld [vmem:[%s1178_s1 + $0x10] sm:$0xff] }
  0x11   : > { %v807_v7 = vld [vmem:[%s1179_s2 + $0x20] sm:$0xff]  ;;  %v806_v9 = vld [vmem:[%s1179_s2 + $0x18] sm:$0xff]  ;;  %v805_v11 = vld [vmem:[%s1179_s2 + $0x10] sm:$0xff]  ;;  %s722_s28 = sshll.u32 %s1093_s24, 3  ;;  %s725_s14 = sshll.u32 %s1093_s24, 2 }
  0x12   : > { %v796_v12 = vld [vmem:[%s1178_s1 + $0x8] sm:$0xff]  ;;  %s1108_s7 = scalar_lea.vmem %s1177_s0, %s722_s28  ;;  %v795_v14 = vld [vmem:[%s1178_s1] sm:$0xff]  ;;  %s1139_s23 = scalar_lea.vmem %s1180_s3, %s725_s14 }
  0x13   : > { %350 = vmatpush.bf16.msra.mxu0 %v801_v2  ;;  %906 = vmatpush.bf16.msra.mxu2 %v801_v2  ;;  %v804_v13 = vld [vmem:[%s1179_s2 + $0x8] sm:$0xff]  ;;  %v261_v15 = vld [vmem:[%s1108_s7] sm:$0xff]  ;;  %v263_v22 = vld [vmem:[%s1108_s7 + $0x10] sm:$0xff]  ;;  %s1144_s16 = scalar_lea.vmem %s1181_s4, %s725_s14 }
  0x14   : > { %463 = vmatpush.bf16.msra.mxu1 %v809_v3  ;;  %914 = vmatpush.bf16.msra.mxu3 %v809_v3  ;;  %v262_v16 = vld [vmem:[%s1108_s7 + $0x8] sm:$0xff]  ;;  %v269_v17 = vld [vmem:[%s1108_s7 + $0x40] sm:$0xff]  ;;  %v264_v23 = vld [vmem:[%s1108_s7 + $0x18] sm:$0xff] }
  0x15   : > { %v270_v18 = vld [vmem:[%s1108_s7 + $0x48] sm:$0xff]  ;;  %v803_v19 = vld [vmem:[%s1179_s2] sm:$0xff]  ;;  %v277_v20 = vpack.c.bf16 %v262_v16, %v261_v15  ;;  %v271_v24 = vld [vmem:[%s1108_s7 + $0x50] sm:$0xff]  ;;  %v278_v26 = vpack.c.bf16 %v264_v23, %v263_v22 }
  0x16   : > { %v281_v21 = vpack.c.bf16 %v270_v18, %v269_v17  ;;  %v272_v25 = vld [vmem:[%s1108_s7 + $0x58] sm:$0xff]  ;;  %v265_v28 = vld [vmem:[%s1108_s7 + $0x20] sm:$0xff]  ;;  %v266_v29 = vld [vmem:[%s1108_s7 + $0x28] sm:$0xff] }
  0x17   : > { %351 = vmatpush.bf16.msra.mxu0 %v800_v4  ;;  %907 = vmatpush.bf16.msra.mxu2 %v800_v4  ;;  %v282_v27 = vpack.c.bf16 %v272_v25, %v271_v24  ;;  %v273_v30 = vld [vmem:[%s1108_s7 + $0x60] sm:$0xff]  ;;  %v274_v31 = vld [vmem:[%s1108_s7 + $0x68] sm:$0xff]  ;;  %v279_v32 = vpack.c.bf16 %v266_v29, %v265_v28  ;;  %v267_v34 = vld [vmem:[%s1108_s7 + $0x30] sm:$0xff] }
  0x18   : > { %464 = vmatpush.bf16.msra.mxu1 %v808_v5  ;;  %915 = vmatpush.bf16.msra.mxu3 %v808_v5  ;;  %v283_v33 = vpack.c.bf16 %v274_v31, %v273_v30  ;;  %v268_v35 = vld [vmem:[%s1108_s7 + $0x38] sm:$0xff]  ;;  %v275_v36 = vld [vmem:[%s1108_s7 + $0x70] sm:$0xff] }
  0x19   : > { %v276_v37 = vld [vmem:[%s1108_s7 + $0x78] sm:$0xff]  ;;  %v280_v38 = vpack.c.bf16 %v268_v35, %v267_v34 }
  0x1a   : > { %v284_v39 = vpack.c.bf16 %v276_v37, %v275_v36 }
  0x1b   : > { %352 = vmatpush.bf16.msra.mxu0 %v799_v6  ;;  %908 = vmatpush.bf16.msra.mxu2 %v799_v6 }
  0x1c   : > { %465 = vmatpush.bf16.msra.mxu1 %v807_v7  ;;  %916 = vmatpush.bf16.msra.mxu3 %v807_v7 }
  0x1f   : > { %353 = vmatpush.bf16.msra.mxu0 %v798_v8  ;;  %909 = vmatpush.bf16.msra.mxu2 %v798_v8 }
  0x20   : > { %466 = vmatpush.bf16.msra.mxu1 %v806_v9  ;;  %917 = vmatpush.bf16.msra.mxu3 %v806_v9 }
  0x23   : > { %354 = vmatpush.bf16.msra.mxu0 %v797_v10  ;;  %910 = vmatpush.bf16.msra.mxu2 %v797_v10 }
  0x24   : > { %467 = vmatpush.bf16.msra.mxu1 %v805_v11  ;;  %918 = vmatpush.bf16.msra.mxu3 %v805_v11 }
  0x27   : > { %355 = vmatpush.bf16.msra.mxu0 %v796_v12  ;;  %911 = vmatpush.bf16.msra.mxu2 %v796_v12 }
  0x28   : > { %468 = vmatpush.bf16.msra.mxu1 %v804_v13  ;;  %919 = vmatpush.bf16.msra.mxu3 %v804_v13 }
  0x2b   : > { %356 = vmatpush.bf16.msra.mxu0 %v795_v14  ;;  %912 = vmatpush.bf16.msra.mxu2 %v795_v14 }
  0x2c   : > { %469 = vmatpush.bf16.msra.mxu1 %v803_v19  ;;  %920 = vmatpush.bf16.msra.mxu3 %v803_v19 }
  0x2e   : > { %357 = vmatmul.bf16.vlgmr.msra.gmra.mxu0 %v277_v20  ;;  %377 = vmatmul.bf16.vlgmr.msra.gmra.mxu2 %v281_v21 }
  0x2f   : > { %470 = vmatmul.bf16.vlgmr.msra.gmra.mxu1 %v277_v20  ;;  %490 = vmatmul.bf16.vlgmr.msra.gmra.mxu3 %v281_v21 }
  0x3e   : > { %362 = vmatmul.bf16.gmra.mxu0 %v278_v26  ;;  %382 = vmatmul.bf16.gmra.mxu2 %v282_v27 }
  0x3f   : > { %475 = vmatmul.bf16.gmra.mxu1 %v278_v26  ;;  %495 = vmatmul.bf16.gmra.mxu3 %v282_v27 }
  0x4e   : > { %367 = vmatmul.bf16.gmra.mxu0 %v279_v32  ;;  %387 = vmatmul.bf16.gmra.mxu2 %v283_v33 }
  0x4f   : > { %480 = vmatmul.bf16.gmra.mxu1 %v279_v32  ;;  %500 = vmatmul.bf16.gmra.mxu3 %v283_v33 }
  0x5e   : > { %372 = vmatmul.bf16.gmra.mxu0 %v280_v38  ;;  %392 = vmatmul.bf16.gmra.mxu2 %v284_v39 }
  0x5f   : > { %485 = vmatmul.bf16.gmra.mxu1 %v280_v38  ;;  %505 = vmatmul.bf16.gmra.mxu3 %v284_v39 }
  0xab   : > { %v358_v40 = vpop.f32.mrf.mxu0 }
  0xac   : > { %v471_v41 = vpop.f32.mrf.mxu1 }
  0xb1   : > { %v378_v42 = vpop.f32.mrf.mxu2 }
  0xb2   : > { %v491_v43 = vpop.f32.mrf.mxu3 }
  0xb3   : > { %v360_v44 = vpop.f32.mrf.mxu0 }
  0xb4   : > { %v814_v45 = vpack.c.bf16 %v360_v44, %v358_v40  ;;  %v473_v46 = vpop.f32.mrf.mxu1 }
  0xb5   : > { %v854_v47 = vpack.c.bf16 %v473_v46, %v471_v41 }
  0xb6   : > { %815 = vst [vmem:[%s1139_s23] sm:$0xff] %v814_v45  }
  0xb7   : > { %855 = vst [vmem:[%s1144_s16] sm:$0xff] %v854_v47  }
  0xb9   : > { %v380_v48 = vpop.f32.mrf.mxu2 }
  0xba   : > { %v834_v49 = vpack.c.bf16 %v380_v48, %v378_v42  ;;  %v493_v50 = vpop.f32.mrf.mxu3 }
  0xbb   : > { %v874_v51 = vpack.c.bf16 %v493_v50, %v491_v43  ;;  %v363_v52 = vpop.f32.mrf.mxu0 }
  0xbc   : > { %894 = vst [vmem:[%s1139_s23 + $0x20] sm:$0xff] %v834_v49   ;;  %v476_v53 = vpop.f32.mrf.mxu1 }
  0xbd   : > { %901 = vst [vmem:[%s1144_s16 + $0x20] sm:$0xff] %v874_v51  }
  0xc1   : > { %v383_v54 = vpop.f32.mrf.mxu2 }
  0xc2   : > { %v496_v55 = vpop.f32.mrf.mxu3 }
  0xc3   : > { %v365_v56 = vpop.f32.mrf.mxu0 }
  0xc4   : > { %v819_v57 = vpack.c.bf16 %v365_v56, %v363_v52  ;;  %v478_v58 = vpop.f32.mrf.mxu1 }
  0xc5   : > { %v859_v59 = vpack.c.bf16 %v478_v58, %v476_v53 }
  0xc6   : > { %891 = vst [vmem:[%s1139_s23 + $0x8] sm:$0xff] %v819_v57  }
  0xc7   : > { %898 = vst [vmem:[%s1144_s16 + $0x8] sm:$0xff] %v859_v59  }
  0xc9   : > { %v385_v60 = vpop.f32.mrf.mxu2 }
  0xca   : > { %v839_v61 = vpack.c.bf16 %v385_v60, %v383_v54  ;;  %v498_v62 = vpop.f32.mrf.mxu3 }
  0xcb   : > { %v879_v63 = vpack.c.bf16 %v498_v62, %v496_v55  ;;  %v368_v0 = vpop.f32.mrf.mxu0 }
  0xcc   : > { %895 = vst [vmem:[%s1139_s23 + $0x28] sm:$0xff] %v839_v61   ;;  %v481_v1 = vpop.f32.mrf.mxu1 }
  0xcd   : > { %902 = vst [vmem:[%s1144_s16 + $0x28] sm:$0xff] %v879_v63  }
  0xd1   : > { %v388_v2 = vpop.f32.mrf.mxu2 }
  0xd2   : > { %v501_v3 = vpop.f32.mrf.mxu3 }
  0xd3   : > { %v370_v4 = vpop.f32.mrf.mxu0 }
  0xd4   : > { %v824_v5 = vpack.c.bf16 %v370_v4, %v368_v0  ;;  %v483_v6 = vpop.f32.mrf.mxu1 }
  0xd5   : > { %v864_v7 = vpack.c.bf16 %v483_v6, %v481_v1 }
  0xd6   : > { %892 = vst [vmem:[%s1139_s23 + $0x10] sm:$0xff] %v824_v5  }
  0xd7   : > { %899 = vst [vmem:[%s1144_s16 + $0x10] sm:$0xff] %v864_v7  }
  0xd9   : > { %v390_v8 = vpop.f32.mrf.mxu2 }
  0xda   : > { %v844_v9 = vpack.c.bf16 %v390_v8, %v388_v2  ;;  %v503_v10 = vpop.f32.mrf.mxu3 }
  0xdb   : > { %v884_v11 = vpack.c.bf16 %v503_v10, %v501_v3  ;;  %v373_v12 = vpop.f32.mrf.mxu0 }
  0xdc   : > { %896 = vst [vmem:[%s1139_s23 + $0x30] sm:$0xff] %v844_v9   ;;  %v486_v13 = vpop.f32.mrf.mxu1 }
  0xdd   : > { %903 = vst [vmem:[%s1144_s16 + $0x30] sm:$0xff] %v884_v11  }
  0xe1   : > { %v393_v14 = vpop.f32.mrf.mxu2 }
  0xe2   : > { %v506_v15 = vpop.f32.mrf.mxu3 }
  0xe3   : > { %v375_v16 = vpop.f32.mrf.mxu0 }
  0xe4   : > { %v829_v17 = vpack.c.bf16 %v375_v16, %v373_v12  ;;  %v488_v18 = vpop.f32.mrf.mxu1 }
  0xe5   : > { %v869_v19 = vpack.c.bf16 %v488_v18, %v486_v13 }
  0xe6   : > { %893 = vst [vmem:[%s1139_s23 + $0x18] sm:$0xff] %v829_v17  }
  0xe7   : > { %900 = vst [vmem:[%s1144_s16 + $0x18] sm:$0xff] %v869_v19  }
  0xe9   : > { %v395_v20 = vpop.f32.mrf.mxu2 }
  0xea   : > { %v849_v21 = vpack.c.bf16 %v395_v20, %v393_v14  ;;  %v508_v22 = vpop.f32.mrf.mxu3 }
  0xeb   : > { %v889_v23 = vpack.c.bf16 %v508_v22, %v506_v15 }
  0xec   : > { %897 = vst [vmem:[%s1139_s23 + $0x38] sm:$0xff] %v849_v21  }
  0xed   : > { %904 = vst [vmem:[%s1144_s16 + $0x38] sm:$0xff] %v889_v23  }
  0xee PF: > { %s15_s19 = sadd.s32 1, %s999_s19   ;;  %s1182_s15 = smov %s991_s17 }
  0xef   : > { %p12_p7 = scmp.ge.s32.totalorder %s15_s19, 6   ;;  %s1183_s16 = smov %s995_s18 }
  0xf0   : > { %s1184_s17 = smov %s1187_s20  ;;  %s1185_s18 = smov %s1191_s21 }
  0xf1   :  { %14 = sbr.rel (!%p12_p7) target bundleno = 3 (0x3), region = 74 }

// kernel: cross_sa_layer.4
= control target key start
LH: loop header
LB: loop body
LE: loop exit
PB: predicated region body
PF: predicated region fallthrough
CT: control target
= control target key end

     0   :  { %s1910_s15 = smov 0   ;;  %s1912_s16 = smov 0   ;;  %s2449_s0 = inlined_call_operand.vmem [shape: f32[4,256,128], index: 0, kind: input, shape index: {}]   ;;  %s2450_s1 = inlined_call_operand.vmem [shape: bf16[2,256,128], index: 1, kind: input, shape index: {}]   ;;  %s2451_s2 = inlined_call_operand.vmem [shape: bf16[2,256,128], index: 2, kind: input, shape index: {}]   ;;  %s2452_s3 = inlined_call_operand.vmem [shape: bf16[128,128], index: 3, kind: input, shape index: {}]   ;;  %s2453_s4 = inlined_call_operand.vmem [shape: f32[2,256,128], index: 4, kind: output, shape index: {}]  }
   0x1   :  { %s1914_s17 = smov 0   ;;  %s1916_s18 = smov 0  }
   0x2   :  { %s1918_s19 = smov 0   ;;  %s1920_s20 = smov 0  }
   0x3   :  { %s1922_s21 = smov 0  }
   0x4 LB: > { %s26_s22 = sadd.s32 1, %s1870_s18  ;;  %s29_s23 = sadd.s32 1, %s1874_s19  ;;  %s1882_s21 = sphi %s1922_s21, %s14_s21   ;;  %s1878_s20 = sphi %s1920_s20, %s2459_s20   ;;  %s1874_s19 = sphi %s1918_s19, %s2458_s19   ;;  %s1870_s18 = sphi %s1916_s18, %s2457_s18   ;;  %s1866_s17 = sphi %s1914_s17, %s2456_s17   ;;  %s1862_s16 = sphi %s1912_s16, %s2455_s16   ;;  %s1858_s15 = sphi %s1910_s15, %s2454_s15  }
   0x5   : > { %p27_p0 = scmp.ge.s32.totalorder %s26_s22, 2  ;;  %p1497_p1 = scmp.ge.s32.totalorder %s1882_s21, 1 }
   0x6   : > { %p335_p2 = scmp.lt.s32.totalorder %s1882_s21, 9  ;;  %s33_s24 = sadd.s32 1, %s1878_s20 }
   0x7   : > { %s2461_s22 = smov (%p27_p0, %s26_s22), 0  ;;  %s2463_s23 = smov (!%p27_p0, %s29_s23), %s1874_s19 }
   0x8   : > { %p336_p3 = pnand %p1497_p1, %p335_p2  ;;  %p31_p4 = scmp.ge.s32.totalorder %s2463_s23, 2 }
   0x9   : > { %s1498_s25 = sshll.u32 (!%p336_p3), %s1866_s17, 1  ;;  %s1499_s26 = sshll.u32 (!%p336_p3), %s1858_s15, 4 }
   0xa   : > { %s2465_s23 = smov (%p31_p4, %s2463_s23), 0  ;;  %s2467_s24 = smov (!%p31_p4, %s33_s24), %s1878_s20 }
   0xb   : > { %p35_p5 = scmp.ge.s32.totalorder %s2467_s24, 2  ;;  %339 = sbr.rel (%p336_p3) target bundleno = 1094 (0x446), region = 36 }
   0xc   : > { %s410_s27 = sadd.s32 (!%p336_p3), %s1862_s16, %s1498_s25  ;;  %p414_p6 = scmp.lt.s32.totalorder (!%p336_p3), %s1499_s26, 31 }
   0xd   : > { %s2469_s24 = smov (%p35_p5, %s2467_s24), 0  ;;  %p412_p7 = scmp.lt.s32.totalorder (!%p336_p3), %s410_s27, 3 }
   0xe   : > { %p425_p8 = scmp.lt.s32.totalorder (!%p336_p3), %s410_s27, 0  ;;  %s426_s29 = ssub.s32 (!%p336_p3), 0, %s410_s27 }
   0xf   : > { %p494_p9 = scmp.lt.s32.totalorder (!%p336_p3), %s1866_s17, 1  ;;  %s1503_s5 = smin.u32 (!%p336_p3), %s426_s29, %s410_s27 }
  0x10   : > { %s2471_s26 = smov (!%p414_p6, %s1499_s26), 31  ;;  %s428_s7 = sand.u32 1, %s1503_s5  }
  0x11   : > { %s413_s28 = scalar_select %p412_p7, %s410_s27, 3 }
  0x12   : > { %s429_s9 = ssub.s32 0, %s428_s7  ;;  %p499_p10 = scmp.eq.s32.totalorder %s1862_s16, 0 }
  0x13   : > { %s1500_s30 = sshll.u32 %s413_s28, 5  ;;  %s2473_s9 = smov (!%p425_p8, %s429_s9), %s428_s7 }
  0x14   : > { %s417_s6 = sadd.s32 %s1500_s30, %s2471_s26  ;;  %s2475_s17 = smov (!%p494_p9, %s1866_s17), 1 }
  0x15   : > { %s1501_s8 = sshll.u32 %s417_s6, 3  ;;  %p1505_p11 = scmp.lt.s32.totalorder %s2473_s9, 0 }
  0x16   : > { %s1965_s12 = scalar_lea.vmem %s2449_s0, %s1501_s8  ;;  %s435_s13 = sadd.s32 2, %s2473_s9 }
  0x17   : > { %s1648_s14 = sshll.u32 %s2475_s17, 8  ;;  %p500_p12 = scmp.eq.s32.totalorder %s1858_s15, 0 }
  0x18   : > { %s2477_s13 = smov (!%p1505_p11, %s435_s13), %s2473_s9  ;;  %s1973_s27 = scalar_lea.vmem %s2453_s4, %s1648_s14 }
  0x19   : > { %p501_p13 = pnand %p500_p12, %p499_p10  ;;  %p437_p0 = scmp.lt.s32.totalorder %s2477_s13, 1 }
  0x1b   : > { %s2479_s13 = smov (!%p437_p0, %s2477_s13), 1  ;;  %504 = sbr.rel (%p501_p13) target bundleno = 65 (0x41), region = 40 }
  0x1c   : > { %s1647_s29 = sshll.u32 %s2479_s13, 7  ;;  %s1513_s30 = sshll.u32 %s2479_s13, 5 }
  0x1d   : > { %s1978_s16 = scalar_lea.vmem %s2450_s1, %s1647_s29  ;;  %s476_s7 = sadd.s32 %s1513_s30, %s2471_s26 }
  0x1e   : > { %s1514_s8 = sshll.u32 %s476_s7, 2 }
  0x1f   : > { %s1983_s9 = scalar_lea.vmem %s2451_s2, %s1514_s8 }
  0x20   : > { %v1884_v0 = vmov 0.0  }
  0x21   : > { %505 = vst [vmem:[%s1973_s27] sm:$0xff] %v1884_v0 }
  0x22   : > { %506 = vst [vmem:[%s1973_s27 + $0x8] sm:$0xff] %v1884_v0 }
  0x23   : > { %507 = vst [vmem:[%s1973_s27 + $0x10] sm:$0xff] %v1884_v0 }
  0x24   : > { %508 = vst [vmem:[%s1973_s27 + $0x18] sm:$0xff] %v1884_v0 }
  0x25   : > { %509 = vst [vmem:[%s1973_s27 + $0x20] sm:$0xff] %v1884_v0 }
  0x26   : > { %510 = vst [vmem:[%s1973_s27 + $0x28] sm:$0xff] %v1884_v0 }
  0x27   : > { %511 = vst [vmem:[%s1973_s27 + $0x30] sm:$0xff] %v1884_v0 }
  0x28   : > { %512 = vst [vmem:[%s1973_s27 + $0x38] sm:$0xff] %v1884_v0 }
  0x29   : > { %513 = vst [vmem:[%s1973_s27 + $0x40] sm:$0xff] %v1884_v0 }
  0x2a   : > { %514 = vst [vmem:[%s1973_s27 + $0x48] sm:$0xff] %v1884_v0 }
  0x2b   : > { %515 = vst [vmem:[%s1973_s27 + $0x50] sm:$0xff] %v1884_v0 }
  0x2c   : > { %516 = vst [vmem:[%s1973_s27 + $0x58] sm:$0xff] %v1884_v0 }
  0x2d   : > { %517 = vst [vmem:[%s1973_s27 + $0x60] sm:$0xff] %v1884_v0 }
  0x2e   : > { %518 = vst [vmem:[%s1973_s27 + $0x68] sm:$0xff] %v1884_v0 }
  0x2f   : > { %519 = vst [vmem:[%s1973_s27 + $0x70] sm:$0xff] %v1884_v0 }
  0x30   : > { %520 = vst [vmem:[%s1973_s27 + $0x78] sm:$0xff] %v1884_v0 }
  0x31   : > { %521 = vst [vmem:[%s1973_s27 + $0x80] sm:$0xff] %v1884_v0 }
  0x32   : > { %522 = vst [vmem:[%s1973_s27 + $0x88] sm:$0xff] %v1884_v0 }
  0x33   : > { %523 = vst [vmem:[%s1973_s27 + $0x90] sm:$0xff] %v1884_v0 }
  0x34   : > { %524 = vst [vmem:[%s1973_s27 + $0x98] sm:$0xff] %v1884_v0 }
  0x35   : > { %525 = vst [vmem:[%s1973_s27 + $0xa0] sm:$0xff] %v1884_v0 }
  0x36   : > { %526 = vst [vmem:[%s1973_s27 + $0xa8] sm:$0xff] %v1884_v0 }
  0x37   : > { %527 = vst [vmem:[%s1973_s27 + $0xb0] sm:$0xff] %v1884_v0 }
  0x38   : > { %528 = vst [vmem:[%s1973_s27 + $0xb8] sm:$0xff] %v1884_v0 }
  0x39   : > { %529 = vst [vmem:[%s1973_s27 + $0xc0] sm:$0xff] %v1884_v0 }
  0x3a   : > { %530 = vst [vmem:[%s1973_s27 + $0xc8] sm:$0xff] %v1884_v0 }
  0x3b   : > { %531 = vst [vmem:[%s1973_s27 + $0xd0] sm:$0xff] %v1884_v0 }
  0x3c   : > { %532 = vst [vmem:[%s1973_s27 + $0xd8] sm:$0xff] %v1884_v0 }
  0x3d   : > { %533 = vst [vmem:[%s1973_s27 + $0xe0] sm:$0xff] %v1884_v0 }
  0x3e   : > { %534 = vst [vmem:[%s1973_s27 + $0xe8] sm:$0xff] %v1884_v0 }
  0x3f   : > { %535 = vst [vmem:[%s1973_s27 + $0xf0] sm:$0xff] %v1884_v0 }
  0x40   : > { %536 = vst [vmem:[%s1973_s27 + $0xf8] sm:$0xff] %v1884_v0 }
  0x41 PF: > { %v1656_v1 = vld [vmem:[%s2452_s3 + $0x38] sm:$0xff]  ;;  %v1655_v2 = vld [vmem:[%s2452_s3 + $0x30] sm:$0xff]  ;;  %v1654_v3 = vld [vmem:[%s2452_s3 + $0x28] sm:$0xff] }
  0x42   : > { %625 = vmatpush.bf16.msra.mxu0 %v1656_v1  ;;  %v1653_v4 = vld [vmem:[%s2452_s3 + $0x20] sm:$0xff]  ;;  %v1652_v5 = vld [vmem:[%s2452_s3 + $0x18] sm:$0xff]  ;;  %v1651_v6 = vld [vmem:[%s2452_s3 + $0x10] sm:$0xff] }
  0x43   : > { %v1650_v7 = vld [vmem:[%s2452_s3 + $0x8] sm:$0xff]  ;;  %v1649_v8 = vld [vmem:[%s2452_s3] sm:$0xff]  ;;  %v539_v12 = vld [vmem:[%s1965_s12 + $0x10] sm:$0xff] }
  0x44   : > { %v537_v9 = vld [vmem:[%s1965_s12] sm:$0xff]  ;;  %v538_v10 = vld [vmem:[%s1965_s12 + $0x8] sm:$0xff]  ;;  %v540_v13 = vld [vmem:[%s1965_s12 + $0x18] sm:$0xff] }
  0x45   : > { %v553_v11 = vpack.c.bf16 %v538_v10, %v537_v9  ;;  %v554_v14 = vpack.c.bf16 %v540_v13, %v539_v12  ;;  %v541_v15 = vld [vmem:[%s1965_s12 + $0x20] sm:$0xff]  ;;  %v542_v16 = vld [vmem:[%s1965_s12 + $0x28] sm:$0xff]  ;;  %v543_v18 = vld [vmem:[%s1965_s12 + $0x30] sm:$0xff] }
  0x46   : > { %626 = vmatpush.bf16.msra.mxu0 %v1655_v2  ;;  %v555_v17 = vpack.c.bf16 %v542_v16, %v541_v15  ;;  %v544_v19 = vld [vmem:[%s1965_s12 + $0x38] sm:$0xff]  ;;  %v545_v21 = vld [vmem:[%s1965_s12 + $0x40] sm:$0xff]  ;;  %v546_v22 = vld [vmem:[%s1965_s12 + $0x48] sm:$0xff] }
  0x47   : > { %v556_v20 = vpack.c.bf16 %v544_v19, %v543_v18  ;;  %v557_v23 = vpack.c.bf16 %v546_v22, %v545_v21  ;;  %v547_v24 = vld [vmem:[%s1965_s12 + $0x50] sm:$0xff]  ;;  %v548_v25 = vld [vmem:[%s1965_s12 + $0x58] sm:$0xff]  ;;  %v549_v27 = vld [vmem:[%s1965_s12 + $0x60] sm:$0xff] }
  0x48   : > { %v558_v26 = vpack.c.bf16 %v548_v25, %v547_v24  ;;  %v550_v28 = vld [vmem:[%s1965_s12 + $0x68] sm:$0xff]  ;;  %v551_v30 = vld [vmem:[%s1965_s12 + $0x70] sm:$0xff]  ;;  %v552_v31 = vld [vmem:[%s1965_s12 + $0x78] sm:$0xff] }
  0x49   : > { %v559_v29 = vpack.c.bf16 %v550_v28, %v549_v27  ;;  %v560_v32 = vpack.c.bf16 %v552_v31, %v551_v30  ;;  %v1657_v57 = vld [vmem:[%s1978_s16] sm:$0xff]  ;;  %v1666_v58 = vld [vmem:[%s1978_s16 + $0x48] sm:$0xff]  ;;  %v1667_v60 = vld [vmem:[%s1978_s16 + $0x50] sm:$0xff] }
  0x4a   : > { %627 = vmatpush.bf16.msra.mxu0 %v1654_v3  ;;  %v1658_v59 = vld [vmem:[%s1978_s16 + $0x8] sm:$0xff]  ;;  %v1659_v61 = vld [vmem:[%s1978_s16 + $0x10] sm:$0xff]  ;;  %v1668_v62 = vld [vmem:[%s1978_s16 + $0x58] sm:$0xff] }
  0x4b   : > { %v1660_v63 = vld [vmem:[%s1978_s16 + $0x18] sm:$0xff]  ;;  %v1669_v0 = vld [vmem:[%s1978_s16 + $0x60] sm:$0xff]  ;;  %v1670_v2 = vld [vmem:[%s1978_s16 + $0x68] sm:$0xff] }
  0x4c   : > { %v1661_v1 = vld [vmem:[%s1978_s16 + $0x20] sm:$0xff]  ;;  %v1662_v3 = vld [vmem:[%s1978_s16 + $0x28] sm:$0xff] }
  0x4e   : > { %628 = vmatpush.bf16.msra.mxu0 %v1653_v4  ;;  %v1671_v4 = vld [vmem:[%s1978_s16 + $0x70] sm:$0xff] }
  0x52   : > { %629 = vmatpush.bf16.msra.mxu0 %v1652_v5  ;;  %v1663_v5 = vld [vmem:[%s1978_s16 + $0x30] sm:$0xff] }
  0x56   : > { %630 = vmatpush.bf16.msra.mxu0 %v1651_v6  ;;  %v1672_v6 = vld [vmem:[%s1978_s16 + $0x78] sm:$0xff] }
  0x5a   : > { %631 = vmatpush.bf16.msra.mxu0 %v1650_v7  ;;  %v1664_v7 = vld [vmem:[%s1978_s16 + $0x38] sm:$0xff] }
  0x5e   : > { %632 = vmatpush.bf16.msra.mxu0 %v1649_v8  ;;  %v1665_v8 = vld [vmem:[%s1978_s16 + $0x40] sm:$0xff] }
  0x61   : > { %633 = vmatmul.bf16.vlgmr.msra.gmra.mxu0 %v553_v11 }
  0x71   : > { %638 = vmatmul.bf16.gmra.mxu0 %v554_v14 }
  0x81   : > { %643 = vmatmul.bf16.gmra.mxu0 %v555_v17 }
  0x91   : > { %648 = vmatmul.bf16.gmra.mxu0 %v556_v20 }
  0xa1   : > { %653 = vmatmul.bf16.gmra.mxu0 %v557_v23 }
  0xb1   : > { %658 = vmatmul.bf16.gmra.mxu0 %v558_v26 }
  0xc1   : > { %663 = vmatmul.bf16.gmra.mxu0 %v559_v29 }
  0xd1   : > { %668 = vmatmul.bf16.gmra.mxu0 %v560_v32 }
  0xde   : > { %v634_v33 = vpop.f32.mrf.mxu0 }
  0xe6   : > { %v636_v34 = vpop.f32.mrf.mxu0 }
  0xe7   : > { %v706_v35 = vpack.c.bf16 %v636_v34, %v634_v33 }
  0xee   : > { %v639_v36 = vpop.f32.mrf.mxu0 }
  0xf6   : > { %v641_v37 = vpop.f32.mrf.mxu0 }
  0xf7   : > { %v707_v38 = vpack.c.bf16 %v641_v37, %v639_v36 }
  0xfe   : > { %v644_v39 = vpop.f32.mrf.mxu0 }
 0x106   : > { %v646_v40 = vpop.f32.mrf.mxu0 }
 0x107   : > { %v708_v41 = vpack.c.bf16 %v646_v40, %v644_v39 }
 0x10e   : > { %v649_v42 = vpop.f32.mrf.mxu0 }
 0x116   : > { %v651_v43 = vpop.f32.mrf.mxu0 }
 0x117   : > { %v709_v44 = vpack.c.bf16 %v651_v43, %v649_v42 }
 0x11e   : > { %v654_v45 = vpop.f32.mrf.mxu0 }
 0x126   : > { %v656_v46 = vpop.f32.mrf.mxu0 }
 0x127   : > { %v710_v47 = vpack.c.bf16 %v656_v46, %v654_v45 }
 0x12e   : > { %v659_v48 = vpop.f32.mrf.mxu0 }
 0x136   : > { %v661_v49 = vpop.f32.mrf.mxu0 }
 0x137   : > { %v711_v56 = vpack.c.bf16 %v661_v49, %v659_v48 }
 0x13e   : > { %v664_v50 = vpop.f32.mrf.mxu0 }
 0x146   : > { %v666_v51 = vpop.f32.mrf.mxu0 }
 0x147   : > { %v712_v55 = vpack.c.bf16 %v666_v51, %v664_v50 }
 0x14e   : > { %v669_v52 = vpop.f32.mrf.mxu0 }
 0x156   : > { %v671_v53 = vpop.f32.mrf.mxu0 }
 0x157   : > { %v713_v54 = vpack.c.bf16 %v671_v53, %v669_v52 }
 0x159   : > { %810 = vmatpush.bf16.xpose.msra.mxu1 %v713_v54  ;;  %1681 = vmatpush.bf16.xpose.msra.mxu3 %v713_v54 }
 0x161   : > { %811 = vmatpush.bf16.xpose.msra.mxu1 %v712_v55  ;;  %1682 = vmatpush.bf16.xpose.msra.mxu3 %v712_v55 }
 0x169   : > { %812 = vmatpush.bf16.xpose.msra.mxu1 %v711_v56  ;;  %1683 = vmatpush.bf16.xpose.msra.mxu3 %v711_v56 }
 0x171   : > { %813 = vmatpush.bf16.xpose.msra.mxu1 %v710_v47  ;;  %1684 = vmatpush.bf16.xpose.msra.mxu3 %v710_v47 }
 0x179   : > { %814 = vmatpush.bf16.xpose.msra.mxu1 %v709_v44  ;;  %1685 = vmatpush.bf16.xpose.msra.mxu3 %v709_v44 }
 0x181   : > { %815 = vmatpush.bf16.xpose.msra.mxu1 %v708_v41  ;;  %1686 = vmatpush.bf16.xpose.msra.mxu3 %v708_v41 }
 0x189   : > { %816 = vmatpush.bf16.xpose.msra.mxu1 %v707_v38  ;;  %1687 = vmatpush.bf16.xpose.msra.mxu3 %v707_v38 }
 0x191   : > { %817 = vmatpush.bf16.xpose.msra.mxu1 %v706_v35  ;;  %1688 = vmatpush.bf16.xpose.msra.mxu3 %v706_v35 }
 0x198   : > { %818 = vmatmul.bf16.vlgmr.msra.gmra.mxu1 %v1657_v57  ;;  %863 = vmatmul.bf16.vlgmr.msra.gmra.mxu3 %v1666_v58 }
 0x1a8   : > { %823 = vmatmul.bf16.gmra.mxu1 %v1658_v59  ;;  %868 = vmatmul.bf16.gmra.mxu3 %v1667_v60 }
 0x1b8   : > { %828 = vmatmul.bf16.gmra.mxu1 %v1659_v61  ;;  %873 = vmatmul.bf16.gmra.mxu3 %v1668_v62 }
 0x1c8   : > { %833 = vmatmul.bf16.gmra.mxu1 %v1660_v63  ;;  %878 = vmatmul.bf16.gmra.mxu3 %v1669_v0 }
 0x1d8   : > { %838 = vmatmul.bf16.gmra.mxu1 %v1661_v1  ;;  %883 = vmatmul.bf16.gmra.mxu3 %v1670_v2 }
 0x1e8   : > { %843 = vmatmul.bf16.gmra.mxu1 %v1662_v3  ;;  %888 = vmatmul.bf16.gmra.mxu3 %v1671_v4 }
 0x1f8   : > { %848 = vmatmul.bf16.gmra.mxu1 %v1663_v5  ;;  %893 = vmatmul.bf16.gmra.mxu3 %v1672_v6 }
 0x208   : > { %853 = vmatmul.bf16.gmra.mxu1 %v1664_v7 }
 0x215   : > { %v2073_v9 = vpop.f32.mrf.mxu1 }
 0x218   : > { %858 = vmatmul.bf16.gmra.mxu1 %v1665_v8 }
 0x21b   : > { %v2077_v11 = vpop.f32.mrf.mxu3 }
 0x21d   : > { %v2075_v10 = vpop.f32.mrf.mxu1 }
 0x223   : > { %v2081_v13 = vpop.f32.mrf.mxu3 }
 0x225   : > { %v2079_v12 = vpop.f32.mrf.mxu1 }
 0x22b   : > { %v2085_v15 = vpop.f32.mrf.mxu3 }
 0x22d   : > { %v2083_v14 = vpop.f32.mrf.mxu1 }
 0x233   : > { %v2089_v17 = vpop.f32.mrf.mxu3 }
 0x235   : > { %v2087_v16 = vpop.f32.mrf.mxu1 }
 0x236   : > { %v899_v40 = vmax.f32 %v2073_v9, %v2087_v16 }
 0x23b   : > { %v2095_v20 = vpop.f32.mrf.mxu3 }
 0x23d   : > { %v2091_v18 = vpop.f32.mrf.mxu1 }
 0x23e   : > { %v900_v49 = vmax.f32 %v2075_v10, %v2091_v18 }
 0x243   : > { %v2099_v22 = vpop.f32.mrf.mxu3 }
 0x245   : > { %v2093_v19 = vpop.f32.mrf.mxu1 }
 0x246   : > { %v901_v38 = vmax.f32 %v2079_v12, %v2093_v19 }
 0x24b   : > { %v2103_v24 = vpop.f32.mrf.mxu3 }
 0x24d   : > { %v2097_v21 = vpop.f32.mrf.mxu1 }
 0x24e   : > { %v902_v37 = vmax.f32 %v2083_v14, %v2097_v21 }
 0x253   : > { %v2107_v26 = vpop.f32.mrf.mxu3 }
 0x255   : > { %v2101_v23 = vpop.f32.mrf.mxu1 }
 0x256   : > { %v903_v43 = vmax.f32 %v899_v40, %v2101_v23 }
 0x25b   : > { %v2113_v29 = vpop.f32.mrf.mxu3 }
 0x25d   : > { %v2105_v25 = vpop.f32.mrf.mxu1 }
 0x25e   : > { %v904_v52 = vmax.f32 %v900_v49, %v2105_v25 }
 0x263   : > { %v2117_v31 = vpop.f32.mrf.mxu3 }
 0x265   : > { %v2109_v27 = vpop.f32.mrf.mxu1 }
 0x266   : > { %v905_v41 = vmax.f32 %v901_v38, %v2109_v27 }
 0x26b   : > { %v2121_v33 = vpop.f32.mrf.mxu3 }
 0x26d   : > { %v2111_v28 = vpop.f32.mrf.mxu1 }
 0x26e   : > { %v906_v39 = vmax.f32 %v902_v37, %v2111_v28 }
 0x273   : > { %v2125_v35 = vpop.f32.mrf.mxu3 }
 0x275   : > { %v2115_v30 = vpop.f32.mrf.mxu1 }
 0x276   : > { %v907_v47 = vmax.f32 %v903_v43, %v2115_v30 }
 0x27b   : > { %v2140_v45 = vpop.f32.mrf.mxu3 }
 0x27d   : > { %v2119_v32 = vpop.f32.mrf.mxu1 }
 0x27e   : > { %v908_v54 = vmax.f32 %v904_v52, %v2119_v32 }
 0x283   : > { %v2159_v60 = vpop.f32.mrf.mxu3 }
 0x285   : > { %v2123_v34 = vpop.f32.mrf.mxu1 }
 0x286   : > { %v909_v44 = vmax.f32 %v905_v41, %v2123_v34 }
 0x288   : > { %v913_v50 = vmax.f32 %v909_v44, %v2077_v11 }
 0x28a   : > { %v917_v55 = vmax.f32 %v913_v50, %v2095_v20 }
 0x28c   : > { %v921_v61 = vmax.f32 %v917_v55, %v2113_v29 }
 0x28d   : > { %v2127_v36 = vpop.f32.mrf.mxu1 }
 0x28e   : > { %v910_v42 = vmax.f32 %v906_v39, %v2127_v36  ;;  %v925_v2 = vmax.f32 %v921_v61, %v2140_v45 }
 0x290   : > { %v914_v48 = vmax.f32 %v910_v42, %v2081_v13 }
 0x292   : > { %v918_v53 = vmax.f32 %v914_v48, %v2099_v22 }
 0x294   : > { %v922_v58 = vmax.f32 %v918_v53, %v2117_v31 }
 0x295   : > { %v2142_v46 = vpop.f32.mrf.mxu1 }
 0x296   : > { %v911_v51 = vmax.f32 %v907_v47, %v2142_v46  ;;  %v926_v0 = vmax.f32 %v922_v58, %v2159_v60 }
 0x298   : > { %v915_v56 = vmax.f32 %v911_v51, %v2085_v15  ;;  %v928_v5 = vmax.f32 %v925_v2, %v926_v0 }
 0x29a   : > { %v919_v62 = vmax.f32 %v915_v56, %v2103_v24 }
 0x29c   : > { %v923_v3 = vmax.f32 %v919_v62, %v2121_v33 }
 0x29d   : > { %v2155_v57 = vpop.f32.mrf.mxu1 }
 0x29e   : > { %v912_v59 = vmax.f32 %v908_v54, %v2155_v57 }
 0x2a0   : > { %v916_v63 = vmax.f32 %v912_v59, %v2089_v17 }
 0x2a2   : > { %v920_v1 = vmax.f32 %v916_v63, %v2107_v26 }
 0x2a4   : > { %v924_v4 = vmax.f32 %v920_v1, %v2125_v35 }
 0x2a6   : > { %v927_v6 = vmax.f32 %v923_v3, %v924_v4 }
 0x2a8   : > { %v929_v7 = vmax.f32 %v927_v6, %v928_v5 }
 0x2aa   : > { %v930_v8 = vrot.slane %v929_v7, 4 }
 0x2ac   : > { %v931_v37 = vmax.f32 %v929_v7, %v930_v8 }
 0x2ae   : > { %v932_v38 = vrot.slane %v931_v37, 2 }
 0x2b0   : > { %v933_v39 = vmax.f32 %v931_v37, %v932_v38 }
 0x2b2   : > { %v934_v40 = vrot.slane %v933_v39, 1 }
 0x2b4   : > { %v2169_v41 = vmax.f32 %v933_v39, %v934_v40 }
 0x2b6   : > { %v936_v42 = vsub.f32 %v2073_v9, %v2169_v41  ;;  %v937_v43 = vsub.f32 %v2075_v10, %v2169_v41  ;;  %v938_v44 = vsub.f32 %v2079_v12, %v2169_v41  ;;  %v939_v47 = vsub.f32 %v2083_v14, %v2169_v41 }
 0x2b7   : > { %v940_v50 = vsub.f32 %v2087_v16, %v2169_v41  ;;  %v941_v52 = vsub.f32 %v2091_v18, %v2169_v41  ;;  %v942_v10 = vsub.f32 %v2093_v19, %v2169_v41  ;;  %v943_v14 = vsub.f32 %v2097_v21, %v2169_v41 }
 0x2b8   : > { %v968_v48 = vmul.f32 1.442695, %v936_v42  ;;  %v970_v49 = vmul.f32 1.442695, %v937_v43  ;;  %v972_v51 = vmul.f32 1.442695, %v938_v44  ;;  %v944_v55 = vsub.f32 %v2101_v23, %v2169_v41 }
 0x2b9   : > { %v974_v9 = vmul.f32 1.442695, %v939_v47  ;;  %v976_v12 = vmul.f32 1.442695, %v940_v50  ;;  %v978_v53 = vmul.f32 1.442695, %v941_v52  ;;  %v945_v58 = vsub.f32 %v2105_v25, %v2169_v41 }
 0x2ba   : > { %1762 = vpow2.f32 %v968_v48  ;;  %v980_v18 = vmul.f32 1.442695, %v942_v10  ;;  %v982_v21 = vmul.f32 1.442695, %v943_v14  ;;  %v946_v62 = vsub.f32 %v2109_v27, %v2169_v41 }
 0x2bb   : > { %1764 = vpow2.f32 %v970_v49  ;;  %v984_v23 = vmul.f32 1.442695, %v944_v55  ;;  %v947_v1 = vsub.f32 %v2111_v28, %v2169_v41  ;;  %v986_v25 = vmul.f32 1.442695, %v945_v58 }
 0x2bc   : > { %1766 = vpow2.f32 %v972_v51  ;;  %v948_v4 = vsub.f32 %v2115_v30, %v2169_v41  ;;  %v988_v27 = vmul.f32 1.442695, %v946_v62  ;;  %v949_v7 = vsub.f32 %v2119_v32, %v2169_v41 }
 0x2bd   : > { %1768 = vpow2.f32 %v974_v9  ;;  %v990_v28 = vmul.f32 1.442695, %v947_v1  ;;  %v950_v38 = vsub.f32 %v2123_v34, %v2169_v41  ;;  %v951_v42 = vsub.f32 %v2127_v36, %v2169_v41 }
 0x2be   : > { %1770 = vpow2.f32 %v976_v12  ;;  %v992_v30 = vmul.f32 1.442695, %v948_v4  ;;  %v994_v32 = vmul.f32 1.442695, %v949_v7  ;;  %v952_v47 = vsub.f32 %v2142_v46, %v2169_v41 }
 0x2bf   : > { %1772 = vpow2.f32 %v978_v53  ;;  %v996_v34 = vmul.f32 1.442695, %v950_v38  ;;  %v953_v50 = vsub.f32 %v2155_v57, %v2169_v41  ;;  %v998_v36 = vmul.f32 1.442695, %v951_v42 }
 0x2c0   : > { %v2187_v54 = vpop.eup %1762  ;;  %1774 = vpow2.f32 %v980_v18  ;;  %v954_v9 = vsub.f32 %v2077_v11, %v2169_v41  ;;  %v1000_v46 = vmul.f32 1.442695, %v952_v47  ;;  %v955_v14 = vsub.f32 %v2081_v13, %v2169_v41 }
 0x2c1   : > { %v2189_v16 = vpop.eup %1764  ;;  %1776 = vpow2.f32 %v982_v21  ;;  %v1002_v57 = vmul.f32 1.442695, %v953_v50  ;;  %v956_v18 = vsub.f32 %v2085_v15, %v2169_v41  ;;  %v957_v21 = vsub.f32 %v2089_v17, %v2169_v41 }
 0x2c2   : > { %v1032_v56 = vadd.f32 %v2189_v16, %v2187_v54  ;;  %v2195_v19 = vpop.eup %1766  ;;  %1778 = vpow2.f32 %v984_v23  ;;  %v1004_v11 = vmul.f32 1.442695, %v954_v9  ;;  %v1006_v13 = vmul.f32 1.442695, %v955_v14  ;;  %v1680_v9 = vld [vmem:[%s1983_s9 + $0x38] sm:$0xff] }
 0x2c3   : > { %v2200_v61 = vpop.eup %1768  ;;  %1780 = vpow2.f32 %v986_v25  ;;  %v958_v23 = vsub.f32 %v2095_v20, %v2169_v41  ;;  %v1008_v15 = vmul.f32 1.442695, %v956_v18  ;;  %v959_v25 = vsub.f32 %v2099_v22, %v2169_v41  ;;  %1214 = vmatpush.bf16.msrb.mxu0 %v1680_v9  ;;  %1689 = vmatpush.bf16.msra.mxu2 %v1680_v9 }
 0x2c4   : > { %v1033_v59 = vadd.f32 %v2195_v19, %v1032_v56  ;;  %v2205_v0 = vpop.eup %1770  ;;  %1782 = vpow2.f32 %v988_v27  ;;  %v1010_v17 = vmul.f32 1.442695, %v957_v21  ;;  %v960_v27 = vsub.f32 %v2103_v24, %v2169_v41  ;;  %1690 = vmatpush.bf16.msrb.mxu3 %v1680_v9 }
 0x2c5   : > { %v2210_v3 = vpop.eup %1772  ;;  %1784 = vpow2.f32 %v990_v28  ;;  %v1012_v20 = vmul.f32 1.442695, %v958_v23  ;;  %v961_v28 = vsub.f32 %v2107_v26, %v2169_v41  ;;  %v1014_v22 = vmul.f32 1.442695, %v959_v25 }
 0x2c6   : > { %v1034_v63 = vadd.f32 %v2200_v61, %v1033_v59  ;;  %v2215_v6 = vpop.eup %1774  ;;  %1786 = vpow2.f32 %v992_v30  ;;  %v962_v30 = vsub.f32 %v2113_v29, %v2169_v41  ;;  %v1016_v24 = vmul.f32 1.442695, %v960_v27 }
 0x2c7   : > { %v2220_v37 = vpop.eup %1776  ;;  %1788 = vpow2.f32 %v994_v32  ;;  %v963_v32 = vsub.f32 %v2117_v31, %v2169_v41  ;;  %v1018_v26 = vmul.f32 1.442695, %v961_v28 }
 0x2c8   : > { %v1035_v2 = vadd.f32 %v2205_v0, %v1034_v63  ;;  %v2225_v40 = vpop.eup %1778  ;;  %1790 = vpow2.f32 %v996_v34  ;;  %v964_v34 = vsub.f32 %v2121_v33, %v2169_v41  ;;  %v1020_v29 = vmul.f32 1.442695, %v962_v30  ;;  %v1675_v30 = vld [vmem:[%s1983_s9 + $0x10] sm:$0xff] }
 0x2c9   : > { %v2230_v44 = vpop.eup %1780  ;;  %1792 = vpow2.f32 %v998_v36  ;;  %v965_v36 = vsub.f32 %v2125_v35, %v2169_v41  ;;  %v1022_v31 = vmul.f32 1.442695, %v963_v32  ;;  %v966_v33 = vsub.f32 %v2140_v45, %v2169_v41  ;;  %v1674_v32 = vld [vmem:[%s1983_s9 + $0x8] sm:$0xff] }
 0x2ca   : > { %v1036_v5 = vadd.f32 %v2210_v3, %v1035_v2  ;;  %v2235_v49 = vpop.eup %1782  ;;  %1794 = vpow2.f32 %v1000_v46  ;;  %v967_v35 = vsub.f32 %v2159_v60, %v2169_v41 }
 0x2cb   : > { %v2240_v52 = vpop.eup %1784  ;;  %1796 = vpow2.f32 %v1002_v57  ;;  %v1679_v57 = vld [vmem:[%s1983_s9 + $0x30] sm:$0xff]  ;;  %v1026_v18 = vmul.f32 1.442695, %v965_v36  ;;  %v1028_v45 = vmul.f32 1.442695, %v966_v33 }
 0x2cc   : > { %v1037_v8 = vadd.f32 %v2215_v6, %v1036_v5  ;;  %v2245_v12 = vpop.eup %1786  ;;  %1798 = vpow2.f32 %v1004_v11  ;;  %1215 = vmatpush.bf16.msrb.mxu0 %v1679_v57  ;;  %1691 = vmatpush.bf16.msra.mxu2 %v1679_v57  ;;  %v1030_v23 = vmul.f32 1.442695, %v967_v35 }
 0x2cd   : > { %v2250_v55 = vpop.eup %1788  ;;  %1800 = vpow2.f32 %v1006_v13  ;;  %v1678_v13 = vld [vmem:[%s1983_s9 + $0x28] sm:$0xff]  ;;  %1692 = vmatpush.bf16.msrb.mxu3 %v1679_v57 }
 0x2ce   : > { %v1038_v39 = vadd.f32 %v2220_v37, %v1037_v8  ;;  %v2255_v58 = vpop.eup %1790  ;;  %1802 = vpow2.f32 %v1008_v15 }
 0x2cf   : > { %v2260_v62 = vpop.eup %1792  ;;  %1804 = vpow2.f32 %v1010_v17 }
 0x2d0   : > { %v1039_v43 = vadd.f32 %v2225_v40, %v1038_v39  ;;  %v2265_v1 = vpop.eup %1794  ;;  %1806 = vpow2.f32 %v1012_v20  ;;  %1216 = vmatpush.bf16.msrb.mxu0 %v1678_v13  ;;  %1693 = vmatpush.bf16.msra.mxu2 %v1678_v13  ;;  %v1676_v20 = vld [vmem:[%s1983_s9 + $0x18] sm:$0xff] }
 0x2d1   : > { %v2270_v4 = vpop.eup %1796  ;;  %1808 = vpow2.f32 %v1014_v22  ;;  %1694 = vmatpush.bf16.msrb.mxu3 %v1678_v13 }
 0x2d2   : > { %v1040_v48 = vadd.f32 %v2230_v44, %v1039_v43  ;;  %v2275_v7 = vpop.eup %1798  ;;  %1810 = vpow2.f32 %v1016_v24 }
 0x2d3   : > { %v2280_v38 = vpop.eup %1800  ;;  %1812 = vpow2.f32 %v1018_v26 }
 0x2d4   : > { %v1041_v51 = vadd.f32 %v2235_v49, %v1040_v48  ;;  %v2285_v42 = vpop.eup %1802  ;;  %1814 = vpow2.f32 %v1020_v29 }
 0x2d5   : > { %v2290_v47 = vpop.eup %1804  ;;  %1816 = vpow2.f32 %v1022_v31 }
 0x2d6   : > { %v1042_v10 = vadd.f32 %v2240_v52, %v1041_v51  ;;  %v2295_v50 = vpop.eup %1806 }
 0x2d7   : > { %v2301_v46 = vpop.eup %1808 }
 0x2d8   : > { %v1043_v53 = vadd.f32 %v2245_v12, %v1042_v10  ;;  %v1024_v10 = vmul.f32 1.442695, %v964_v34  ;;  %v1673_v34 = vld [vmem:[%s1983_s9] sm:$0xff] }
 0x2da   : > { %v1044_v56 = vadd.f32 %v2250_v55, %v1043_v53  ;;  %v2307_v53 = vpop.eup %1810  ;;  %1818 = vpow2.f32 %v1024_v10 }
 0x2db   : > { %1820 = vpow2.f32 %v1026_v18 }
 0x2dc   : > { %v1045_v59 = vadd.f32 %v2255_v58, %v1044_v56  ;;  %v2312_v56 = vpop.eup %1812  ;;  %1822 = vpow2.f32 %v1028_v45 }
 0x2dd   : > { %1824 = vpow2.f32 %v1030_v23 }
 0x2de   : > { %v1046_v63 = vadd.f32 %v2260_v62, %v1045_v59  ;;  %v2316_v59 = vpop.eup %1814 }
 0x2df   : > { %v2319_v41 = vpop.eup %1816 }
 0x2e0   : > { %v1047_v2 = vadd.f32 %v2265_v1, %v1046_v63  ;;  %v1677_v63 = vld [vmem:[%s1983_s9 + $0x20] sm:$0xff]  ;;  %v1819_v25 = vpop.eup %1818 }
 0x2e1   : > { %1217 = vmatpush.bf16.msrb.mxu0 %v1677_v63  ;;  %1695 = vmatpush.bf16.msra.mxu2 %v1677_v63 }
 0x2e2   : > { %v1048_v5 = vadd.f32 %v2270_v4, %v1047_v2  ;;  %v1821_v2 = vpop.eup %1820  ;;  %1696 = vmatpush.bf16.msrb.mxu3 %v1677_v63 }
 0x2e4   : > { %v1049_v8 = vadd.f32 %v2275_v7, %v1048_v5  ;;  %v1823_v5 = vpop.eup %1822 }
 0x2e5   : > { %v1825_v22 = vpop.eup %1824  ;;  %1218 = vmatpush.bf16.msrb.mxu0 %v1676_v20  ;;  %1697 = vmatpush.bf16.msra.mxu2 %v1676_v20 }
 0x2e6   : > { %v1050_v39 = vadd.f32 %v2280_v38, %v1049_v8  ;;  %1698 = vmatpush.bf16.msrb.mxu3 %v1676_v20 }
 0x2e8   : > { %v1051_v43 = vadd.f32 %v2285_v42, %v1050_v39 }
 0x2e9   : > { %1219 = vmatpush.bf16.msrb.mxu0 %v1675_v30  ;;  %1699 = vmatpush.bf16.msra.mxu2 %v1675_v30 }
 0x2ea   : > { %v1052_v48 = vadd.f32 %v2290_v47, %v1051_v43  ;;  %1700 = vmatpush.bf16.msrb.mxu3 %v1675_v30  ;;  %v1103_v30 = vld [vmem:[%s1973_s27 + $0x8] sm:$0xff] }
 0x2ec   : > { %v1053_v51 = vadd.f32 %v2295_v50, %v1052_v48 }
 0x2ed   : > { %1220 = vmatpush.bf16.msrb.mxu0 %v1674_v32  ;;  %1701 = vmatpush.bf16.msra.mxu2 %v1674_v32 }
 0x2ee   : > { %v1054_v14 = vadd.f32 %v2301_v46, %v1053_v51  ;;  %1702 = vmatpush.bf16.msrb.mxu3 %v1674_v32 }
 0x2f0   : > { %v1055_v11 = vadd.f32 %v2307_v53, %v1054_v14 }
 0x2f1   : > { %1221 = vmatpush.bf16.msrb.mxu0 %v1673_v34  ;;  %1703 = vmatpush.bf16.msra.mxu2 %v1673_v34 }
 0x2f2   : > { %v1056_v21 = vadd.f32 %v2312_v56, %v1055_v11  ;;  %1704 = vmatpush.bf16.msrb.mxu3 %v1673_v34  ;;  %v1109_v34 = vld [vmem:[%s1973_s27 + $0x38] sm:$0xff] }
 0x2f4   : > { %v1057_v60 = vadd.f32 %v2316_v59, %v1056_v21 }
 0x2f6   : > { %v1058_v15 = vadd.f32 %v2319_v41, %v1057_v60 }
 0x2f8   : > { %v1059_v17 = vadd.f32 %v1819_v25, %v1058_v15 }
 0x2fa   : > { %v1060_v27 = vadd.f32 %v1821_v2, %v1059_v17 }
 0x2fc   : > { %v1061_v28 = vadd.f32 %v1823_v5, %v1060_v27 }
 0x2fe   : > { %v1062_v8 = vadd.f32 %v1825_v22, %v1061_v28 }
 0x300   : > { %v1063_v24 = vrot.slane %v1062_v8, 4 }
 0x302   : > { %v1064_v39 = vadd.f32 %v1063_v24, %v1062_v8 }
 0x304   : > { %v1065_v26 = vrot.slane %v1064_v39, 2 }
 0x306   : > { %v1066_v43 = vadd.f32 %v1065_v26, %v1064_v39 }
 0x308   : > { %v1067_v29 = vrot.slane %v1066_v43, 1 }
 0x30a   : > { %v1068_v48 = vadd.f32 %v1067_v29, %v1066_v43  ;;  %v1131_v29 = vld [vmem:[%s1973_s27 + $0xe8] sm:$0xff] }
 0x30c   : > { %1826 = vrcp.f32 %v1068_v48 }
 0x312   : > { %v1827_v36 = vpop.eup %1826 }
 0x313   : > { %v1070_v31 = vmul.f32 %v1827_v36, %v2187_v54  ;;  %v1071_v51 = vmul.f32 %v1827_v36, %v2189_v16  ;;  %v1076_v9 = vmul.f32 %v1827_v36, %v2215_v6  ;;  %v1077_v33 = vmul.f32 %v1827_v36, %v2220_v37 }
 0x314   : > { %v1098_v10 = vmul.f32 %v1827_v36, %v1819_v25  ;;  %v1099_v14 = vmul.f32 %v1827_v36, %v1821_v2  ;;  %v1100_v11 = vmul.f32 %v1827_v36, %v1823_v5  ;;  %v1101_v45 = vmul.f32 %v1827_v36, %v1825_v22 }
 0x315   : > { %v1134_v57 = vpack.c.bf16 %v1071_v51, %v1070_v31  ;;  %v1137_v35 = vpack.c.bf16 %v1077_v33, %v1076_v9  ;;  %v1082_v13 = vmul.f32 %v1827_v36, %v2245_v12  ;;  %v1083_v54 = vmul.f32 %v1827_v36, %v2250_v55 }
 0x316   : > { %v1148_v18 = vpack.c.bf16 %v1099_v14, %v1098_v10  ;;  %v1149_v21 = vpack.c.bf16 %v1101_v45, %v1100_v11  ;;  %v1084_v16 = vmul.f32 %v1827_v36, %v2255_v58  ;;  %v1085_v6 = vmul.f32 %v1827_v36, %v2260_v62  ;;  %v1110_v14 = vld [vmem:[%s1973_s27 + $0x40] sm:$0xff] }
 0x317   : > { %1222 = vmatmul.bf16.vlgmr.msrb.gmra.mxu0 %v1134_v57  ;;  %1237 = vmatmul.bf16.vlgmr.msra.gmra.mxu2 %v1137_v35  ;;  %v1086_v37 = vmul.f32 %v1827_v36, %v2265_v1  ;;  %v1087_v23 = vmul.f32 %v1827_v36, %v2270_v4  ;;  %v1088_v60 = vmul.f32 %v1827_v36, %v2275_v7  ;;  %v1132_v57 = vld [vmem:[%s1973_s27 + $0xf0] sm:$0xff] }
 0x318   : > { %1292 = vmatmul.bf16.vlgmr.msrb.gmra.mxu3 %v1148_v18  ;;  %v1140_v15 = vpack.c.bf16 %v1083_v54, %v1082_v13  ;;  %v1141_v63 = vpack.c.bf16 %v1085_v6, %v1084_v16  ;;  %v1089_v25 = vmul.f32 %v1827_v36, %v2280_v38  ;;  %v1090_v17 = vmul.f32 %v1827_v36, %v2285_v42  ;;  %v1105_v18 = vld [vmem:[%s1973_s27 + $0x18] sm:$0xff]  ;;  %v1111_v16 = vld [vmem:[%s1973_s27 + $0x48] sm:$0xff] }
 0x319   : > { %v1142_v2 = vpack.c.bf16 %v1087_v23, %v1086_v37  ;;  %v1091_v12 = vmul.f32 %v1827_v36, %v2290_v47  ;;  %v1092_v55 = vmul.f32 %v1827_v36, %v2295_v50  ;;  %v1093_v58 = vmul.f32 %v1827_v36, %v2301_v46  ;;  %v1133_v6 = vld [vmem:[%s1973_s27 + $0xf8] sm:$0xff]  ;;  %v1106_v23 = vld [vmem:[%s1973_s27 + $0x20] sm:$0xff] }
 0x31a   : > { %v1143_v62 = vpack.c.bf16 %v1089_v25, %v1088_v60  ;;  %v1094_v1 = vmul.f32 %v1827_v36, %v2307_v53  ;;  %v1095_v4 = vmul.f32 %v1827_v36, %v2312_v56  ;;  %v2346_v7 = vmul.f32 %v1827_v36, %v2316_v59 }
 0x31b   : > { %v1144_v27 = vpack.c.bf16 %v1091_v12, %v1090_v17  ;;  %v1145_v20 = vpack.c.bf16 %v1093_v58, %v1092_v55  ;;  %v2349_v38 = vmul.f32 %v1827_v36, %v2319_v41  ;;  %v1072_v50 = vmul.f32 %v1827_v36, %v2195_v19  ;;  %v1107_v55 = vld [vmem:[%s1973_s27 + $0x28] sm:$0xff] }
 0x31c   : > { %v1146_v42 = vpack.c.bf16 %v1095_v4, %v1094_v1  ;;  %v1073_v46 = vmul.f32 %v1827_v36, %v2200_v61  ;;  %v1078_v53 = vmul.f32 %v1827_v36, %v2225_v40  ;;  %v1079_v56 = vmul.f32 %v1827_v36, %v2230_v44  ;;  %v1113_v4 = vld [vmem:[%s1973_s27 + $0x58] sm:$0xff] }
 0x31d   : > { %v1147_v47 = vpack.c.bf16 %v2349_v38, %v2346_v7  ;;  %v1074_v41 = vmul.f32 %v1827_v36, %v2205_v0  ;;  %v1075_v28 = vmul.f32 %v1827_v36, %v2210_v3  ;;  %v1080_v22 = vmul.f32 %v1827_v36, %v2235_v49  ;;  %v1102_v0 = vld [vmem:[%s1973_s27] sm:$0xff]  ;;  %v1108_v49 = vld [vmem:[%s1973_s27 + $0x30] sm:$0xff] }
 0x31e   : > { %v1135_v5 = vpack.c.bf16 %v1073_v46, %v1072_v50  ;;  %v1138_v59 = vpack.c.bf16 %v1079_v56, %v1078_v53  ;;  %v1081_v19 = vmul.f32 %v1827_v36, %v2240_v52  ;;  %v1130_v52 = vld [vmem:[%s1973_s27 + $0xe0] sm:$0xff]  ;;  %v1104_v36 = vld [vmem:[%s1973_s27 + $0x10] sm:$0xff] }
 0x31f   : > { %v1136_v61 = vpack.c.bf16 %v1075_v28, %v1074_v41  ;;  %v1114_v7 = vld [vmem:[%s1973_s27 + $0x60] sm:$0xff]  ;;  %v1116_v53 = vld [vmem:[%s1973_s27 + $0x70] sm:$0xff] }
 0x320   : > { %v1139_v40 = vpack.c.bf16 %v1081_v19, %v1080_v22  ;;  %v1118_v22 = vld [vmem:[%s1973_s27 + $0x80] sm:$0xff] }
 0x327   : > { %1227 = vmatmul.bf16.gmra.mxu0 %v1135_v5  ;;  %1242 = vmatmul.bf16.gmra.mxu2 %v1138_v59  ;;  %v1117_v59 = vld [vmem:[%s1973_s27 + $0x78] sm:$0xff] }
 0x328   : > { %1297 = vmatmul.bf16.gmra.mxu3 %v1149_v21 }
 0x337   : > { %1232 = vmatmul.bf16.gmra.mxu0 %v1136_v61  ;;  %1247 = vmatmul.bf16.gmra.mxu2 %v1139_v40  ;;  %v1119_v40 = vld [vmem:[%s1973_s27 + $0x88] sm:$0xff] }
 0x347   : > { %1252 = vmatmul.bf16.gmra.mxu2 %v1140_v15 }
 0x357   : > { %1257 = vmatmul.bf16.gmra.mxu2 %v1141_v63 }
 0x367   : > { %1262 = vmatmul.bf16.gmra.mxu2 %v1142_v2  ;;  %v1112_v2 = vld [vmem:[%s1973_s27 + $0x50] sm:$0xff] }
 0x377   : > { %1267 = vmatmul.bf16.gmra.mxu2 %v1143_v62 }
 0x387   : > { %1272 = vmatmul.bf16.gmra.mxu2 %v1144_v27 }
 0x394   : > { %v1223_v3 = vpop.f32.mrf.mxu0 }
 0x395   : > { %v1303_v44 = vadd.f32 %v1223_v3, %v1102_v0 }
 0x397   : > { %1335 = vst [vmem:[%s1973_s27] sm:$0xff] %v1303_v44  ;;  %1277 = vmatmul.bf16.gmra.mxu2 %v1145_v20  ;;  %v1120_v44 = vld [vmem:[%s1973_s27 + $0x90] sm:$0xff] }
 0x39a   : > { %v1238_v8 = vpop.f32.mrf.mxu2 }
 0x39b   : > { %v1309_v24 = vadd.f32 %v1238_v8, %v1108_v49  ;;  %v1293_v39 = vpop.f32.mrf.mxu3  ;;  %v1121_v8 = vld [vmem:[%s1973_s27 + $0x98] sm:$0xff] }
 0x39c   : > { %v1331_v32 = vadd.f32 %v1293_v39, %v1130_v52  ;;  %v1225_v26 = vpop.f32.mrf.mxu0  ;;  %v1122_v39 = vld [vmem:[%s1973_s27 + $0xa0] sm:$0xff] }
 0x39d   : > { %1341 = vst [vmem:[%s1973_s27 + $0x30] sm:$0xff] %v1309_v24  ;;  %v1304_v43 = vadd.f32 %v1225_v26, %v1103_v30 }
 0x39e   : > { %1363 = vst [vmem:[%s1973_s27 + $0xe0] sm:$0xff] %v1331_v32 }
 0x39f   : > { %1336 = vst [vmem:[%s1973_s27 + $0x8] sm:$0xff] %v1304_v43  ;;  %v1123_v43 = vld [vmem:[%s1973_s27 + $0xa8] sm:$0xff] }
 0x3a2   : > { %v1240_v48 = vpop.f32.mrf.mxu2 }
 0x3a3   : > { %v1310_v31 = vadd.f32 %v1240_v48, %v1109_v34  ;;  %v1295_v51 = vpop.f32.mrf.mxu3  ;;  %v1124_v48 = vld [vmem:[%s1973_s27 + $0xb0] sm:$0xff] }
 0x3a4   : > { %v1332_v9 = vadd.f32 %v1295_v51, %v1131_v29  ;;  %v1228_v33 = vpop.f32.mrf.mxu0  ;;  %v1125_v51 = vld [vmem:[%s1973_s27 + $0xb8] sm:$0xff] }
 0x3a5   : > { %1342 = vst [vmem:[%s1973_s27 + $0x38] sm:$0xff] %v1310_v31  ;;  %v1305_v10 = vadd.f32 %v1228_v33, %v1104_v36 }
 0x3a6   : > { %1364 = vst [vmem:[%s1973_s27 + $0xe8] sm:$0xff] %v1332_v9 }
 0x3a7   : > { %1337 = vst [vmem:[%s1973_s27 + $0x10] sm:$0xff] %v1305_v10  ;;  %1282 = vmatmul.bf16.gmra.mxu2 %v1146_v42  ;;  %v1126_v10 = vld [vmem:[%s1973_s27 + $0xc0] sm:$0xff] }
 0x3aa   : > { %v1243_v35 = vpop.f32.mrf.mxu2 }
 0x3ab   : > { %v1311_v11 = vadd.f32 %v1243_v35, %v1110_v14  ;;  %v1298_v45 = vpop.f32.mrf.mxu3  ;;  %v1127_v35 = vld [vmem:[%s1973_s27 + $0xc8] sm:$0xff] }
 0x3ac   : > { %v1333_v21 = vadd.f32 %v1298_v45, %v1132_v57  ;;  %v1230_v13 = vpop.f32.mrf.mxu0  ;;  %v1128_v45 = vld [vmem:[%s1973_s27 + $0xd0] sm:$0xff] }
 0x3ad   : > { %1343 = vst [vmem:[%s1973_s27 + $0x40] sm:$0xff] %v1311_v11  ;;  %v1306_v54 = vadd.f32 %v1230_v13, %v1105_v18 }
 0x3ae   : > { %1365 = vst [vmem:[%s1973_s27 + $0xf0] sm:$0xff] %v1333_v21 }
 0x3af   : > { %1338 = vst [vmem:[%s1973_s27 + $0x18] sm:$0xff] %v1306_v54  ;;  %v1129_v54 = vld [vmem:[%s1973_s27 + $0xd8] sm:$0xff] }
 0x3b2   : > { %v1245_v37 = vpop.f32.mrf.mxu2 }
 0x3b3   : > { %v1312_v60 = vadd.f32 %v1245_v37, %v1111_v16  ;;  %v1300_v15 = vpop.f32.mrf.mxu3 }
 0x3b4   : > { %v1334_v63 = vadd.f32 %v1300_v15, %v1133_v6  ;;  %v1233_v25 = vpop.f32.mrf.mxu0 }
 0x3b5   : > { %1344 = vst [vmem:[%s1973_s27 + $0x48] sm:$0xff] %v1312_v60  ;;  %v1307_v17 = vadd.f32 %v1233_v25, %v1106_v23 }
 0x3b6   : > { %1366 = vst [vmem:[%s1973_s27 + $0xf8] sm:$0xff] %v1334_v63 }
 0x3b7   : > { %1339 = vst [vmem:[%s1973_s27 + $0x20] sm:$0xff] %v1307_v17  ;;  %1287 = vmatmul.bf16.gmra.mxu2 %v1147_v47  ;;  %v1115_v47 = vld [vmem:[%s1973_s27 + $0x68] sm:$0xff] }
 0x3ba   : > { %v1248_v12 = vpop.f32.mrf.mxu2 }
 0x3bb   : > { %v1313_v58 = vadd.f32 %v1248_v12, %v1112_v2 }
 0x3bc   : > { %v1235_v62 = vpop.f32.mrf.mxu0 }
 0x3bd   : > { %1345 = vst [vmem:[%s1973_s27 + $0x50] sm:$0xff] %v1313_v58  ;;  %v1308_v1 = vadd.f32 %v1235_v62, %v1107_v55 }
 0x3bf   : > { %1340 = vst [vmem:[%s1973_s27 + $0x28] sm:$0xff] %v1308_v1 }
 0x3c2   : > { %v1250_v27 = vpop.f32.mrf.mxu2 }
 0x3c3   : > { %v1314_v20 = vadd.f32 %v1250_v27, %v1113_v4 }
 0x3c5   : > { %1346 = vst [vmem:[%s1973_s27 + $0x58] sm:$0xff] %v1314_v20 }
 0x3ca   : > { %v1253_v38 = vpop.f32.mrf.mxu2 }
 0x3cb   : > { %v1315_v42 = vadd.f32 %v1253_v38, %v1114_v7 }
 0x3cd   : > { %1347 = vst [vmem:[%s1973_s27 + $0x60] sm:$0xff] %v1315_v42 }
 0x3d2   : > { %v1255_v50 = vpop.f32.mrf.mxu2 }
 0x3d3   : > { %v1316_v46 = vadd.f32 %v1255_v50, %v1115_v47 }
 0x3d5   : > { %1348 = vst [vmem:[%s1973_s27 + $0x68] sm:$0xff] %v1316_v46 }
 0x3da   : > { %v1258_v56 = vpop.f32.mrf.mxu2 }
 0x3db   : > { %v1317_v5 = vadd.f32 %v1258_v56, %v1116_v53 }
 0x3dd   : > { %1349 = vst [vmem:[%s1973_s27 + $0x70] sm:$0xff] %v1317_v5 }
 0x3e2   : > { %v1260_v41 = vpop.f32.mrf.mxu2 }
 0x3e3   : > { %v1318_v28 = vadd.f32 %v1260_v41, %v1117_v59 }
 0x3e5   : > { %1350 = vst [vmem:[%s1973_s27 + $0x78] sm:$0xff] %v1318_v28 }
 0x3ea   : > { %v1263_v19 = vpop.f32.mrf.mxu2 }
 0x3eb   : > { %v1319_v61 = vadd.f32 %v1263_v19, %v1118_v22 }
 0x3ed   : > { %1351 = vst [vmem:[%s1973_s27 + $0x80] sm:$0xff] %v1319_v61 }
 0x3f2   : > { %v1265_v0 = vpop.f32.mrf.mxu2 }
 0x3f3   : > { %v1320_v3 = vadd.f32 %v1265_v0, %v1119_v40 }
 0x3f5   : > { %1352 = vst [vmem:[%s1973_s27 + $0x88] sm:$0xff] %v1320_v3 }
 0x3fa   : > { %v1268_v49 = vpop.f32.mrf.mxu2 }
 0x3fb   : > { %v1321_v52 = vadd.f32 %v1268_v49, %v1120_v44 }
 0x3fd   : > { %1353 = vst [vmem:[%s1973_s27 + $0x90] sm:$0xff] %v1321_v52 }
 0x402   : > { %v1270_v30 = vpop.f32.mrf.mxu2 }
 0x403   : > { %v1322_v24 = vadd.f32 %v1270_v30, %v1121_v8 }
 0x405   : > { %1354 = vst [vmem:[%s1973_s27 + $0x98] sm:$0xff] %v1322_v24 }
 0x40a   : > { %v1273_v32 = vpop.f32.mrf.mxu2 }
 0x40b   : > { %v1323_v26 = vadd.f32 %v1273_v32, %v1122_v39 }
 0x40d   : > { %1355 = vst [vmem:[%s1973_s27 + $0xa0] sm:$0xff] %v1323_v26 }
 0x412   : > { %v1275_v34 = vpop.f32.mrf.mxu2 }
 0x413   : > { %v1324_v29 = vadd.f32 %v1275_v34, %v1123_v43 }
 0x415   : > { %1356 = vst [vmem:[%s1973_s27 + $0xa8] sm:$0xff] %v1324_v29 }
 0x41a   : > { %v1278_v36 = vpop.f32.mrf.mxu2 }
 0x41b   : > { %v1325_v31 = vadd.f32 %v1278_v36, %v1124_v48 }
 0x41d   : > { %1357 = vst [vmem:[%s1973_s27 + $0xb0] sm:$0xff] %v1325_v31 }
 0x422   : > { %v1280_v9 = vpop.f32.mrf.mxu2 }
 0x423   : > { %v1326_v33 = vadd.f32 %v1280_v9, %v1125_v51 }
 0x425   : > { %1358 = vst [vmem:[%s1973_s27 + $0xb8] sm:$0xff] %v1326_v33 }
 0x42a   : > { %v1283_v14 = vpop.f32.mrf.mxu2 }
 0x42b   : > { %v1327_v57 = vadd.f32 %v1283_v14, %v1126_v10 }
 0x42d   : > { %1359 = vst [vmem:[%s1973_s27 + $0xc0] sm:$0xff] %v1327_v57 }
 0x432   : > { %v1285_v18 = vpop.f32.mrf.mxu2 }
 0x433   : > { %v1328_v11 = vadd.f32 %v1285_v18, %v1127_v35 }
 0x435   : > { %1360 = vst [vmem:[%s1973_s27 + $0xc8] sm:$0xff] %v1328_v11 }
 0x43a   : > { %v1288_v21 = vpop.f32.mrf.mxu2 }
 0x43b   : > { %v1329_v13 = vadd.f32 %v1288_v21, %v1128_v45 }
 0x43d   : > { %1361 = vst [vmem:[%s1973_s27 + $0xd0] sm:$0xff] %v1329_v13 }
 0x442   : > { %v1290_v16 = vpop.f32.mrf.mxu2 }
 0x443   : > { %v1330_v6 = vadd.f32 %v1290_v16, %v1129_v54 }
 0x445   : > { %1362 = vst [vmem:[%s1973_s27 + $0xd8] sm:$0xff] %v1330_v6 }
 0x446 PF: > { %s14_s21 = sadd.s32 1, %s1882_s21   ;;  %s2454_s15 = smov %s1870_s18 }
 0x447   : > { %p11_p1 = scmp.ge.s32.totalorder %s14_s21, 10   ;;  %s2455_s16 = smov %s1874_s19 }
 0x448   : > { %s2456_s17 = smov %s1878_s20  ;;  %s2457_s18 = smov %s2461_s22 }
 0x449   : > { %s2458_s19 = smov %s2465_s23  ;;  %s2459_s20 = smov %s2469_s24 }
 0x44a   :  { %13 = sbr.rel (!%p11_p1) target bundleno = 4 (0x4), region = 76 }

// kernel: cross_sa_layer.5
= control target key start
LH: loop header
LB: loop body
LE: loop exit
PB: predicated region body
PF: predicated region fallthrough
CT: control target
= control target key end

     0   :  { %s2884_s13 = smov 0   ;;  %s2886_s14 = smov 0   ;;  %s3994_s0 = inlined_call_operand.vmem [shape: f32[2,256,128], index: 0, kind: input, shape index: {}]   ;;  %s3995_s1 = inlined_call_operand.vmem [shape: f32[2,256,128], index: 1, kind: input, shape index: {}]   ;;  %s3996_s2 = inlined_call_operand.vmem [shape: f32[1,128], index: 2, kind: input, shape index: {}]   ;;  %s3997_s3 = inlined_call_operand.vmem [shape: f32[1,128], index: 3, kind: input, shape index: {}]   ;;  %s3998_s4 = inlined_call_operand.vmem [shape: bf16[128,512], index: 4, kind: input, shape index: {}]   ;;  %s3999_s5 = inlined_call_operand.vmem [shape: f32[1,512], index: 5, kind: input, shape index: {}]   ;;  %s4000_s6 = inlined_call_operand.vmem [shape: bf16[512,128], index: 6, kind: input, shape index: {}]   ;;  %s4001_s7 = inlined_call_operand.vmem [shape: f32[1,128], index: 7, kind: input, shape index: {}]   ;;  %s4002_s8 = inlined_call_operand.vmem [shape: f32[1,128], index: 8, kind: input, shape index: {}]   ;;  %s4003_s9 = inlined_call_operand.vmem [shape: f32[1,128], index: 9, kind: input, shape index: {}]   ;;  %s4004_s10 = inlined_call_operand.vmem [shape: f32[2,256,128], index: 10, kind: output, shape index: {}]  }
   0x1   :  { %s2888_s15 = smov 0   ;;  %s2890_s16 = smov 0  }
   0x2   :  { %s2892_s17 = smov 0  }
   0x3 LB: > { %s29_s18 = sadd.s32 1, %s2818_s15  ;;  %s32_s19 = sadd.s32 1, %s2822_s16  ;;  %s2826_s17 = sphi %s2892_s17, %s20_s17   ;;  %s2822_s16 = sphi %s2890_s16, %s4022_s16   ;;  %s2818_s15 = sphi %s2888_s15, %s4021_s15   ;;  %s2814_s14 = sphi %s2886_s14, %s4020_s14   ;;  %s2810_s13 = sphi %s2884_s13, %s4019_s13  }
   0x4   : > { %p30_p0 = scmp.ge.s32.totalorder %s29_s18, 2  ;;  %p2344_p1 = scmp.ge.s32.totalorder %s2826_s17, 1 }
   0x5   : > { %p350_p2 = scmp.lt.s32.totalorder %s2826_s17, 5 }
   0x6   : > { %s4024_s18 = smov (%p30_p0, %s29_s18), 0  ;;  %s4026_s19 = smov (!%p30_p0, %s32_s19), %s2822_s16 }
   0x7   : > { %p351_p3 = pnand %p2344_p1, %p350_p2  ;;  %p34_p4 = scmp.ge.s32.totalorder %s4026_s19, 2 }
   0x8   : > { %s2345_s20 = sshll.u32 (!%p351_p3), %s2810_s13, 4  ;;  %p406_p5 = scmp.lt.s32.totalorder (!%p351_p3), %s2814_s14, 1 }
   0x9   : > { %s4028_s19 = smov (%p34_p4, %s4026_s19), 0  ;;  %354 = sbr.rel (%p351_p3) target bundleno = 1123 (0x463), region = 60 }
   0xa   : > { %p408_p6 = scmp.lt.s32.totalorder (!%p351_p3), %s2345_s20, 31 }
   0xe   : > { %s4030_s14 = smov (!%p406_p5, %s2814_s14), 1  ;;  %s4032_s20 = smov (!%p408_p6, %s2345_s20), 31  ;;  %v2828_v21 = vmov 128.0  }
   0xf   : > { %s2346_s21 = sshll.u32 %s4030_s14, 5  ;;  %2722 = vrcp.f32 %v2828_v21  ;;  %v2476_v21 = vld [vmem:[%s3998_s4 + $0xe8] sm:$0xf] }
  0x10   : > { %s411_s22 = sadd.s32 %s2346_s21, %s4032_s20 }
  0x11   : > { %s2914_s23 = sshll.u32 %s411_s22, 3 }
  0x12   : > { %s2920_s26 = scalar_lea.vmem %s3994_s0, %s2914_s23  ;;  %s2926_s29 = scalar_lea.vmem %s3995_s1, %s2914_s23 }
  0x13   : > { %v437_v0 = vld [vmem:[%s2920_s26 + $0x10] sm:$0xff]  ;;  %v435_v2 = vld [vmem:[%s2920_s26] sm:$0xff]  ;;  %v438_v8 = vld [vmem:[%s2920_s26 + $0x18] sm:$0xff]  ;;  %s3904_s12 = scalar_lea.vmem %s4004_s10, %s2914_s23 }
  0x14   : > { %v453_v1 = vld [vmem:[%s2926_s29 + $0x10] sm:$0xff]  ;;  %v451_v4 = vld [vmem:[%s2926_s29] sm:$0xff]  ;;  %v454_v9 = vld [vmem:[%s2926_s29 + $0x18] sm:$0xff] }
  0x15   : > { %v469_v3 = vadd.f32 %v453_v1, %v437_v0  ;;  %v467_v5 = vadd.f32 %v451_v4, %v435_v2  ;;  %v439_v6 = vld [vmem:[%s2920_s26 + $0x20] sm:$0xff]  ;;  %v436_v11 = vld [vmem:[%s2920_s26 + $0x8] sm:$0xff]  ;;  %v470_v13 = vadd.f32 %v454_v9, %v438_v8  ;;  %v441_v18 = vld [vmem:[%s2920_s26 + $0x30] sm:$0xff]  ;;  %v2723_v22 = vpop.eup %2722 }
  0x16   : > { %v455_v7 = vld [vmem:[%s2926_s29 + $0x20] sm:$0xff]  ;;  %v452_v12 = vld [vmem:[%s2926_s29 + $0x8] sm:$0xff]  ;;  %v457_v19 = vld [vmem:[%s2926_s29 + $0x30] sm:$0xff]  ;;  %v516_v23 = vmul.f32 128.0, %v2723_v22  ;;  %vm520_vm0 = vweird.f32 %v2723_v22 }
  0x17   : > { %487 = vadd.xlane.f32.xlu1 %v469_v3  ;;  %483 = vadd.xlane.f32.xlu0 %v467_v5  ;;  %v471_v10 = vadd.f32 %v455_v7, %v439_v6  ;;  %v440_v14 = vld [vmem:[%s2920_s26 + $0x28] sm:$0xff]  ;;  %v468_v16 = vadd.f32 %v452_v12, %v436_v11  ;;  %v473_v20 = vadd.f32 %v457_v19, %v441_v18  ;;  %v442_v37 = vld [vmem:[%s2920_s26 + $0x38] sm:$0xff]  ;;  %v443_v50 = vld [vmem:[%s2920_s26 + $0x40] sm:$0xff] }
  0x18   : > { %v456_v15 = vld [vmem:[%s2926_s29 + $0x28] sm:$0xff]  ;;  %v517_v24 = vsub.f32 1.0, %v516_v23  ;;  %v458_v38 = vld [vmem:[%s2926_s29 + $0x38] sm:$0xff]  ;;  %v459_v51 = vld [vmem:[%s2926_s29 + $0x40] sm:$0xff] }
  0x19   : > { %491 = vadd.xlane.f32.xlu2 %v471_v10  ;;  %v472_v17 = vadd.f32 %v456_v15, %v440_v14  ;;  %v2959_v44 = vadd.f32 %v458_v38, %v442_v37  ;;  %v2974_v53 = vadd.f32 %v459_v51, %v443_v50  ;;  %v446_v57 = vld [vmem:[%s2920_s26 + $0x58] sm:$0xff]  ;;  %v444_v59 = vld [vmem:[%s2920_s26 + $0x48] sm:$0xff]  ;;  %v463_v4 = vld [vmem:[%s2926_s29 + $0x60] sm:$0xff] }
  0x1a   : > { %v518_v25 = vmul.f32 %v2723_v22, %v517_v24  ;;  %v462_v58 = vld [vmem:[%s2926_s29 + $0x58] sm:$0xff]  ;;  %v460_v60 = vld [vmem:[%s2926_s29 + $0x48] sm:$0xff]  ;;  %v461_v6 = vld [vmem:[%s2926_s29 + $0x50] sm:$0xff] }
  0x1b   : > { %v2986_v62 = vadd.f32 %v462_v58, %v446_v57  ;;  %v2990_v0 = vadd.f32 %v460_v60, %v444_v59  ;;  %v464_v11 = vld [vmem:[%s2926_s29 + $0x68] sm:$0xff]  ;;  %v465_v14 = vld [vmem:[%s2926_s29 + $0x70] sm:$0xff]  ;;  %v2640_v18 = vld [vmem:[%s3998_s4 + $0xe4] sm:$0xf] }
  0x1c   : > { %v519_v26 = vadd.f32 %v2723_v22, %v518_v25  ;;  %v2641_v25 = vld [vmem:[%s3998_s4 + $0xec] sm:$0xf]  ;;  %v2438_v51 = vld [vmem:[%s3998_s4 + $0xb0] sm:$0xf0]  ;;  %v2446_v59 = vld [vmem:[%s3998_s4 + $0xb8] sm:$0xf0] }
  0x1d   : > { %v2633_v58 = vld [vmem:[%s3998_s4 + $0xac] sm:$0xf] }
  0x1e   : > { %v2942_v27 = vsel %vm520_vm0, %v2723_v22, %v519_v26  ;;  %v2643_v22 = vld [vmem:[%s3998_s4 + $0xf4] sm:$0xf0]  ;;  %v2478_v26 = vld [vmem:[%s3998_s4 + $0xf8] sm:$0xf0]  ;;  %v2449_v60 = vor.u32 %v2633_v58, %v2446_v59  ;;  %v2617_v59 = vld [vmem:[%s3998_s4 + $0x2c] sm:$0xf] }
  0x1f   : > { %489 = vadd.xlane.f32.xlu1 %v470_v13  ;;  %485 = vadd.xlane.f32.xlu0 %v468_v16  ;;  %v2477_v24 = vor.u32 %v2643_v22, %v2476_v21  ;;  %v2412_v21 = vld [vmem:[%s3998_s4 + $0x68] sm:$0xf]  ;;  %v2627_v22 = vld [vmem:[%s3998_s4 + $0x74] sm:$0xf0] }
  0x21   : > { %493 = vadd.xlane.f32.xlu2 %v472_v17  ;;  %1158 = vmatpush.bf16.msra.mxu2 %v2477_v24  ;;  %v2413_v24 = vor.u32 %v2627_v22, %v2412_v21 }
  0x29   : > { %495 = vadd.xlane.f32.xlu2 %v473_v20 }
  0x8a   : > { %v488_v28 = vpop.xlane.xlu1 %487  ;;  %v484_v29 = vpop.xlane.xlu0 %483 }
  0x8b   : > { %v522_v30 = vmul.f32 %v2942_v27, %v484_v29  ;;  %v524_v42 = vmul.f32 %v2942_v27, %v488_v28  ;;  %v2481_v28 = vor.u32 %v2641_v25, %v2478_v26  ;;  %v2452_v29 = vld [vmem:[%s3998_s4 + $0xc0] sm:$0xf]  ;;  %v2625_v25 = vld [vmem:[%s3998_s4 + $0x6c] sm:$0xf]  ;;  %v2414_v26 = vld [vmem:[%s3998_s4 + $0x78] sm:$0xf0] }
  0x8c   : > { %v492_v32 = vpop.xlane.xlu2 %491 }
  0x8d   : > { %v2945_v31 = vsub.f32 %v467_v5, %v522_v30  ;;  %v526_v41 = vmul.f32 %v2942_v27, %v492_v32  ;;  %v2967_v49 = vsub.f32 %v469_v3, %v524_v42  ;;  %v447_v3 = vld [vmem:[%s2920_s26 + $0x60] sm:$0xff]  ;;  %v445_v5 = vld [vmem:[%s2920_s26 + $0x50] sm:$0xff]  ;;  %1207 = vmatpush.bf16.msra.mxu3 %v2481_v28  ;;  %v2417_v28 = vor.u32 %v2625_v25, %v2414_v26 }
  0x8e   : > { %v3001_v7 = vadd.f32 %v463_v4, %v447_v3  ;;  %v3005_v9 = vadd.f32 %v461_v6, %v445_v5  ;;  %v2638_v30 = vld [vmem:[%s3998_s4 + $0xcc] sm:$0xf0]  ;;  %v2636_v32 = vld [vmem:[%s3998_s4 + $0xc4] sm:$0xf]  ;;  %v2422_v4 = vld [vmem:[%s3998_s4 + $0x90] sm:$0xf0] }
  0x8f   : > { %v554_v33 = vmul.f32 %v2945_v31, %v2945_v31  ;;  %v2965_v47 = vsub.f32 %v471_v10, %v526_v41  ;;  %v556_v54 = vmul.f32 %v2967_v49, %v2967_v49  ;;  %v448_v10 = vld [vmem:[%s2920_s26 + $0x68] sm:$0xff]  ;;  %v2462_v41 = vld [vmem:[%s3998_s4 + $0xd8] sm:$0xf0]  ;;  %v2631_v6 = vld [vmem:[%s3998_s4 + $0x94] sm:$0xf0] }
  0x90   : > { %v3011_v12 = vadd.f32 %v464_v11, %v448_v10  ;;  %v2428_v5 = vld [vmem:[%s3998_s4 + $0x88] sm:$0xf]  ;;  %v2629_v11 = vld [vmem:[%s3998_s4 + $0x8c] sm:$0xf] }
  0x91   : > { %570 = vadd.xlane.f32.xlu0 %v554_v33  ;;  %v558_v52 = vmul.f32 %v2965_v47, %v2965_v47  ;;  %v2453_v33 = vor.u32 %v2638_v30, %v2452_v29  ;;  %v2429_v10 = vor.u32 %v2631_v6, %v2428_v5  ;;  %v2388_v29 = vld [vmem:[%s3998_s4 + $0x40] sm:$0xf]  ;;  %v2622_v30 = vld [vmem:[%s3998_s4 + $0x4c] sm:$0xf0] }
  0x92   : > { %v490_v34 = vpop.xlane.xlu1 %489  ;;  %v486_v36 = vpop.xlane.xlu0 %485 }
  0x93   : > { %v525_v35 = vmul.f32 %v2942_v27, %v490_v34  ;;  %v523_v39 = vmul.f32 %v2942_v27, %v486_v36  ;;  %v2454_v34 = vld [vmem:[%s3998_s4 + $0xd0] sm:$0xf0]  ;;  %v2639_v36 = vld [vmem:[%s3998_s4 + $0xd4] sm:$0xf0] }
  0x94   : > { %v494_v48 = vpop.xlane.xlu2 %493  ;;  %v2457_v37 = vor.u32 %v2636_v32, %v2454_v34  ;;  %v2620_v32 = vld [vmem:[%s3998_s4 + $0x44] sm:$0xf]  ;;  %v2390_v34 = vld [vmem:[%s3998_s4 + $0x50] sm:$0xf0] }
  0x95   : > { %v2953_v40 = vsub.f32 %v470_v13, %v525_v35  ;;  %v2957_v43 = vsub.f32 %v468_v16, %v523_v39  ;;  %v527_v55 = vmul.f32 %v2942_v27, %v494_v48  ;;  %v449_v13 = vld [vmem:[%s2920_s26 + $0x70] sm:$0xff]  ;;  %v2468_v16 = vld [vmem:[%s3998_s4 + $0xe0] sm:$0xf]  ;;  %v2460_v35 = vld [vmem:[%s3998_s4 + $0xc8] sm:$0xf] }
  0x96   : > { %v3016_v15 = vadd.f32 %v465_v14, %v449_v13  ;;  %v2461_v38 = vor.u32 %v2639_v36, %v2460_v35  ;;  %v2637_v39 = vld [vmem:[%s3998_s4 + $0xcc] sm:$0xf]  ;;  %v2632_v48 = vld [vmem:[%s3998_s4 + $0xa4] sm:$0xf]  ;;  %v2430_v13 = vld [vmem:[%s3998_s4 + $0x98] sm:$0xf0] }
  0x97   : > { %v557_v45 = vmul.f32 %v2953_v40, %v2953_v40  ;;  %v555_v46 = vmul.f32 %v2957_v43, %v2957_v43  ;;  %v2980_v56 = vsub.f32 %v472_v17, %v527_v55  ;;  %v2642_v17 = vld [vmem:[%s3998_s4 + $0xec] sm:$0xf0]  ;;  %v2465_v42 = vor.u32 %v2637_v39, %v2462_v41  ;;  %v2396_v35 = vld [vmem:[%s3998_s4 + $0x48] sm:$0xf]  ;;  %v2623_v36 = vld [vmem:[%s3998_s4 + $0x54] sm:$0xf0] }
  0x98   : > { %v2469_v19 = vor.u32 %v2642_v17, %v2468_v16  ;;  %1159 = vmatpush.bf16.msra.mxu2 %v2461_v38  ;;  %v2441_v55 = vor.u32 %v2632_v48, %v2438_v51  ;;  %v2433_v14 = vor.u32 %v2629_v11, %v2430_v13  ;;  %v2404_v16 = vld [vmem:[%s3998_s4 + $0x60] sm:$0xf]  ;;  %v2626_v17 = vld [vmem:[%s3998_s4 + $0x6c] sm:$0xf0]  ;;  %v2397_v38 = vor.u32 %v2623_v36, %v2396_v35  ;;  %v2621_v39 = vld [vmem:[%s3998_s4 + $0x4c] sm:$0xf] }
  0x99   : > { %576 = vadd.xlane.f32.xlu2 %v557_v45  ;;  %497 = vadd.xlane.f32.xlu0 %v2959_v44  ;;  %v559_v63 = vmul.f32 %v2980_v56, %v2980_v56  ;;  %v2436_v45 = vld [vmem:[%s3998_s4 + $0xa0] sm:$0xf]  ;;  %v2398_v41 = vld [vmem:[%s3998_s4 + $0x58] sm:$0xf0]  ;;  %v2616_v48 = vld [vmem:[%s3998_s4 + $0x24] sm:$0xf] }
  0x9a   : > { %572 = vadd.xlane.f32.xlu1 %v555_v46  ;;  %1060 = vmatpush.bf16.msra.mxu0 %v2469_v19  ;;  %v2634_v46 = vld [vmem:[%s3998_s4 + $0xac] sm:$0xf0]  ;;  %v2405_v19 = vor.u32 %v2626_v17, %v2404_v16  ;;  %v2374_v51 = vld [vmem:[%s3998_s4 + $0x30] sm:$0xf0]  ;;  %v2615_v13 = vld [vmem:[%s3998_s4 + $0x14] sm:$0xf0] }
  0x9b   : > { %1208 = vmatpush.bf16.msra.mxu3 %v2465_v42  ;;  %v2437_v50 = vor.u32 %v2634_v46, %v2436_v45  ;;  %v2401_v42 = vor.u32 %v2621_v39, %v2398_v41  ;;  %v2372_v45 = vld [vmem:[%s3998_s4 + $0x20] sm:$0xf]  ;;  %v2618_v46 = vld [vmem:[%s3998_s4 + $0x2c] sm:$0xf0]  ;;  %v2366_v16 = vld [vmem:[%s3998_s4 + $0x18] sm:$0xf0] }
  0x9c   : > { %v496_v61 = vpop.xlane.xlu2 %495 }
  0x9d   : > { %v528_v1 = vmul.f32 %v2942_v27, %v496_v61  ;;  %v2420_v61 = vld [vmem:[%s3998_s4 + $0x80] sm:$0xf] }
  0x9e   : > { %1061 = vmatpush.bf16.msra.mxu0 %v2453_v33  ;;  %v2389_v33 = vor.u32 %v2622_v30, %v2388_v29 }
  0x9f   : > { %v2995_v2 = vsub.f32 %v473_v20, %v528_v1  ;;  %v2470_v20 = vld [vmem:[%s3998_s4 + $0xf0] sm:$0xf0]  ;;  %v2628_v1 = vld [vmem:[%s3998_s4 + $0x84] sm:$0xf]  ;;  %1209 = vmatpush.bf16.msra.mxu3 %v2449_v60  ;;  %v2382_v60 = vld [vmem:[%s3998_s4 + $0x38] sm:$0xf0] }
  0xa0   : > { %v2473_v23 = vor.u32 %v2640_v18, %v2470_v20  ;;  %v2624_v18 = vld [vmem:[%s3998_s4 + $0x64] sm:$0xf]  ;;  %v2406_v20 = vld [vmem:[%s3998_s4 + $0x70] sm:$0xf0] }
  0xa1   : > { %578 = vadd.xlane.f32.xlu2 %v558_v52  ;;  %499 = vadd.xlane.f32.xlu0 %v2974_v53  ;;  %v560_v8 = vmul.f32 %v2995_v2, %v2995_v2  ;;  %v2444_v52 = vld [vmem:[%s3998_s4 + $0xa8] sm:$0xf] }
  0xa2   : > { %574 = vadd.xlane.f32.xlu1 %v556_v54  ;;  %1109 = vmatpush.bf16.msra.mxu1 %v2473_v23  ;;  %v2635_v54 = vld [vmem:[%s3998_s4 + $0xb4] sm:$0xf0]  ;;  %v2409_v23 = vor.u32 %v2624_v18, %v2406_v20 }
  0xa3   : > { %v2445_v57 = vor.u32 %v2635_v54, %v2444_v52  ;;  %1062 = vmatpush.bf16.msra.mxu0 %v2437_v50  ;;  %1210 = vmatpush.bf16.msra.mxu3 %v2433_v14  ;;  %v2373_v50 = vor.u32 %v2618_v46, %v2372_v45  ;;  %v2380_v52 = vld [vmem:[%s3998_s4 + $0x28] sm:$0xf]  ;;  %v2619_v54 = vld [vmem:[%s3998_s4 + $0x34] sm:$0xf0]  ;;  %v2613_v14 = vld [vmem:[%s3998_s4 + $0xc] sm:$0xf] }
  0xa4   : > { %v2381_v58 = vor.u32 %v2619_v54, %v2380_v52  ;;  %v2369_v18 = vor.u32 %v2613_v14, %v2366_v16 }
  0xa5   : > { %1160 = vmatpush.bf16.msra.mxu2 %v2445_v57  ;;  %v2377_v57 = vor.u32 %v2616_v48, %v2374_v51 }
  0xa6   : > { %1110 = vmatpush.bf16.msra.mxu1 %v2457_v37  ;;  %v2393_v37 = vor.u32 %v2620_v32, %v2390_v34 }
  0xa7   : > { %1211 = vmatpush.bf16.msra.mxu3 %v2417_v28 }
  0xa9   : > { %505 = vadd.xlane.f32.xlu2 %v2986_v62  ;;  %580 = vadd.xlane.f32.xlu0 %v559_v63  ;;  %v2630_v63 = vld [vmem:[%s3998_s4 + $0x8c] sm:$0xf0] }
  0xaa   : > { %501 = vadd.xlane.f32.xlu1 %v2990_v0  ;;  %1111 = vmatpush.bf16.msra.mxu1 %v2441_v55  ;;  %v2421_v3 = vor.u32 %v2630_v63, %v2420_v61  ;;  %v2385_v63 = vor.u32 %v2617_v59, %v2382_v60 }
  0xab   : > { %1161 = vmatpush.bf16.msra.mxu2 %v2429_v10  ;;  %1212 = vmatpush.bf16.msra.mxu3 %v2401_v42  ;;  %v2364_v10 = vld [vmem:[%s3998_s4 + $0x8] sm:$0xf] }
  0xac   : > { %1063 = vmatpush.bf16.msra.mxu0 %v2421_v3  ;;  %v2614_v3 = vld [vmem:[%s3998_s4 + $0xc] sm:$0xf0]  ;;  %v2365_v17 = vor.u32 %v2615_v13, %v2364_v10 }
  0xaf   : > { %1162 = vmatpush.bf16.msra.mxu2 %v2413_v24  ;;  %1213 = vmatpush.bf16.msra.mxu3 %v2385_v63 }
  0xb0   : > { %1064 = vmatpush.bf16.msra.mxu0 %v2405_v19 }
  0xb1   : > { %507 = vadd.xlane.f32.xlu2 %v3001_v7  ;;  %582 = vadd.xlane.f32.xlu0 %v560_v8  ;;  %v2425_v8 = vor.u32 %v2628_v1, %v2422_v4  ;;  %v2356_v1 = vld [vmem:[%s3998_s4] sm:$0xf]  ;;  %v2612_v4 = vld [vmem:[%s3998_s4 + $0x4] sm:$0xf] }
  0xb2   : > { %503 = vadd.xlane.f32.xlu1 %v3005_v9  ;;  %v2357_v6 = vor.u32 %v2614_v3, %v2356_v1 }
  0xb3   : > { %1112 = vmatpush.bf16.msra.mxu1 %v2425_v8  ;;  %1163 = vmatpush.bf16.msra.mxu2 %v2397_v38  ;;  %v2358_v8 = vld [vmem:[%s3998_s4 + $0x10] sm:$0xf0] }
  0xb4   : > { %1065 = vmatpush.bf16.msra.mxu0 %v2389_v33  ;;  %v2361_v11 = vor.u32 %v2612_v4, %v2358_v8  ;;  %1214 = vmatpush.bf16.msra.mxu3 %v2369_v18  ;;  %v450_v4 = vld [vmem:[%s2920_s26 + $0x78] sm:$0xff] }
  0xb7   : > { %1113 = vmatpush.bf16.msra.mxu1 %v2409_v23  ;;  %1164 = vmatpush.bf16.msra.mxu2 %v2381_v58 }
  0xb8   : > { %1066 = vmatpush.bf16.msra.mxu0 %v2373_v50 }
  0xb9   : > { %509 = vadd.xlane.f32.xlu0 %v3011_v12 }
  0xbb   : > { %1114 = vmatpush.bf16.msra.mxu1 %v2393_v37  ;;  %1165 = vmatpush.bf16.msra.mxu2 %v2365_v17 }
  0xbc   : > { %1067 = vmatpush.bf16.msra.mxu0 %v2357_v6 }
  0xbf   : > { %1115 = vmatpush.bf16.msra.mxu1 %v2377_v57 }
  0xc1   : > { %511 = vadd.xlane.f32.xlu0 %v3016_v15 }
  0xc3   : > { %1116 = vmatpush.bf16.msra.mxu1 %v2361_v11 }
 0x104   : > { %v571_v55 = vpop.xlane.xlu0 %570 }
 0x105   : > { %v602_v61 = vmul.f32 %v571_v55, %v2942_v27 }
 0x107   : > { %v618_v5 = vadd.f32 1e-06, %v602_v61 }
 0x109   : > { %2724 = vrsqrt.f32 %v618_v5  ;;  %vm640_vm2 = vweird.f32 %v618_v5 }
 0x10c   : > { %v577_v19 = vpop.xlane.xlu2 %576  ;;  %v498_v22 = vpop.xlane.xlu0 %497 }
 0x10d   : > { %v605_v20 = vmul.f32 %v577_v19, %v2942_v27  ;;  %v573_v21 = vpop.xlane.xlu1 %572  ;;  %v529_v24 = vmul.f32 %v2942_v27, %v498_v22 }
 0x10e   : > { %v603_v23 = vmul.f32 %v573_v21, %v2942_v27 }
 0x10f   : > { %v3215_v25 = vadd.f32 1e-06, %v605_v20  ;;  %v2725_v26 = vpop.eup %2724  ;;  %v3218_v29 = vsub.f32 %v2959_v44, %v529_v24 }
 0x110   : > { %v619_v28 = vadd.f32 1e-06, %v603_v23  ;;  %v635_v30 = vmul.f32 %v2725_v26, %v618_v5  ;;  %vm641_vm1 = vweird.f32 %v2725_v26  ;;  %v466_v5 = vld [vmem:[%s2926_s29 + $0x78] sm:$0xff] }
 0x111   : > { %2726 = vrsqrt.f32 %v3215_v25  ;;  %v561_v32 = vmul.f32 %v3218_v29, %v3218_v29  ;;  %vm3240_vm5 = vmor %vm640_vm2, %vm641_vm1  ;;  %v3267_v19 = vadd.f32 %v466_v5, %v450_v4  ;;  %vm670_vm9 = vweird.f32 %v3215_v25 }
 0x112   : > { %2728 = vrsqrt.f32 %v619_v28  ;;  %v636_v33 = vmul.f32 %v2725_v26, %v635_v30  ;;  %vm650_vm3 = vweird.f32 %v619_v28 }
 0x113   : > { %584 = vadd.xlane.f32.xlu1 %v561_v32 }
 0x114   : > { %v579_v34 = vpop.xlane.xlu2 %578  ;;  %v637_v35 = vmul.f32 0.5, %v636_v33  ;;  %v500_v37 = vpop.xlane.xlu0 %499 }
 0x115   : > { %v575_v36 = vpop.xlane.xlu1 %574  ;;  %v530_v39 = vmul.f32 %v2942_v27, %v500_v37  ;;  %v606_v50 = vmul.f32 %v579_v34, %v2942_v27 }
 0x116   : > { %v604_v38 = vmul.f32 %v575_v36, %v2942_v27  ;;  %v638_v44 = vsub.f32 1.5, %v637_v35 }
 0x117   : > { %v3225_v41 = vpop.eup %2726  ;;  %v3230_v46 = vsub.f32 %v2974_v53, %v530_v39  ;;  %v3244_v63 = vadd.f32 1e-06, %v606_v50 }
 0x118   : > { %v2729_v42 = vpop.eup %2728  ;;  %v3227_v45 = vadd.f32 1e-06, %v604_v38  ;;  %v639_v51 = vmul.f32 %v2725_v26, %v638_v44  ;;  %v665_v52 = vmul.f32 %v3225_v41, %v3215_v25  ;;  %vm671_vm10 = vweird.f32 %v3225_v41 }
 0x119   : > { %v645_v48 = vmul.f32 %v2729_v42, %v619_v28  ;;  %v562_v55 = vmul.f32 %v3230_v46, %v3230_v46  ;;  %vm651_vm4 = vweird.f32 %v2729_v42  ;;  %vm3328_vm12 = vmor %vm670_vm9, %vm671_vm10  ;;  %vm680_vm15 = vweird.f32 %v3244_v63 }
 0x11a   : > { %2730 = vrsqrt.f32 %v3227_v45  ;;  %v643_v6 = vsel %vm3240_vm5, %v2725_v26, %v639_v51  ;;  %v666_v8 = vmul.f32 %v3225_v41, %v665_v52  ;;  %vm652_vm6 = vmor %vm650_vm3, %vm651_vm4  ;;  %vm660_vm7 = vweird.f32 %v3227_v45 }
 0x11b   : > { %v646_v54 = vmul.f32 %v2729_v42, %v645_v48  ;;  %586 = vadd.xlane.f32.xlu1 %v562_v55  ;;  %v794_v20 = vmul.f32 %v643_v6, %v2945_v31  ;;  %2732 = vrsqrt.f32 %v3244_v63 }
 0x11c   : > { %v506_v57 = vpop.xlane.xlu2 %505  ;;  %v581_v60 = vpop.xlane.xlu0 %580  ;;  %v667_v22 = vmul.f32 0.5, %v666_v8 }
 0x11d   : > { %v647_v53 = vmul.f32 0.5, %v646_v54  ;;  %v533_v58 = vmul.f32 %v2942_v27, %v506_v57  ;;  %v502_v59 = vpop.xlane.xlu1 %501  ;;  %v607_v3 = vmul.f32 %v581_v60, %v2942_v27 }
 0x11e   : > { %v531_v1 = vmul.f32 %v2942_v27, %v502_v59  ;;  %v668_v37 = vsub.f32 1.5, %v667_v22 }
 0x11f   : > { %v648_v10 = vsub.f32 1.5, %v647_v53  ;;  %v3254_v11 = vsub.f32 %v2986_v62, %v533_v58  ;;  %v3265_v18 = vadd.f32 1e-06, %v607_v3 }
 0x120   : > { %v3256_v13 = vpop.eup %2730  ;;  %v3261_v14 = vsub.f32 %v2990_v0, %v531_v1  ;;  %v3278_v0 = vld [vmem:[%s3996_s2] ss:$0 sm:$0xff]  ;;  %v669_v25 = vmul.f32 %v3225_v41, %v668_v37 }
 0x121   : > { %v649_v16 = vmul.f32 %v2729_v42, %v648_v10  ;;  %v655_v17 = vmul.f32 %v3256_v13, %v3227_v45  ;;  %v565_v62 = vmul.f32 %v3254_v11, %v3254_v11  ;;  %2734 = vrsqrt.f32 %v3265_v18  ;;  %v3300_v44 = vpop.eup %2732 }
 0x122   : > { %v563_v21 = vmul.f32 %v3261_v14, %v3261_v14  ;;  %v814_v35 = vmul.f32 %v3278_v0, %v794_v20  ;;  %vm661_vm8 = vweird.f32 %v3256_v13  ;;  %v675_v55 = vmul.f32 %v3300_v44, %v3244_v63 }
 0x123   : > { %v653_v23 = vsel %vm652_vm6, %v2729_v42, %v649_v16  ;;  %v656_v24 = vmul.f32 %v3256_v13, %v655_v17  ;;  %592 = vadd.xlane.f32.xlu0 %v565_v62  ;;  %513 = vadd.xlane.f32.xlu1 %v3267_v19  ;;  %vm3315_vm11 = vmor %vm660_vm7, %vm661_vm8  ;;  %v673_v1 = vsel %vm3328_vm12, %v3225_v41, %v669_v25  ;;  %vm690_vm13 = vweird.f32 %v3265_v18 }
 0x124   : > { %v795_v31 = vmul.f32 %v653_v23, %v2957_v43  ;;  %588 = vadd.xlane.f32.xlu2 %v563_v21  ;;  %v508_v26 = vpop.xlane.xlu2 %507  ;;  %v3285_v33 = vpop.xlane.xlu0 %582  ;;  %v3294_v43 = vld [vmem:[%s3997_s3] ss:$0 sm:$0xff]  ;;  %v676_v3 = vmul.f32 %v3300_v44, %v675_v55  ;;  %v797_v8 = vmul.f32 %v673_v1, %v2953_v40  ;;  %vm681_vm0 = vweird.f32 %v3300_v44 }
 0x125   : > { %v657_v28 = vmul.f32 0.5, %v656_v24  ;;  %v534_v30 = vmul.f32 %v2942_v27, %v508_v26  ;;  %v504_v32 = vpop.xlane.xlu1 %503  ;;  %v3321_v54 = vadd.f32 %v3294_v43, %v814_v35  ;;  %vm682_vm2 = vmor %vm680_vm15, %vm681_vm0 }
 0x126   : > { %v532_v34 = vmul.f32 %v2942_v27, %v504_v32  ;;  %v815_v36 = vmul.f32 %v3278_v0, %v795_v31  ;;  %v817_v62 = vmul.f32 %v3278_v0, %v797_v8 }
 0x127   : > { %v658_v38 = vsub.f32 1.5, %v657_v28  ;;  %v3298_v39 = vsub.f32 %v3001_v7, %v534_v30  ;;  %v2735_v50 = vpop.eup %2734 }
 0x128   : > { %v3303_v42 = vsub.f32 %v3005_v9, %v532_v34  ;;  %v3306_v48 = vadd.f32 %v3294_v43, %v815_v36  ;;  %v685_v9 = vmul.f32 %v2735_v50, %v3265_v18  ;;  %vm691_vm14 = vweird.f32 %v2735_v50 }
 0x129   : > { %v659_v51 = vmul.f32 %v3256_v13, %v658_v38  ;;  %v566_v52 = vmul.f32 %v3298_v39, %v3298_v39  ;;  %vm692_vm1 = vmor %vm690_vm13, %vm691_vm14  ;;  %v3362_v22 = vadd.f32 %v3294_v43, %v817_v62 }
 0x12a   : > { %v564_v57 = vmul.f32 %v3303_v42, %v3303_v42  ;;  %v850_v45 = vpack.c.bf16 %v3306_v48, %v3321_v54  ;;  %v686_v59 = vmul.f32 %v2735_v50, %v685_v9 }
 0x12b   : > { %v663_v58 = vsel %vm3315_vm11, %v3256_v13, %v659_v51  ;;  %594 = vadd.xlane.f32.xlu1 %v566_v52  ;;  %v677_v13 = vmul.f32 0.5, %v676_v3 }
 0x12c   : > { %590 = vadd.xlane.f32.xlu2 %v564_v57  ;;  %v510_v60 = vpop.xlane.xlu0 %509  ;;  %1068 = vmatmul.bf16.vlgmr.msra.gmra.mxu0 %v850_v45  ;;  %v796_v4 = vmul.f32 %v663_v58, %v2967_v49  ;;  %v687_v6 = vmul.f32 0.5, %v686_v59 }
 0x12d   : > { %1117 = vmatmul.bf16.vlgmr.msra.gmra.mxu1 %v850_v45  ;;  %v535_v61 = vmul.f32 %v2942_v27, %v510_v60  ;;  %1166 = vmatmul.bf16.vlgmr.msra.gmra.mxu2 %v850_v45  ;;  %v678_v49 = vsub.f32 1.5, %v677_v13 }
 0x12e   : > { %1215 = vmatmul.bf16.vlgmr.msra.gmra.mxu3 %v850_v45  ;;  %v816_v16 = vmul.f32 %v3278_v0, %v796_v4  ;;  %v688_v17 = vsub.f32 1.5, %v687_v6 }
 0x12f   : > { %v3344_v5 = vsub.f32 %v3011_v12, %v535_v61  ;;  %v679_v18 = vmul.f32 %v3300_v44, %v678_v49 }
 0x130   : > { %v3357_v40 = vadd.f32 %v3294_v43, %v816_v16  ;;  %v689_v21 = vmul.f32 %v2735_v50, %v688_v17 }
 0x131   : > { %v567_v10 = vmul.f32 %v3344_v5, %v3344_v5  ;;  %v683_v63 = vsel %vm682_vm2, %v3300_v44, %v679_v18 }
 0x132   : > { %v693_v24 = vsel %vm692_vm1, %v2735_v50, %v689_v21  ;;  %v798_v26 = vmul.f32 %v683_v63, %v2965_v47  ;;  %v608_v47 = vmul.f32 %v3285_v33, %v2942_v27 }
 0x133   : > { %v799_v31 = vmul.f32 %v693_v24, %v2980_v56 }
 0x134   : > { %596 = vadd.xlane.f32.xlu2 %v567_v10  ;;  %v512_v41 = vpop.xlane.xlu0 %511  ;;  %v818_v30 = vmul.f32 %v3278_v0, %v798_v26  ;;  %v624_v56 = vadd.f32 1e-06, %v608_v47 }
 0x135   : > { %v536_v20 = vmul.f32 %v2942_v27, %v512_v41  ;;  %v819_v28 = vmul.f32 %v3278_v0, %v799_v31 }
 0x136   : > { %v3378_v34 = vadd.f32 %v3294_v43, %v818_v30  ;;  %2736 = vrsqrt.f32 %v624_v56  ;;  %vm700_vm3 = vweird.f32 %v624_v56 }
 0x137   : > { %v3354_v12 = vsub.f32 %v3016_v15, %v536_v20  ;;  %v851_v15 = vpack.c.bf16 %v3362_v22, %v3357_v40  ;;  %v3375_v32 = vadd.f32 %v3294_v43, %v819_v28 }
 0x139   : > { %v568_v23 = vmul.f32 %v3354_v12, %v3354_v12  ;;  %v852_v35 = vpack.c.bf16 %v3375_v32, %v3378_v34 }
 0x13b   : > { %598 = vadd.xlane.f32.xlu0 %v568_v23 }
 0x13c   : > { %1073 = vmatmul.bf16.gmra.mxu0 %v851_v15  ;;  %v2737_v36 = vpop.eup %2736 }
 0x13d   : > { %1122 = vmatmul.bf16.gmra.mxu1 %v851_v15  ;;  %1171 = vmatmul.bf16.gmra.mxu2 %v851_v15  ;;  %v695_v37 = vmul.f32 %v2737_v36, %v624_v56  ;;  %vm701_vm4 = vweird.f32 %v2737_v36 }
 0x13e   : > { %1220 = vmatmul.bf16.gmra.mxu3 %v851_v15  ;;  %vm702_vm5 = vmor %vm700_vm3, %vm701_vm4 }
 0x13f   : > { %v696_v38 = vmul.f32 %v2737_v36, %v695_v37 }
 0x141   : > { %v697_v52 = vmul.f32 0.5, %v696_v38 }
 0x143   : > { %v698_v7 = vsub.f32 1.5, %v697_v52 }
 0x145   : > { %v699_v57 = vmul.f32 %v2737_v36, %v698_v7 }
 0x147   : > { %v703_v58 = vsel %vm702_vm5, %v2737_v36, %v699_v57 }
 0x148   : > { %v800_v10 = vmul.f32 %v703_v58, %v2995_v2 }
 0x14a   : > { %v820_v18 = vmul.f32 %v3278_v0, %v800_v10 }
 0x14c   : > { %1078 = vmatmul.bf16.gmra.mxu0 %v852_v35  ;;  %v3403_v30 = vadd.f32 %v3294_v43, %v820_v18  ;;  %v2675_v18 = vld [vmem:[%s4000_s6 + $0xf8] sm:$0xff] }
 0x14d   : > { %1127 = vmatmul.bf16.gmra.mxu1 %v852_v35  ;;  %1176 = vmatmul.bf16.gmra.mxu2 %v852_v35 }
 0x14e   : > { %1225 = vmatmul.bf16.gmra.mxu3 %v852_v35 }
 0x14f   : > { %1755 = vmatpush.bf16.msrb.mxu3 %v2675_v18  ;;  %v2647_v18 = vld [vmem:[%s4000_s6 + $0x18] sm:$0xff] }
 0x186   : > { %v585_v44 = vpop.xlane.xlu1 %584 }
 0x187   : > { %v609_v50 = vmul.f32 %v585_v44, %v2942_v27 }
 0x189   : > { %v625_v51 = vadd.f32 1e-06, %v609_v50 }
 0x18b   : > { %2738 = vrsqrt.f32 %v625_v51  ;;  %vm710_vm7 = vweird.f32 %v625_v51 }
 0x18e   : > { %v587_v9 = vpop.xlane.xlu1 %586 }
 0x18f   : > { %v610_v25 = vmul.f32 %v587_v9, %v2942_v27 }
 0x191   : > { %v2739_v55 = vpop.eup %2738  ;;  %v626_v53 = vadd.f32 1e-06, %v610_v25 }
 0x192   : > { %v705_v33 = vmul.f32 %v2739_v55, %v625_v51  ;;  %vm711_vm6 = vweird.f32 %v2739_v55 }
 0x193   : > { %2740 = vrsqrt.f32 %v626_v53  ;;  %vm712_vm8 = vmor %vm710_vm7, %vm711_vm6  ;;  %vm720_vm12 = vweird.f32 %v626_v53 }
 0x194   : > { %v706_v45 = vmul.f32 %v2739_v55, %v705_v33 }
 0x196   : > { %v707_v59 = vmul.f32 0.5, %v706_v45  ;;  %v593_v61 = vpop.xlane.xlu0 %592  ;;  %v514_v3 = vpop.xlane.xlu1 %513 }
 0x197   : > { %v589_v60 = vpop.xlane.xlu2 %588  ;;  %v613_v4 = vmul.f32 %v593_v61, %v2942_v27  ;;  %v537_v8 = vmul.f32 %v2942_v27, %v514_v3 }
 0x198   : > { %v611_v1 = vmul.f32 %v589_v60, %v2942_v27  ;;  %v708_v6 = vsub.f32 1.5, %v707_v59 }
 0x199   : > { %v3390_v16 = vadd.f32 1e-06, %v613_v4  ;;  %v2741_v17 = vpop.eup %2740  ;;  %v3393_v20 = vsub.f32 %v3267_v19, %v537_v8 }
 0x19a   : > { %v627_v13 = vadd.f32 1e-06, %v611_v1  ;;  %v709_v41 = vmul.f32 %v2739_v55, %v708_v6  ;;  %v715_v62 = vmul.f32 %v2741_v17, %v626_v53  ;;  %vm721_vm9 = vweird.f32 %v2741_v17 }
 0x19b   : > { %v569_v21 = vmul.f32 %v3393_v20, %v3393_v20  ;;  %vm722_vm13 = vmor %vm720_vm12, %vm721_vm9  ;;  %vm750_vm1 = vweird.f32 %v3390_v16 }
 0x19c   : > { %2742 = vrsqrt.f32 %v627_v13  ;;  %v713_v49 = vsel %vm712_vm8, %v2739_v55, %v709_v41  ;;  %v716_v23 = vmul.f32 %v2741_v17, %v715_v62  ;;  %vm730_vm10 = vweird.f32 %v627_v13 }
 0x19d   : > { %2744 = vrsqrt.f32 %v3390_v16  ;;  %v801_v2 = vmul.f32 %v713_v49, %v3218_v29  ;;  %600 = vadd.xlane.f32.xlu1 %v569_v21 }
 0x19e   : > { %v717_v15 = vmul.f32 0.5, %v716_v23  ;;  %v595_v31 = vpop.xlane.xlu1 %594 }
 0x19f   : > { %v591_v24 = vpop.xlane.xlu2 %590  ;;  %v821_v19 = vmul.f32 %v3278_v0, %v801_v2  ;;  %v614_v36 = vmul.f32 %v595_v31, %v2942_v27 }
 0x1a0   : > { %v612_v63 = vmul.f32 %v591_v24, %v2942_v27  ;;  %v718_v28 = vsub.f32 1.5, %v717_v15  ;;  %v2655_v15 = vld [vmem:[%s4000_s6 + $0x58] sm:$0xff] }
 0x1a1   : > { %v3406_v35 = vadd.f32 %v3294_v43, %v821_v19  ;;  %v3415_v52 = vadd.f32 1e-06, %v614_v36 }
 0x1a2   : > { %v2743_v26 = vpop.eup %2742  ;;  %v628_v56 = vadd.f32 1e-06, %v612_v63  ;;  %v719_v44 = vmul.f32 %v2741_v17, %v718_v28  ;;  %v2651_v28 = vld [vmem:[%s4000_s6 + $0x38] sm:$0xff] }
 0x1a3   : > { %v3408_v29 = vpop.eup %2744  ;;  %v725_v47 = vmul.f32 %v2743_v26, %v627_v13  ;;  %v853_v37 = vpack.c.bf16 %v3406_v35, %v3403_v30  ;;  %vm731_vm11 = vweird.f32 %v2743_v26  ;;  %1608 = vmatpush.bf16.msrb.mxu0 %v2651_v28  ;;  %vm760_vm7 = vweird.f32 %v3415_v52 }
 0x1a4   : > { %2746 = vrsqrt.f32 %v628_v56  ;;  %v745_v50 = vmul.f32 %v3408_v29, %v3390_v16  ;;  %v723_v55 = vsel %vm722_vm13, %v2741_v17, %v719_v44  ;;  %vm732_vm14 = vmor %vm730_vm10, %vm731_vm11  ;;  %vm740_vm15 = vweird.f32 %v628_v56  ;;  %v2667_v16 = vld [vmem:[%s4000_s6 + $0xb8] sm:$0xff]  ;;  %v2650_v44 = vld [vmem:[%s4000_s6 + $0x30] sm:$0xff] }
 0x1a5   : > { %v726_v38 = vmul.f32 %v2743_v26, %v725_v47  ;;  %1083 = vmatmul.bf16.gmra.mxu0 %v853_v37  ;;  %1132 = vmatmul.bf16.gmra.mxu1 %v853_v37  ;;  %2748 = vrsqrt.f32 %v3415_v52  ;;  %v802_v53 = vmul.f32 %v723_v55, %v3230_v46  ;;  %vm751_vm2 = vweird.f32 %v3408_v29  ;;  %v2659_v47 = vld [vmem:[%s4000_s6 + $0x78] sm:$0xff] }
 0x1a6   : > { %1181 = vmatmul.bf16.gmra.mxu2 %v853_v37  ;;  %1230 = vmatmul.bf16.gmra.mxu3 %v853_v37  ;;  %v746_v57 = vmul.f32 %v3408_v29, %v745_v50  ;;  %vm3454_vm4 = vmor %vm750_vm1, %vm751_vm2 }
 0x1a7   : > { %v727_v51 = vmul.f32 0.5, %v726_v38  ;;  %v597_v7 = vpop.xlane.xlu2 %596  ;;  %v822_v8 = vmul.f32 %v3278_v0, %v802_v53  ;;  %1706 = vmatpush.bf16.msrb.mxu2 %v2667_v16  ;;  %1657 = vmatpush.bf16.msrb.mxu1 %v2659_v47  ;;  %v2674_v38 = vld [vmem:[%s4000_s6 + $0xf0] sm:$0xff]  ;;  %v2671_v16 = vld [vmem:[%s4000_s6 + $0xd8] sm:$0xff] }
 0x1a8   : > { %v615_v25 = vmul.f32 %v597_v7, %v2942_v27  ;;  %v747_v1 = vmul.f32 0.5, %v746_v57  ;;  %1756 = vmatpush.bf16.msrb.mxu3 %v2674_v38  ;;  %1609 = vmatpush.bf16.msrb.mxu0 %v2650_v44  ;;  %v2657_v57 = vld [vmem:[%s4000_s6 + $0x68] sm:$0xff] }
 0x1a9   : > { %v728_v9 = vsub.f32 1.5, %v727_v51  ;;  %v3443_v21 = vadd.f32 %v3294_v43, %v822_v8  ;;  %v2665_v51 = vld [vmem:[%s4000_s6 + $0xa8] sm:$0xff] }
 0x1aa   : > { %v2747_v33 = vpop.eup %2746  ;;  %v3419_v58 = vadd.f32 1e-06, %v615_v25  ;;  %v748_v13 = vsub.f32 1.5, %v747_v1  ;;  %v2649_v25 = vld [vmem:[%s4000_s6 + $0x28] sm:$0xff] }
 0x1ab   : > { %v729_v45 = vmul.f32 %v2743_v26, %v728_v9  ;;  %v735_v59 = vmul.f32 %v2747_v33, %v628_v56  ;;  %v3427_v10 = vpop.eup %2748  ;;  %vm741_vm0 = vweird.f32 %v2747_v33  ;;  %v2673_v9 = vld [vmem:[%s4000_s6 + $0xe8] sm:$0xff] }
 0x1ac   : > { %2750 = vrsqrt.f32 %v3419_v58  ;;  %vm3438_vm3 = vmor %vm740_vm15, %vm741_vm0  ;;  %v749_v2 = vmul.f32 %v3408_v29, %v748_v13  ;;  %v755_v23 = vmul.f32 %v3427_v10, %v3415_v52  ;;  %vm770_vm5 = vweird.f32 %v3419_v58  ;;  %1757 = vmatpush.bf16.msrb.mxu3 %v2673_v9  ;;  %1610 = vmatpush.bf16.msrb.mxu0 %v2649_v25  ;;  %v2653_v9 = vld [vmem:[%s4000_s6 + $0x48] sm:$0xff] }
 0x1ad   : > { %v733_v60 = vsel %vm732_vm14, %v2743_v26, %v729_v45  ;;  %v736_v3 = vmul.f32 %v2747_v33, %v735_v59  ;;  %v2664_v59 = vld [vmem:[%s4000_s6 + $0xa0] sm:$0xff]  ;;  %vm761_vm8 = vweird.f32 %v3427_v10 }
 0x1ae   : > { %v803_v61 = vmul.f32 %v733_v60, %v3261_v14  ;;  %v753_v31 = vsel %vm3454_vm4, %v3408_v29, %v749_v2  ;;  %v756_v26 = vmul.f32 %v3427_v10, %v755_v23  ;;  %v2666_v29 = vld [vmem:[%s4000_s6 + $0xb0] sm:$0xff]  ;;  %v2648_v60 = vld [vmem:[%s4000_s6 + $0x20] sm:$0xff]  ;;  %vm762_vm10 = vmor %vm760_vm7, %vm761_vm8 }
 0x1af   : > { %v737_v4 = vmul.f32 0.5, %v736_v3  ;;  %v805_v37 = vmul.f32 %v753_v31, %v3254_v11  ;;  %1707 = vmatpush.bf16.msrb.mxu2 %v2666_v29  ;;  %v2663_v23 = vld [vmem:[%s4000_s6 + $0x98] sm:$0xff]  ;;  %v2646_v31 = vld [vmem:[%s4000_s6 + $0x10] sm:$0xff]  ;;  %v3575_v29 = vpop.f32.mrf.mxu1 }
 0x1b0   : > { %v823_v6 = vmul.f32 %v3278_v0, %v803_v61  ;;  %v757_v50 = vmul.f32 0.5, %v756_v26  ;;  %1611 = vmatpush.bf16.msrb.mxu0 %v2648_v60  ;;  %v2654_v26 = vld [vmem:[%s4000_s6 + $0x50] sm:$0xff]  ;;  %v3577_v38 = vpop.f32.mrf.mxu2 }
 0x1b1   : > { %v738_v17 = vsub.f32 1.5, %v737_v4  ;;  %v825_v55 = vmul.f32 %v3278_v0, %v805_v37  ;;  %v2656_v4 = vld [vmem:[%s4000_s6 + $0x60] sm:$0xff]  ;;  %v3573_v37 = vpop.f32.mrf.mxu0  ;;  %v3579_v44 = vpop.f32.mrf.mxu3 }
 0x1b2   : > { %v3429_v41 = vpop.eup %2750  ;;  %v3432_v46 = vadd.f32 %v3294_v43, %v823_v6 }
 0x1b3   : > { %v739_v14 = vmul.f32 %v2747_v33, %v738_v17  ;;  %v765_v62 = vmul.f32 %v3429_v41, %v3419_v58  ;;  %vm771_vm6 = vweird.f32 %v3429_v41  ;;  %1708 = vmatpush.bf16.msrb.mxu2 %v2665_v51  ;;  %v2672_v58 = vld [vmem:[%s4000_s6 + $0xe0] sm:$0xff]  ;;  %v3523_v52 = vadd.f32 %v3294_v43, %v825_v55  ;;  %v2669_v51 = vld [vmem:[%s4000_s6 + $0xc8] sm:$0xff] }
 0x1b4   : > { %v854_v24 = vpack.c.bf16 %v3432_v46, %v3443_v21  ;;  %vm3518_vm9 = vmor %vm770_vm5, %vm771_vm6  ;;  %1758 = vmatpush.bf16.msrb.mxu3 %v2672_v58  ;;  %1612 = vmatpush.bf16.msrb.mxu0 %v2647_v18 }
 0x1b5   : > { %v743_v19 = vsel %vm3438_vm3, %v2747_v33, %v739_v14  ;;  %v766_v63 = vmul.f32 %v3429_v41, %v765_v62  ;;  %v758_v33 = vsub.f32 1.5, %v757_v50 }
 0x1b6   : > { %1088 = vmatmul.bf16.gmra.mxu0 %v854_v24  ;;  %1137 = vmatmul.bf16.gmra.mxu1 %v854_v24  ;;  %v804_v56 = vmul.f32 %v743_v19, %v3303_v42  ;;  %v2658_v42 = vld [vmem:[%s4000_s6 + $0x70] sm:$0xff] }
 0x1b7   : > { %1186 = vmatmul.bf16.gmra.mxu2 %v854_v24  ;;  %1235 = vmatmul.bf16.gmra.mxu3 %v854_v24  ;;  %v767_v36 = vmul.f32 0.5, %v766_v63  ;;  %v759_v1 = vmul.f32 %v3427_v10, %v758_v33  ;;  %v2662_v19 = vld [vmem:[%s4000_s6 + $0x90] sm:$0xff] }
 0x1b8   : > { %v824_v11 = vmul.f32 %v3278_v0, %v804_v56  ;;  %1658 = vmatpush.bf16.msrb.mxu1 %v2658_v42  ;;  %1709 = vmatpush.bf16.msrb.mxu2 %v2664_v59  ;;  %v2670_v63 = vld [vmem:[%s4000_s6 + $0xd0] sm:$0xff]  ;;  %v2661_v42 = vld [vmem:[%s4000_s6 + $0x88] sm:$0xff]  ;;  %v1120_v59 = vpop.f32.mrf.mxu1  ;;  %v1169_v60 = vpop.f32.mrf.mxu2 }
 0x1b9   : > { %v768_v7 = vsub.f32 1.5, %v767_v36  ;;  %v763_v8 = vsel %vm762_vm10, %v3427_v10, %v759_v1  ;;  %1759 = vmatpush.bf16.msrb.mxu3 %v2671_v16  ;;  %1613 = vmatpush.bf16.msrb.mxu0 %v2646_v31  ;;  %v1071_v33 = vpop.f32.mrf.mxu0  ;;  %v1218_v61 = vpop.f32.mrf.mxu3  ;;  %v890_v31 = vld [vmem:[%s3999_s5] sm:$0xf] }
 0x1ba   : > { %v3504_v45 = vadd.f32 %v3294_v43, %v824_v11  ;;  %v806_v17 = vmul.f32 %v763_v8, %v3298_v39  ;;  %v2668_v8 = vld [vmem:[%s4000_s6 + $0xc0] sm:$0xff] }
 0x1bb   : > { %v769_v53 = vmul.f32 %v3429_v41, %v768_v7  ;;  %v2645_v7 = vld [vmem:[%s4000_s6 + $0x8] sm:$0xff] }
 0x1bc   : > { %1659 = vmatpush.bf16.msrb.mxu1 %v2657_v57  ;;  %v855_v3 = vpack.c.bf16 %v3523_v52, %v3504_v45  ;;  %v826_v62 = vmul.f32 %v3278_v0, %v806_v17  ;;  %1710 = vmatpush.bf16.msrb.mxu2 %v2663_v23 }
 0x1bd   : > { %v773_v6 = vsel %vm3518_vm9, %v3429_v41, %v769_v53  ;;  %1760 = vmatpush.bf16.msrb.mxu3 %v2670_v63  ;;  %1614 = vmatpush.bf16.msrb.mxu0 %v2645_v7 }
 0x1be   : > { %v807_v13 = vmul.f32 %v773_v6, %v3344_v5  ;;  %v3543_v41 = vadd.f32 %v3294_v43, %v826_v62  ;;  %v599_v5 = vpop.xlane.xlu0 %598  ;;  %v2660_v6 = vld [vmem:[%s4000_s6 + $0x80] sm:$0xff] }
 0x1bf   : > { %v616_v39 = vmul.f32 %v599_v5, %v2942_v27 }
 0x1c0   : > { %1660 = vmatpush.bf16.msrb.mxu1 %v2656_v4  ;;  %v827_v14 = vmul.f32 %v3278_v0, %v807_v13  ;;  %1711 = vmatpush.bf16.msrb.mxu2 %v2662_v19  ;;  %v2652_v4 = vld [vmem:[%s4000_s6 + $0x40] sm:$0xff]  ;;  %v1172_v23 = vpop.f32.mrf.mxu2 }
 0x1c1   : > { %v632_v2 = vadd.f32 1e-06, %v616_v39  ;;  %1761 = vmatpush.bf16.msrb.mxu3 %v2669_v51  ;;  %v1074_v5 = vpop.f32.mrf.mxu0  ;;  %v1123_v39 = vpop.f32.mrf.mxu1 }
 0x1c2   : > { %v3540_v49 = vadd.f32 %v3294_v43, %v827_v14  ;;  %v1221_v16 = vpop.f32.mrf.mxu3 }
 0x1c3   : > { %2752 = vrsqrt.f32 %v632_v2  ;;  %vm780_vm11 = vweird.f32 %v632_v2 }
 0x1c4   : > { %v856_v10 = vpack.c.bf16 %v3540_v49, %v3543_v41  ;;  %1661 = vmatpush.bf16.msrb.mxu1 %v2655_v15  ;;  %1712 = vmatpush.bf16.msrb.mxu2 %v2661_v42 }
 0x1c5   : > { %1762 = vmatpush.bf16.msrb.mxu3 %v2668_v8 }
 0x1c6   : > { %1093 = vmatmul.bf16.gmra.mxu0 %v855_v3  ;;  %1142 = vmatmul.bf16.gmra.mxu1 %v855_v3 }
 0x1c7   : > { %1191 = vmatmul.bf16.gmra.mxu2 %v855_v3  ;;  %1240 = vmatmul.bf16.gmra.mxu3 %v855_v3  ;;  %v2644_v3 = vld [vmem:[%s4000_s6] sm:$0xff] }
 0x1c8   : > { %1662 = vmatpush.bf16.msrb.mxu1 %v2654_v26  ;;  %1615 = vmatpush.bf16.msrb.mxu0 %v2644_v3 }
 0x1c9   : > { %v2753_v24 = vpop.eup %2752  ;;  %1713 = vmatpush.bf16.msrb.mxu2 %v2660_v6  ;;  %v1125_v26 = vpop.f32.mrf.mxu1 }
 0x1ca   : > { %v775_v28 = vmul.f32 %v2753_v24, %v632_v2  ;;  %vm781_vm12 = vweird.f32 %v2753_v24 }
 0x1cb   : > { %vm3593_vm13 = vmor %vm780_vm11, %vm781_vm12 }
 0x1cc   : > { %v776_v47 = vmul.f32 %v2753_v24, %v775_v28  ;;  %1663 = vmatpush.bf16.msrb.mxu1 %v2653_v9  ;;  %v1223_v28 = vpop.f32.mrf.mxu3 }
 0x1ce   : > { %v777_v11 = vmul.f32 0.5, %v776_v47  ;;  %v3626_v47 = vperm.slane %v890_v31, 0 }
 0x1d0   : > { %v778_v25 = vsub.f32 1.5, %v777_v11  ;;  %1664 = vmatpush.bf16.msrb.mxu1 %v2652_v4  ;;  %v1070_v7 = vadd.f32 %v3573_v37, %v3626_v47 }
 0x1d2   : > { %v779_v57 = vmul.f32 %v2753_v24, %v778_v25 }
 0x1d4   : > { %v783_v13 = vsel %vm3593_vm13, %v2753_v24, %v779_v57  ;;  %v1226_v4 = vpop.f32.mrf.mxu3 }
 0x1d5   : > { %v808_v62 = vmul.f32 %v783_v13, %v3354_v12 }
 0x1d6   : > { %1098 = vmatmul.bf16.gmra.mxu0 %v856_v10  ;;  %1147 = vmatmul.bf16.gmra.mxu1 %v856_v10 }
 0x1d7   : > { %1196 = vmatmul.bf16.gmra.mxu2 %v856_v10  ;;  %1245 = vmatmul.bf16.gmra.mxu3 %v856_v10  ;;  %v828_v15 = vmul.f32 %v3278_v0, %v808_v62 }
 0x1d9   : > { %v3616_v19 = vadd.f32 %v3294_v43, %v828_v15 }
 0x210   : > { %v601_v56 = vpop.xlane.xlu1 %600 }
 0x211   : > { %v617_v36 = vmul.f32 %v601_v56, %v2942_v27  ;;  %v3628_v56 = vperm.slane %v890_v31, 1 }
 0x213   : > { %v633_v50 = vadd.f32 1e-06, %v617_v36  ;;  %v3632_v36 = vperm.slane %v890_v31, 3  ;;  %v1121_v42 = vadd.f32 %v1120_v59, %v3628_v56  ;;  %v1119_v9 = vadd.f32 %v3575_v29, %v3628_v56 }
 0x214   : > { %v1126_v62 = vadd.f32 %v1125_v26, %v3628_v56 }
 0x215   : > { %2754 = vrsqrt.f32 %v633_v50  ;;  %vm790_vm15 = vweird.f32 %v633_v50  ;;  %v1219_v51 = vadd.f32 %v1218_v61, %v3632_v36  ;;  %v1257_v61 = vmax.f32 %v1119_v9, 0.0 }
 0x216   : > { %v1224_v15 = vadd.f32 %v1223_v28, %v3632_v36 }
 0x217   : > { %v1263_v59 = vmax.f32 %v1219_v51, 0.0 }
 0x21b   : > { %v2755_v55 = vpop.eup %2754 }
 0x21c   : > { %v785_v53 = vmul.f32 %v2755_v55, %v633_v50  ;;  %vm791_vm14 = vweird.f32 %v2755_v55  ;;  %v1072_v50 = vadd.f32 %v1071_v33, %v3626_v47  ;;  %v1261_v33 = vmax.f32 %v1121_v42, 0.0 }
 0x21d   : > { %vm792_vm0 = vmor %vm790_vm15, %vm791_vm14 }
 0x21e   : > { %v786_v1 = vmul.f32 %v2755_v55, %v785_v53  ;;  %v1260_v57 = vmax.f32 %v1072_v50, 0.0  ;;  %v1321_v29 = vpack.c.bf16 %v1261_v33, %v1257_v61  ;;  %v1222_v50 = vadd.f32 %v1221_v16, %v3632_v36 }
 0x220   : > { %v787_v17 = vmul.f32 0.5, %v786_v1  ;;  %v1256_v1 = vmax.f32 %v1070_v7, 0.0 }
 0x222   : > { %v788_v14 = vsub.f32 1.5, %v787_v17  ;;  %v1320_v8 = vpack.c.bf16 %v1260_v57, %v1256_v1 }
 0x224   : > { %v789_v10 = vmul.f32 %v2755_v55, %v788_v14 }
 0x226   : > { %v793_v2 = vsel %vm792_vm0, %v2755_v55, %v789_v10  ;;  %v1217_v55 = vadd.f32 %v3579_v44, %v3632_v36 }
 0x227   : > { %v809_v18 = vmul.f32 %v793_v2, %v3393_v20  ;;  %v1076_v20 = vpop.f32.mrf.mxu0  ;;  %v1228_v2 = vpop.f32.mrf.mxu3 }
 0x228   : > { %v1259_v6 = vmax.f32 %v1217_v55, 0.0  ;;  %v1077_v14 = vadd.f32 %v1076_v20, %v3626_v47  ;;  %v1271_v20 = vmax.f32 %v1224_v15, 0.0  ;;  %v1229_v1 = vadd.f32 %v1228_v2, %v3632_v36 }
 0x229   : > { %v829_v24 = vmul.f32 %v3278_v0, %v809_v18  ;;  %v1174_v0 = vpop.f32.mrf.mxu2 }
 0x22a   : > { %v1323_v17 = vpack.c.bf16 %v1263_v59, %v1259_v6  ;;  %v1268_v42 = vmax.f32 %v1077_v14, 0.0  ;;  %v1227_v14 = vadd.f32 %v1226_v4, %v3632_v36 }
 0x22b   : > { %v3619_v63 = vadd.f32 %v3294_v43, %v829_v24  ;;  %v3630_v43 = vperm.slane %v890_v31, 2  ;;  %v1075_v24 = vadd.f32 %v1074_v5, %v3626_v47 }
 0x22c   : > { %v1275_v2 = vmax.f32 %v1227_v14, 0.0 }
 0x22d   : > { %v857_v12 = vpack.c.bf16 %v3619_v63, %v3616_v19  ;;  %v1170_v11 = vadd.f32 %v1169_v60, %v3630_v43  ;;  %v1168_v25 = vadd.f32 %v3577_v38, %v3630_v43  ;;  %v1128_v60 = vpop.f32.mrf.mxu1  ;;  %v1175_v18 = vadd.f32 %v1174_v0, %v3630_v43 }
 0x22e   : > { %v1173_v31 = vadd.f32 %v1172_v23, %v3630_v43  ;;  %v1264_v7 = vmax.f32 %v1075_v24, 0.0 }
 0x22f   : > { %1103 = vmatmul.bf16.gmra.mxu0 %v857_v12  ;;  %1152 = vmatmul.bf16.gmra.mxu1 %v857_v12  ;;  %v1262_v53 = vmax.f32 %v1170_v11, 0.0  ;;  %v1079_v58 = vpop.f32.mrf.mxu0  ;;  %v1258_v37 = vmax.f32 %v1168_v25, 0.0  ;;  %v1269_v11 = vmax.f32 %v1126_v62, 0.0  ;;  %v1270_v51 = vmax.f32 %v1175_v18, 0.0  ;;  %v1231_v28 = vpop.f32.mrf.mxu3 }
 0x230   : > { %1201 = vmatmul.bf16.gmra.mxu2 %v857_v12  ;;  %1250 = vmatmul.bf16.gmra.mxu3 %v857_v12  ;;  %v1124_v12 = vadd.f32 %v1123_v39, %v3628_v56  ;;  %v1266_v9 = vmax.f32 %v1173_v31, 0.0  ;;  %v1267_v25 = vmax.f32 %v1222_v50, 0.0  ;;  %v1324_v33 = vpack.c.bf16 %v1268_v42, %v1264_v7 }
 0x231   : > { %v1177_v3 = vpop.f32.mrf.mxu2  ;;  %v1322_v13 = vpack.c.bf16 %v1262_v53, %v1258_v37  ;;  %v1080_v6 = vadd.f32 %v1079_v58, %v3626_v47 }
 0x232   : > { %v1265_v26 = vmax.f32 %v1124_v12, 0.0  ;;  %v1326_v53 = vpack.c.bf16 %v1270_v51, %v1266_v9  ;;  %v1327_v39 = vpack.c.bf16 %v1271_v20, %v1267_v25 }
 0x233   : > { %v1272_v15 = vmax.f32 %v1080_v6, 0.0 }
 0x234   : > { %v1325_v5 = vpack.c.bf16 %v1269_v11, %v1265_v26 }
 0x235   : > { %v1130_v44 = vpop.f32.mrf.mxu1 }
 0x236   : > { %v1131_v16 = vadd.f32 %v1130_v44, %v3628_v56  ;;  %v1279_v44 = vmax.f32 %v1229_v1, 0.0 }
 0x237   : > { %v1081_v38 = vpop.f32.mrf.mxu0 }
 0x238   : > { %v1082_v23 = vadd.f32 %v1081_v38, %v3626_v47  ;;  %v1277_v38 = vmax.f32 %v1131_v16, 0.0  ;;  %v1331_v58 = vpack.c.bf16 %v1279_v44, %v1275_v2 }
 0x239   : > { %v1179_v10 = vpop.f32.mrf.mxu2 }
 0x23a   : > { %v1180_v59 = vadd.f32 %v1179_v10, %v3630_v43  ;;  %v1276_v62 = vmax.f32 %v1082_v23, 0.0 }
 0x23c   : > { %v1278_v18 = vmax.f32 %v1180_v59, 0.0  ;;  %v1328_v12 = vpack.c.bf16 %v1276_v62, %v1272_v15 }
 0x23d   : > { %v1133_v0 = vpop.f32.mrf.mxu1 }
 0x23e   : > { %v1134_v9 = vadd.f32 %v1133_v0, %v3628_v56 }
 0x23f   : > { %1616 = vmatmul.bf16.vlgmr.msrb.gmra.mxu0 %v1320_v8  ;;  %1665 = vmatmul.bf16.vlgmr.msrb.gmra.mxu1 %v1321_v29  ;;  %v1084_v55 = vpop.f32.mrf.mxu0  ;;  %v1129_v8 = vadd.f32 %v1128_v60, %v3628_v56 }
 0x240   : > { %1714 = vmatmul.bf16.vlgmr.msrb.gmra.mxu2 %v1322_v13  ;;  %1763 = vmatmul.bf16.vlgmr.msrb.gmra.mxu3 %v1323_v17  ;;  %v1233_v13 = vpop.f32.mrf.mxu3  ;;  %v1178_v17 = vadd.f32 %v1177_v3, %v3630_v43  ;;  %v1085_v26 = vadd.f32 %v1084_v55, %v3626_v47 }
 0x241   : > { %v1182_v57 = vpop.f32.mrf.mxu2  ;;  %v1273_v10 = vmax.f32 %v1129_v8, 0.0  ;;  %v1234_v7 = vadd.f32 %v1233_v13, %v3632_v36 }
 0x242   : > { %v1274_v24 = vmax.f32 %v1178_v17, 0.0  ;;  %v1183_v25 = vadd.f32 %v1182_v57, %v3630_v43  ;;  %v1280_v1 = vmax.f32 %v1085_v26, 0.0 }
 0x243   : > { %v1329_v31 = vpack.c.bf16 %v1277_v38, %v1273_v10  ;;  %v1287_v23 = vmax.f32 %v1234_v7, 0.0 }
 0x244   : > { %v1330_v50 = vpack.c.bf16 %v1278_v18, %v1274_v24  ;;  %v1282_v8 = vmax.f32 %v1183_v25, 0.0 }
 0x245   : > { %v1135_v37 = vpop.f32.mrf.mxu1 }
 0x246   : > { %v1136_v51 = vadd.f32 %v1135_v37, %v3628_v56 }
 0x247   : > { %v1086_v61 = vpop.f32.mrf.mxu0 }
 0x248   : > { %v1236_v4 = vpop.f32.mrf.mxu3  ;;  %v1087_v11 = vadd.f32 %v1086_v61, %v3626_v47  ;;  %v1281_v61 = vmax.f32 %v1134_v9, 0.0 }
 0x249   : > { %v1184_v29 = vpop.f32.mrf.mxu2 }
 0x24a   : > { %v1185_v20 = vadd.f32 %v1184_v29, %v3630_v43 }
 0x24d   : > { %v1138_v42 = vpop.f32.mrf.mxu1 }
 0x24e   : > { %v1139_v24 = vadd.f32 %v1138_v42, %v3628_v56 }
 0x24f   : > { %1621 = vmatmul.bf16.gmra.mxu0 %v1324_v33  ;;  %1670 = vmatmul.bf16.gmra.mxu1 %v1325_v5  ;;  %v1089_v60 = vpop.f32.mrf.mxu0  ;;  %v1232_v33 = vadd.f32 %v1231_v28, %v3632_v36  ;;  %v1284_v5 = vmax.f32 %v1087_v11, 0.0 }
 0x250   : > { %1719 = vmatmul.bf16.gmra.mxu2 %v1326_v53  ;;  %1768 = vmatmul.bf16.gmra.mxu3 %v1327_v39  ;;  %v1285_v53 = vmax.f32 %v1136_v51, 0.0  ;;  %v1286_v39 = vmax.f32 %v1185_v20, 0.0  ;;  %v1238_v6 = vpop.f32.mrf.mxu3  ;;  %v1090_v10 = vadd.f32 %v1089_v60, %v3626_v47  ;;  %v1289_v20 = vmax.f32 %v1139_v24, 0.0 }
 0x251   : > { %v1187_v3 = vpop.f32.mrf.mxu2  ;;  %v1283_v29 = vmax.f32 %v1232_v33, 0.0  ;;  %v1332_v13 = vpack.c.bf16 %v1284_v5, %v1280_v1  ;;  %v1239_v15 = vadd.f32 %v1238_v6, %v3632_v36 }
 0x252   : > { %v1333_v55 = vpack.c.bf16 %v1285_v53, %v1281_v61  ;;  %v1334_v17 = vpack.c.bf16 %v1286_v39, %v1282_v8  ;;  %v1188_v2 = vadd.f32 %v1187_v3, %v3630_v43  ;;  %v1288_v51 = vmax.f32 %v1090_v10, 0.0 }
 0x253   : > { %v1335_v0 = vpack.c.bf16 %v1287_v23, %v1283_v29  ;;  %v1295_v11 = vmax.f32 %v1239_v15, 0.0 }
 0x254   : > { %v1290_v7 = vmax.f32 %v1188_v2, 0.0 }
 0x255   : > { %v1140_v59 = vpop.f32.mrf.mxu1 }
 0x256   : > { %v1141_v62 = vadd.f32 %v1140_v59, %v3628_v56 }
 0x257   : > { %v1091_v16 = vpop.f32.mrf.mxu0 }
 0x258   : > { %v1092_v14 = vadd.f32 %v1091_v16, %v3626_v47  ;;  %v1241_v18 = vpop.f32.mrf.mxu3 }
 0x259   : > { %v1189_v37 = vpop.f32.mrf.mxu2 }
 0x25a   : > { %v1190_v44 = vadd.f32 %v1189_v37, %v3630_v43  ;;  %v1242_v37 = vadd.f32 %v1241_v18, %v3632_v36 }
 0x25c   : > { %v1299_v10 = vmax.f32 %v1242_v37, 0.0 }
 0x25d   : > { %v1143_v28 = vpop.f32.mrf.mxu1 }
 0x25e   : > { %v1144_v1 = vadd.f32 %v1143_v28, %v3628_v56 }
 0x25f   : > { %1626 = vmatmul.bf16.gmra.mxu0 %v1328_v12  ;;  %1675 = vmatmul.bf16.gmra.mxu1 %v1329_v31  ;;  %v1094_v57 = vpop.f32.mrf.mxu0  ;;  %v1237_v12 = vadd.f32 %v1236_v4, %v3632_v36  ;;  %v1292_v31 = vmax.f32 %v1092_v14, 0.0 }
 0x260   : > { %1724 = vmatmul.bf16.gmra.mxu2 %v1330_v50  ;;  %1773 = vmatmul.bf16.gmra.mxu3 %v1331_v58  ;;  %v1293_v50 = vmax.f32 %v1141_v62, 0.0  ;;  %v1294_v58 = vmax.f32 %v1190_v44, 0.0  ;;  %v1243_v42 = vpop.f32.mrf.mxu3  ;;  %v1095_v59 = vadd.f32 %v1094_v57, %v3626_v47  ;;  %v1297_v44 = vmax.f32 %v1144_v1, 0.0 }
 0x261   : > { %v1192_v38 = vpop.f32.mrf.mxu2  ;;  %v1291_v26 = vmax.f32 %v1237_v12, 0.0  ;;  %v1336_v9 = vpack.c.bf16 %v1292_v31, %v1288_v51  ;;  %v1244_v16 = vadd.f32 %v1243_v42, %v3632_v36 }
 0x262   : > { %v1337_v25 = vpack.c.bf16 %v1293_v50, %v1289_v20  ;;  %v1338_v33 = vpack.c.bf16 %v1294_v58, %v1290_v7  ;;  %v1193_v61 = vadd.f32 %v1192_v38, %v3630_v43  ;;  %v1296_v62 = vmax.f32 %v1095_v59, 0.0 }
 0x263   : > { %v1339_v5 = vpack.c.bf16 %v1295_v11, %v1291_v26  ;;  %v1303_v14 = vmax.f32 %v1244_v16, 0.0 }
 0x264   : > { %v1298_v15 = vmax.f32 %v1193_v61, 0.0 }
 0x265   : > { %v1145_v60 = vpop.f32.mrf.mxu1  ;;  %v1343_v28 = vpack.c.bf16 %v1303_v14, %v1299_v10 }
 0x266   : > { %v1146_v4 = vadd.f32 %v1145_v60, %v3628_v56 }
 0x267   : > { %v1096_v53 = vpop.f32.mrf.mxu0 }
 0x268   : > { %v1097_v3 = vadd.f32 %v1096_v53, %v3626_v47 }
 0x269   : > { %v1194_v39 = vpop.f32.mrf.mxu2 }
 0x26a   : > { %v1195_v23 = vadd.f32 %v1194_v39, %v3630_v43  ;;  %v1300_v29 = vmax.f32 %v1097_v3, 0.0 }
 0x26c   : > { %v1340_v24 = vpack.c.bf16 %v1300_v29, %v1296_v62 }
 0x26d   : > { %v1148_v8 = vpop.f32.mrf.mxu1 }
 0x26e   : > { %v1149_v7 = vadd.f32 %v1148_v8, %v3628_v56 }
 0x26f   : > { %1631 = vmatmul.bf16.gmra.mxu0 %v1332_v13  ;;  %1680 = vmatmul.bf16.gmra.mxu1 %v1333_v55  ;;  %v1099_v6 = vpop.f32.mrf.mxu0  ;;  %v1301_v13 = vmax.f32 %v1146_v4, 0.0 }
 0x270   : > { %1729 = vmatmul.bf16.gmra.mxu2 %v1334_v17  ;;  %1778 = vmatmul.bf16.gmra.mxu3 %v1335_v0  ;;  %v1246_v17 = vpop.f32.mrf.mxu3  ;;  %v1302_v0 = vmax.f32 %v1195_v23, 0.0  ;;  %v1100_v20 = vadd.f32 %v1099_v6, %v3626_v47  ;;  %v1305_v39 = vmax.f32 %v1149_v7, 0.0 }
 0x271   : > { %v1197_v55 = vpop.f32.mrf.mxu2  ;;  %v1341_v57 = vpack.c.bf16 %v1301_v13, %v1297_v44 }
 0x272   : > { %v1342_v2 = vpack.c.bf16 %v1302_v0, %v1298_v15  ;;  %v1198_v26 = vadd.f32 %v1197_v55, %v3630_v43  ;;  %v1304_v60 = vmax.f32 %v1100_v20, 0.0 }
 0x274   : > { %v1306_v42 = vmax.f32 %v1198_v26, 0.0 }
 0x275   : > { %v1150_v18 = vpop.f32.mrf.mxu1 }
 0x276   : > { %v1151_v58 = vadd.f32 %v1150_v18, %v3628_v56 }
 0x277   : > { %v1101_v38 = vpop.f32.mrf.mxu0 }
 0x278   : > { %v1248_v31 = vpop.f32.mrf.mxu3  ;;  %v1102_v50 = vadd.f32 %v1101_v38, %v3626_v47 }
 0x279   : > { %v1199_v12 = vpop.f32.mrf.mxu2  ;;  %v1249_v51 = vadd.f32 %v1248_v31, %v3632_v36 }
 0x27a   : > { %v1200_v11 = vadd.f32 %v1199_v12, %v3630_v43 }
 0x27b   : > { %v1311_v53 = vmax.f32 %v1249_v51, 0.0 }
 0x27f   : > { %1636 = vmatmul.bf16.gmra.mxu0 %v1336_v9  ;;  %1685 = vmatmul.bf16.gmra.mxu1 %v1337_v25  ;;  %v1247_v9 = vadd.f32 %v1246_v17, %v3632_v36  ;;  %v1308_v25 = vmax.f32 %v1102_v50, 0.0 }
 0x280   : > { %1734 = vmatmul.bf16.gmra.mxu2 %v1338_v33  ;;  %1783 = vmatmul.bf16.gmra.mxu3 %v1339_v5  ;;  %v1309_v33 = vmax.f32 %v1151_v58, 0.0  ;;  %v1310_v5 = vmax.f32 %v1200_v11, 0.0 }
 0x281   : > { %v1307_v3 = vmax.f32 %v1247_v9, 0.0  ;;  %v1344_v4 = vpack.c.bf16 %v1308_v25, %v1304_v60 }
 0x282   : > { %v1345_v23 = vpack.c.bf16 %v1309_v33, %v1305_v39  ;;  %v1346_v16 = vpack.c.bf16 %v1310_v5, %v1306_v42 }
 0x283   : > { %v1347_v59 = vpack.c.bf16 %v1311_v53, %v1307_v3 }
 0x28f   : > { %1641 = vmatmul.bf16.gmra.mxu0 %v1340_v24  ;;  %1690 = vmatmul.bf16.gmra.mxu1 %v1341_v57 }
 0x290   : > { %1739 = vmatmul.bf16.gmra.mxu2 %v1342_v2  ;;  %1788 = vmatmul.bf16.gmra.mxu3 %v1343_v28 }
 0x29f   : > { %1646 = vmatmul.bf16.gmra.mxu0 %v1344_v4  ;;  %1695 = vmatmul.bf16.gmra.mxu1 %v1345_v23 }
 0x2a0   : > { %1744 = vmatmul.bf16.gmra.mxu2 %v1346_v16  ;;  %1793 = vmatmul.bf16.gmra.mxu3 %v1347_v59 }
 0x2ac   : > { %v1104_v1 = vpop.f32.mrf.mxu0  ;;  %v1153_v61 = vpop.f32.mrf.mxu1 }
 0x2ad   : > { %v1105_v37 = vadd.f32 %v1104_v1, %v3626_v47  ;;  %v1154_v6 = vadd.f32 %v1153_v61, %v3628_v56 }
 0x2af   : > { %v1312_v14 = vmax.f32 %v1105_v37, 0.0  ;;  %v1313_v62 = vmax.f32 %v1154_v6, 0.0 }
 0x2b3   : > { %v1202_v8 = vpop.f32.mrf.mxu2  ;;  %v1251_v29 = vpop.f32.mrf.mxu3 }
 0x2b4   : > { %v1106_v13 = vpop.f32.mrf.mxu0  ;;  %v1155_v55 = vpop.f32.mrf.mxu1  ;;  %v1203_v57 = vadd.f32 %v1202_v8, %v3630_v43  ;;  %v1252_v2 = vadd.f32 %v1251_v29, %v3632_v36 }
 0x2b5   : > { %v1107_v17 = vadd.f32 %v1106_v13, %v3626_v47  ;;  %v1156_v0 = vadd.f32 %v1155_v55, %v3628_v56 }
 0x2b6   : > { %v1314_v31 = vmax.f32 %v1203_v57, 0.0  ;;  %v1315_v50 = vmax.f32 %v1252_v2, 0.0 }
 0x2b7   : > { %v1316_v44 = vmax.f32 %v1107_v17, 0.0  ;;  %v1317_v15 = vmax.f32 %v1156_v0, 0.0 }
 0x2b9   : > { %v1348_v10 = vpack.c.bf16 %v1316_v44, %v1312_v14  ;;  %v1349_v24 = vpack.c.bf16 %v1317_v15, %v1313_v62 }
 0x2bb   : > { %v1204_v28 = vpop.f32.mrf.mxu2  ;;  %v1253_v38 = vpop.f32.mrf.mxu3  ;;  %1651 = vmatmul.bf16.gmra.mxu0 %v1348_v10  ;;  %1700 = vmatmul.bf16.gmra.mxu1 %v1349_v24 }
 0x2bc   : > { %v1205_v18 = vadd.f32 %v1204_v28, %v3630_v43  ;;  %v1254_v47 = vadd.f32 %v1253_v38, %v3632_v36  ;;  %v1617_v12 = vpop.f32.mrf.mxu0  ;;  %v1666_v56 = vpop.f32.mrf.mxu1  ;;  %v3705_v43 = vld [vmem:[%s4001_s7] ss:$0 sm:$0xff] }
 0x2bd   : > { %v1667_v7 = vadd.f32 %v1666_v56, %v1617_v12 }
 0x2be   : > { %v1318_v58 = vmax.f32 %v1205_v18, 0.0  ;;  %v1319_v11 = vmax.f32 %v1254_v47, 0.0 }
 0x2c0   : > { %v1350_v51 = vpack.c.bf16 %v1318_v58, %v1314_v31  ;;  %v1351_v20 = vpack.c.bf16 %v1319_v11, %v1315_v50 }
 0x2c2   : > { %1749 = vmatmul.bf16.gmra.mxu2 %v1350_v51  ;;  %1798 = vmatmul.bf16.gmra.mxu3 %v1351_v20 }
 0x2c3   : > { %v1715_v26 = vpop.f32.mrf.mxu2  ;;  %v1764_v9 = vpop.f32.mrf.mxu3 }
 0x2c4   : > { %v1716_v25 = vadd.f32 %v1715_v26, %v1667_v7  ;;  %v1619_v33 = vpop.f32.mrf.mxu0  ;;  %v1668_v5 = vpop.f32.mrf.mxu1 }
 0x2c5   : > { %v1669_v60 = vadd.f32 %v1668_v5, %v1619_v33 }
 0x2c6   : > { %v1765_v53 = vadd.f32 %v1764_v9, %v1716_v25 }
 0x2c8   : > { %v1804_v36 = vadd.f32 %v1765_v53, %v3321_v54 }
 0x2ca   : > { %v3709_v39 = vadd.f32 %v3705_v43, %v1804_v36 }
 0x2cb   : > { %v1717_v42 = vpop.f32.mrf.mxu2  ;;  %v1766_v3 = vpop.f32.mrf.mxu3 }
 0x2cc   : > { %v1718_v4 = vadd.f32 %v1717_v42, %v1669_v60  ;;  %1840 = vadd.xlane.f32.xlu2 %v3709_v39  ;;  %v1622_v23 = vpop.f32.mrf.mxu0  ;;  %v1671_v16 = vpop.f32.mrf.mxu1 }
 0x2cd   : > { %v1672_v61 = vadd.f32 %v1671_v16, %v1622_v23 }
 0x2ce   : > { %v1767_v59 = vadd.f32 %v1766_v3, %v1718_v4 }
 0x2d0   : > { %v1805_v1 = vadd.f32 %v1767_v59, %v3306_v48 }
 0x2d2   : > { %v3714_v37 = vadd.f32 %v3705_v43, %v1805_v1 }
 0x2d3   : > { %v1720_v6 = vpop.f32.mrf.mxu2  ;;  %v1769_v54 = vpop.f32.mrf.mxu3 }
 0x2d4   : > { %v1721_v8 = vadd.f32 %v1720_v6, %v1672_v61  ;;  %1842 = vadd.xlane.f32.xlu0 %v3714_v37  ;;  %v1624_v29 = vpop.f32.mrf.mxu0  ;;  %v1673_v13 = vpop.f32.mrf.mxu1 }
 0x2d5   : > { %v1674_v0 = vadd.f32 %v1673_v13, %v1624_v29 }
 0x2d6   : > { %v1770_v55 = vadd.f32 %v1769_v54, %v1721_v8 }
 0x2d8   : > { %v1806_v17 = vadd.f32 %v1770_v55, %v3357_v40 }
 0x2da   : > { %v3719_v14 = vadd.f32 %v3705_v43, %v1806_v17 }
 0x2db   : > { %v1722_v62 = vpop.f32.mrf.mxu2  ;;  %v1771_v48 = vpop.f32.mrf.mxu3 }
 0x2dc   : > { %v1723_v44 = vadd.f32 %v1722_v62, %v1674_v0  ;;  %1844 = vadd.xlane.f32.xlu1 %v3719_v14  ;;  %v1627_v15 = vpop.f32.mrf.mxu0  ;;  %v1676_v10 = vpop.f32.mrf.mxu1 }
 0x2dd   : > { %v1677_v2 = vadd.f32 %v1676_v10, %v1627_v15 }
 0x2de   : > { %v1772_v24 = vadd.f32 %v1771_v48, %v1723_v44 }
 0x2e0   : > { %v1807_v57 = vadd.f32 %v1772_v24, %v3362_v22 }
 0x2e2   : > { %v3724_v28 = vadd.f32 %v3705_v43, %v1807_v57 }
 0x2e3   : > { %v1725_v38 = vpop.f32.mrf.mxu2  ;;  %v1774_v40 = vpop.f32.mrf.mxu3 }
 0x2e4   : > { %v1726_v18 = vadd.f32 %v1725_v38, %v1677_v2  ;;  %1846 = vadd.xlane.f32.xlu2 %v3724_v28  ;;  %v1629_v47 = vpop.f32.mrf.mxu0  ;;  %v1678_v12 = vpop.f32.mrf.mxu1 }
 0x2e5   : > { %v1679_v50 = vadd.f32 %v1678_v12, %v1629_v47 }
 0x2e6   : > { %v1775_v56 = vadd.f32 %v1774_v40, %v1726_v18 }
 0x2e8   : > { %v1808_v31 = vadd.f32 %v1775_v56, %v3378_v34 }
 0x2ea   : > { %v3729_v58 = vadd.f32 %v3705_v43, %v1808_v31 }
 0x2eb   : > { %v1727_v11 = vpop.f32.mrf.mxu2  ;;  %v1776_v22 = vpop.f32.mrf.mxu3 }
 0x2ec   : > { %v1728_v51 = vadd.f32 %v1727_v11, %v1679_v50  ;;  %1848 = vadd.xlane.f32.xlu0 %v3729_v58  ;;  %v1632_v20 = vpop.f32.mrf.mxu0  ;;  %v1681_v7 = vpop.f32.mrf.mxu1 }
 0x2ed   : > { %v1682_v25 = vadd.f32 %v1681_v7, %v1632_v20 }
 0x2ee   : > { %v1777_v26 = vadd.f32 %v1776_v22, %v1728_v51 }
 0x2f0   : > { %v1809_v9 = vadd.f32 %v1777_v26, %v3375_v32 }
 0x2f2   : > { %v3734_v33 = vadd.f32 %v3705_v43, %v1809_v9 }
 0x2f3   : > { %v1730_v5 = vpop.f32.mrf.mxu2  ;;  %v1779_v34 = vpop.f32.mrf.mxu3 }
 0x2f4   : > { %v1731_v53 = vadd.f32 %v1730_v5, %v1682_v25  ;;  %1850 = vadd.xlane.f32.xlu1 %v3734_v33  ;;  %v1634_v36 = vpop.f32.mrf.mxu0  ;;  %v1683_v60 = vpop.f32.mrf.mxu1 }
 0x2f5   : > { %v1684_v4 = vadd.f32 %v1683_v60, %v1634_v36 }
 0x2f6   : > { %v1780_v42 = vadd.f32 %v1779_v34, %v1731_v53 }
 0x2f8   : > { %v1810_v3 = vadd.f32 %v1780_v42, %v3403_v30 }
 0x2fa   : > { %v3739_v23 = vadd.f32 %v3705_v43, %v1810_v3 }
 0x2fb   : > { %v1732_v16 = vpop.f32.mrf.mxu2  ;;  %v1781_v32 = vpop.f32.mrf.mxu3 }
 0x2fc   : > { %v1733_v59 = vadd.f32 %v1732_v16, %v1684_v4  ;;  %1852 = vadd.xlane.f32.xlu2 %v3739_v23  ;;  %v1637_v1 = vpop.f32.mrf.mxu0  ;;  %v1686_v61 = vpop.f32.mrf.mxu1 }
 0x2fd   : > { %v1687_v8 = vadd.f32 %v1686_v61, %v1637_v1 }
 0x2fe   : > { %v1782_v6 = vadd.f32 %v1781_v32, %v1733_v59 }
 0x300   : > { %v1811_v54 = vadd.f32 %v1782_v6, %v3406_v35 }
 0x302   : > { %v3744_v29 = vadd.f32 %v3705_v43, %v1811_v54 }
 0x303   : > { %v1735_v13 = vpop.f32.mrf.mxu2  ;;  %v1784_v30 = vpop.f32.mrf.mxu3 }
 0x304   : > { %v1736_v55 = vadd.f32 %v1735_v13, %v1687_v8  ;;  %1854 = vadd.xlane.f32.xlu0 %v3744_v29  ;;  %v1639_v17 = vpop.f32.mrf.mxu0  ;;  %v1688_v0 = vpop.f32.mrf.mxu1 }
 0x305   : > { %v1689_v44 = vadd.f32 %v1688_v0, %v1639_v17 }
 0x306   : > { %v1785_v62 = vadd.f32 %v1784_v30, %v1736_v55 }
 0x308   : > { %v1812_v48 = vadd.f32 %v1785_v62, %v3443_v21 }
 0x30a   : > { %v3749_v15 = vadd.f32 %v3705_v43, %v1812_v48 }
 0x30b   : > { %v1737_v10 = vpop.f32.mrf.mxu2  ;;  %v1786_v35 = vpop.f32.mrf.mxu3 }
 0x30c   : > { %v1738_v24 = vadd.f32 %v1737_v10, %v1689_v44  ;;  %1856 = vadd.xlane.f32.xlu1 %v3749_v15  ;;  %v1642_v57 = vpop.f32.mrf.mxu0  ;;  %v1691_v2 = vpop.f32.mrf.mxu1 }
 0x30d   : > { %v1692_v18 = vadd.f32 %v1691_v2, %v1642_v57 }
 0x30e   : > { %v1787_v38 = vadd.f32 %v1786_v35, %v1738_v24 }
 0x310   : > { %v1813_v40 = vadd.f32 %v1787_v38, %v3432_v46 }
 0x312   : > { %v3754_v47 = vadd.f32 %v3705_v43, %v1813_v40 }
 0x313   : > { %v1740_v12 = vpop.f32.mrf.mxu2  ;;  %v1789_v21 = vpop.f32.mrf.mxu3 }
 0x314   : > { %v1741_v56 = vadd.f32 %v1740_v12, %v1692_v18  ;;  %1858 = vadd.xlane.f32.xlu2 %v3754_v47  ;;  %v1644_v31 = vpop.f32.mrf.mxu0  ;;  %v1693_v50 = vpop.f32.mrf.mxu1 }
 0x315   : > { %v1694_v51 = vadd.f32 %v1693_v50, %v1644_v31 }
 0x316   : > { %v1790_v11 = vadd.f32 %v1789_v21, %v1741_v56 }
 0x318   : > { %v1814_v22 = vadd.f32 %v1790_v11, %v3504_v45 }
 0x31a   : > { %v3759_v20 = vadd.f32 %v3705_v43, %v1814_v22 }
 0x31b   : > { %v1742_v7 = vpop.f32.mrf.mxu2  ;;  %v1791_v46 = vpop.f32.mrf.mxu3 }
 0x31c   : > { %v1743_v26 = vadd.f32 %v1742_v7, %v1694_v51  ;;  %1860 = vadd.xlane.f32.xlu0 %v3759_v20  ;;  %v1647_v9 = vpop.f32.mrf.mxu0  ;;  %v1696_v25 = vpop.f32.mrf.mxu1 }
 0x31d   : > { %v1697_v53 = vadd.f32 %v1696_v25, %v1647_v9 }
 0x31e   : > { %v1792_v5 = vadd.f32 %v1791_v46, %v1743_v26 }
 0x320   : > { %v1815_v34 = vadd.f32 %v1792_v5, %v3523_v52 }
 0x322   : > { %v3764_v36 = vadd.f32 %v3705_v43, %v1815_v34 }
 0x323   : > { %v1745_v60 = vpop.f32.mrf.mxu2  ;;  %v1794_v45 = vpop.f32.mrf.mxu3 }
 0x324   : > { %v1746_v42 = vadd.f32 %v1745_v60, %v1697_v53  ;;  %1862 = vadd.xlane.f32.xlu1 %v3764_v36  ;;  %v1649_v4 = vpop.f32.mrf.mxu0  ;;  %v1698_v16 = vpop.f32.mrf.mxu1 }
 0x325   : > { %v1699_v59 = vadd.f32 %v1698_v16, %v1649_v4 }
 0x326   : > { %v1795_v3 = vadd.f32 %v1794_v45, %v1746_v42 }
 0x328   : > { %v1816_v32 = vadd.f32 %v1795_v3, %v3543_v41 }
 0x32a   : > { %v3769_v1 = vadd.f32 %v3705_v43, %v1816_v32 }
 0x32b   : > { %v1747_v61 = vpop.f32.mrf.mxu2  ;;  %v1796_v6 = vpop.f32.mrf.mxu3 }
 0x32c   : > { %v1748_v52 = vadd.f32 %v1747_v61, %v1699_v59  ;;  %1864 = vadd.xlane.f32.xlu2 %v3769_v1 }
 0x32e   : > { %v1797_v54 = vadd.f32 %v1796_v6, %v1748_v52 }
 0x330   : > { %v1817_v8 = vadd.f32 %v1797_v54, %v3540_v49 }
 0x332   : > { %v3774_v13 = vadd.f32 %v3705_v43, %v1817_v8 }
 0x334   : > { %1866 = vadd.xlane.f32.xlu0 %v3774_v13 }
 0x338   : > { %v1652_v30 = vpop.f32.mrf.mxu0  ;;  %v1701_v55 = vpop.f32.mrf.mxu1 }
 0x339   : > { %v1702_v62 = vadd.f32 %v1701_v55, %v1652_v30 }
 0x33f   : > { %v1841_v41 = vpop.xlane.xlu2 %1840 }
 0x340   : > { %v1872_v17 = vmul.f32 %v1841_v41, %v2942_v27  ;;  %v1654_v35 = vpop.f32.mrf.mxu0  ;;  %v1703_v57 = vpop.f32.mrf.mxu1 }
 0x341   : > { %v1704_v40 = vadd.f32 %v1703_v57, %v1654_v35 }
 0x342   : > { %v3779_v0 = vsub.f32 %v3709_v39, %v1872_v17 }
 0x344   : > { %v1904_v48 = vmul.f32 %v3779_v0, %v3779_v0 }
 0x345   : > { %v1750_v44 = vpop.f32.mrf.mxu2  ;;  %v1799_v10 = vpop.f32.mrf.mxu3 }
 0x346   : > { %v1751_v49 = vadd.f32 %v1750_v44, %v1702_v62  ;;  %1920 = vadd.xlane.f32.xlu0 %v1904_v48 }
 0x347   : > { %v1843_v2 = vpop.xlane.xlu0 %1842 }
 0x348   : > { %v1800_v24 = vadd.f32 %v1799_v10, %v1751_v49  ;;  %v1873_v18 = vmul.f32 %v1843_v2, %v2942_v27 }
 0x34a   : > { %v1818_v38 = vadd.f32 %v1800_v24, %v3616_v19  ;;  %v3790_v31 = vsub.f32 %v3714_v37, %v1873_v18 }
 0x34c   : > { %v3786_v39 = vadd.f32 %v3705_v43, %v1818_v38  ;;  %v1905_v51 = vmul.f32 %v3790_v31, %v3790_v31 }
 0x34d   : > { %v1752_v12 = vpop.f32.mrf.mxu2  ;;  %v1801_v56 = vpop.f32.mrf.mxu3 }
 0x34e   : > { %v1753_v21 = vadd.f32 %v1752_v12, %v1704_v40  ;;  %1868 = vadd.xlane.f32.xlu1 %v3786_v39 }
 0x34f   : > { %v1845_v11 = vpop.xlane.xlu1 %1844 }
 0x350   : > { %v1802_v50 = vadd.f32 %v1801_v56, %v1753_v21  ;;  %v1874_v19 = vmul.f32 %v1845_v11, %v2942_v27 }
 0x352   : > { %v1819_v22 = vadd.f32 %v1802_v50, %v3619_v63  ;;  %v3801_v26 = vsub.f32 %v3719_v14, %v1874_v19 }
 0x354   : > { %v3797_v7 = vadd.f32 %v3705_v43, %v1819_v22  ;;  %v1906_v25 = vmul.f32 %v3801_v26, %v3801_v26 }
 0x356   : > { %1922 = vadd.xlane.f32.xlu1 %v1905_v51  ;;  %1870 = vadd.xlane.f32.xlu2 %v3797_v7 }
 0x357   : > { %v1847_v46 = vpop.xlane.xlu2 %1846 }
 0x358   : > { %v1875_v37 = vmul.f32 %v1847_v46, %v2942_v27 }
 0x35a   : > { %v3805_v9 = vsub.f32 %v3724_v28, %v1875_v37 }
 0x35c   : > { %v1907_v63 = vmul.f32 %v3805_v9, %v3805_v9 }
 0x35e   : > { %1926 = vadd.xlane.f32.xlu0 %v1907_v63  ;;  %1924 = vadd.xlane.f32.xlu2 %v1906_v25 }
 0x35f   : > { %v1849_v43 = vpop.xlane.xlu0 %1848 }
 0x360   : > { %v1876_v5 = vmul.f32 %v1849_v43, %v2942_v27 }
 0x362   : > { %v3813_v34 = vsub.f32 %v3729_v58, %v1876_v5  ;;  %v3886_v5 = vld [vmem:[%s4002_s8] ss:$0 sm:$0xff] }
 0x364   : > { %v1908_v14 = vmul.f32 %v3813_v34, %v3813_v34 }
 0x366   : > { %1928 = vadd.xlane.f32.xlu1 %v1908_v14 }
 0x367   : > { %v1851_v28 = vpop.xlane.xlu1 %1850 }
 0x368   : > { %v1877_v53 = vmul.f32 %v1851_v28, %v2942_v27 }
 0x36a   : > { %v3819_v60 = vsub.f32 %v3734_v33, %v1877_v53  ;;  %v3893_v53 = vld [vmem:[%s4003_s9] ss:$0 sm:$0xff] }
 0x36c   : > { %v1909_v45 = vmul.f32 %v3819_v60, %v3819_v60 }
 0x36e   : > { %1930 = vadd.xlane.f32.xlu2 %v1909_v45 }
 0x36f   : > { %v1853_v42 = vpop.xlane.xlu2 %1852 }
 0x370   : > { %v1878_v3 = vmul.f32 %v1853_v42, %v2942_v27 }
 0x372   : > { %v3825_v58 = vsub.f32 %v3739_v23, %v1878_v3 }
 0x374   : > { %v1910_v4 = vmul.f32 %v3825_v58, %v3825_v58 }
 0x376   : > { %1932 = vadd.xlane.f32.xlu0 %v1910_v4 }
 0x377   : > { %v1855_v16 = vpop.xlane.xlu0 %1854 }
 0x378   : > { %v1879_v32 = vmul.f32 %v1855_v16, %v2942_v27 }
 0x37a   : > { %v3831_v33 = vsub.f32 %v3744_v29, %v1879_v32 }
 0x37c   : > { %v1911_v59 = vmul.f32 %v3831_v33, %v3831_v33 }
 0x37e   : > { %1934 = vadd.xlane.f32.xlu1 %v1911_v59 }
 0x37f   : > { %v1857_v61 = vpop.xlane.xlu1 %1856 }
 0x380   : > { %v1880_v52 = vmul.f32 %v1857_v61, %v2942_v27 }
 0x382   : > { %v3837_v23 = vsub.f32 %v3749_v15, %v1880_v52 }
 0x384   : > { %v1912_v6 = vmul.f32 %v3837_v23, %v3837_v23 }
 0x386   : > { %1936 = vadd.xlane.f32.xlu2 %v1912_v6 }
 0x387   : > { %v1859_v54 = vpop.xlane.xlu2 %1858 }
 0x388   : > { %v1881_v8 = vmul.f32 %v1859_v54, %v2942_v27 }
 0x38a   : > { %v3843_v29 = vsub.f32 %v3754_v47, %v1881_v8 }
 0x38c   : > { %v1913_v30 = vmul.f32 %v3843_v29, %v3843_v29 }
 0x38e   : > { %1938 = vadd.xlane.f32.xlu0 %v1913_v30 }
 0x38f   : > { %v1861_v55 = vpop.xlane.xlu0 %1860 }
 0x390   : > { %v1882_v41 = vmul.f32 %v1861_v55, %v2942_v27 }
 0x392   : > { %v3849_v15 = vsub.f32 %v3759_v20, %v1882_v41 }
 0x394   : > { %v1914_v17 = vmul.f32 %v3849_v15, %v3849_v15 }
 0x396   : > { %1940 = vadd.xlane.f32.xlu1 %v1914_v17 }
 0x397   : > { %v1863_v62 = vpop.xlane.xlu1 %1862 }
 0x398   : > { %v1883_v48 = vmul.f32 %v1863_v62, %v2942_v27 }
 0x39a   : > { %v3855_v47 = vsub.f32 %v3764_v36, %v1883_v48 }
 0x39c   : > { %v1915_v44 = vmul.f32 %v3855_v47, %v3855_v47 }
 0x39e   : > { %1942 = vadd.xlane.f32.xlu2 %v1915_v44 }
 0x39f   : > { %v1865_v10 = vpop.xlane.xlu2 %1864 }
 0x3a0   : > { %v1884_v49 = vmul.f32 %v1865_v10, %v2942_v27 }
 0x3a2   : > { %v3861_v20 = vsub.f32 %v3769_v1, %v1884_v49 }
 0x3a4   : > { %v1916_v35 = vmul.f32 %v3861_v20, %v3861_v20 }
 0x3a6   : > { %1944 = vadd.xlane.f32.xlu0 %v1916_v35 }
 0x3a7   : > { %v1867_v24 = vpop.xlane.xlu0 %1866 }
 0x3a8   : > { %v1885_v57 = vmul.f32 %v1867_v24, %v2942_v27 }
 0x3aa   : > { %v3867_v36 = vsub.f32 %v3774_v13, %v1885_v57 }
 0x3ac   : > { %v1917_v2 = vmul.f32 %v3867_v36, %v3867_v36 }
 0x3ae   : > { %1946 = vadd.xlane.f32.xlu1 %v1917_v2 }
 0x3b9   : > { %v1921_v38 = vpop.xlane.xlu0 %1920 }
 0x3ba   : > { %v1952_v40 = vmul.f32 %v1921_v38, %v2942_v27 }
 0x3bc   : > { %v1968_v18 = vadd.f32 1e-05, %v1952_v40 }
 0x3be   : > { %2756 = vrsqrt.f32 %v1968_v18  ;;  %vm1990_vm2 = vweird.f32 %v1968_v18 }
 0x3c1   : > { %v1869_v1 = vpop.xlane.xlu1 %1868 }
 0x3c2   : > { %v1886_v12 = vmul.f32 %v1869_v1, %v2942_v27 }
 0x3c4   : > { %v2757_v21 = vpop.eup %2756  ;;  %v3874_v56 = vsub.f32 %v3786_v39, %v1886_v12 }
 0x3c5   : > { %v1985_v50 = vmul.f32 %v2757_v21, %v1968_v18  ;;  %vm1991_vm1 = vweird.f32 %v2757_v21 }
 0x3c6   : > { %v1918_v13 = vmul.f32 %v3874_v56, %v3874_v56  ;;  %vm1992_vm3 = vmor %vm1990_vm2, %vm1991_vm1 }
 0x3c7   : > { %v1986_v11 = vmul.f32 %v2757_v21, %v1985_v50 }
 0x3c8   : > { %1948 = vadd.xlane.f32.xlu2 %v1918_v13 }
 0x3c9   : > { %v1987_v22 = vmul.f32 0.5, %v1986_v11  ;;  %v1923_v19 = vpop.xlane.xlu1 %1922  ;;  %v1871_v51 = vpop.xlane.xlu2 %1870 }
 0x3ca   : > { %v1953_v46 = vmul.f32 %v1923_v19, %v2942_v27  ;;  %v1887_v37 = vmul.f32 %v1871_v51, %v2942_v27 }
 0x3cb   : > { %v1988_v63 = vsub.f32 1.5, %v1987_v22 }
 0x3cc   : > { %v1969_v25 = vadd.f32 1e-05, %v1953_v46  ;;  %v3881_v43 = vsub.f32 %v3797_v7, %v1887_v37 }
 0x3cd   : > { %v1989_v39 = vmul.f32 %v2757_v21, %v1988_v63 }
 0x3ce   : > { %2758 = vrsqrt.f32 %v1969_v25  ;;  %v1919_v14 = vmul.f32 %v3881_v43, %v3881_v43  ;;  %vm2000_vm5 = vweird.f32 %v1969_v25 }
 0x3cf   : > { %v1993_v28 = vsel %vm1992_vm3, %v2757_v21, %v1989_v39 }
 0x3d0   : > { %v2144_v7 = vmul.f32 %v1993_v28, %v3779_v0  ;;  %1950 = vadd.xlane.f32.xlu0 %v1919_v14 }
 0x3d1   : > { %v1927_v45 = vpop.xlane.xlu0 %1926  ;;  %v1925_v42 = vpop.xlane.xlu2 %1924 }
 0x3d2   : > { %v2164_v3 = vmul.f32 %v3886_v5, %v2144_v7  ;;  %v1955_v4 = vmul.f32 %v1927_v45, %v2942_v27  ;;  %v1954_v16 = vmul.f32 %v1925_v42, %v2942_v27 }
 0x3d4   : > { %v2759_v32 = vpop.eup %2758  ;;  %v2184_v59 = vadd.f32 %v3893_v53, %v2164_v3  ;;  %v1971_v61 = vadd.f32 1e-05, %v1955_v4  ;;  %v1970_v52 = vadd.f32 1e-05, %v1954_v16 }
 0x3d5   : > { %v1995_v0 = vmul.f32 %v2759_v32, %v1969_v25  ;;  %vm2001_vm4 = vweird.f32 %v2759_v32 }
 0x3d6   : > { %v2200_v6 = vmax.f32 %v2184_v59, 0.0  ;;  %2760 = vrsqrt.f32 %v1971_v61  ;;  %vm2002_vm6 = vmor %vm2000_vm5, %vm2001_vm4  ;;  %vm2020_vm9 = vweird.f32 %v1971_v61  ;;  %vm2010_vm11 = vweird.f32 %v1970_v52 }
 0x3d7   : > { %v1996_v54 = vmul.f32 %v2759_v32, %v1995_v0  ;;  %2762 = vrsqrt.f32 %v1970_v52 }
 0x3d8   : > { %2216 = vst [vmem:[%s3904_s12] sm:$0xff] %v2200_v6 }
 0x3d9   : > { %v1997_v8 = vmul.f32 0.5, %v1996_v54  ;;  %v1929_v30 = vpop.xlane.xlu1 %1928 }
 0x3da   : > { %v1956_v55 = vmul.f32 %v1929_v30, %v2942_v27 }
 0x3db   : > { %v1998_v41 = vsub.f32 1.5, %v1997_v8 }
 0x3dc   : > { %v2761_v17 = vpop.eup %2760  ;;  %v1972_v62 = vadd.f32 1e-05, %v1956_v55 }
 0x3dd   : > { %v2763_v48 = vpop.eup %2762  ;;  %v1999_v44 = vmul.f32 %v2759_v32, %v1998_v41  ;;  %v2015_v10 = vmul.f32 %v2761_v17, %v1971_v61  ;;  %vm2021_vm7 = vweird.f32 %v2761_v17 }
 0x3de   : > { %v2005_v49 = vmul.f32 %v2763_v48, %v1970_v52  ;;  %2764 = vrsqrt.f32 %v1972_v62  ;;  %vm2011_vm8 = vweird.f32 %v2763_v48  ;;  %vm2022_vm10 = vmor %vm2020_vm9, %vm2021_vm7  ;;  %vm2030_vm14 = vweird.f32 %v1972_v62 }
 0x3df   : > { %v2003_v35 = vsel %vm2002_vm6, %v2759_v32, %v1999_v44  ;;  %v2016_v24 = vmul.f32 %v2761_v17, %v2015_v10  ;;  %vm2012_vm12 = vmor %vm2010_vm11, %vm2011_vm8 }
 0x3e0   : > { %v2145_v57 = vmul.f32 %v2003_v35, %v3790_v31  ;;  %v2006_v2 = vmul.f32 %v2763_v48, %v2005_v49 }
 0x3e1   : > { %v2017_v38 = vmul.f32 0.5, %v2016_v24  ;;  %v1931_v40 = vpop.xlane.xlu2 %1930 }
 0x3e2   : > { %v2165_v18 = vmul.f32 %v3886_v5, %v2145_v57  ;;  %v2007_v1 = vmul.f32 0.5, %v2006_v2  ;;  %v1957_v12 = vmul.f32 %v1931_v40, %v2942_v27 }
 0x3e3   : > { %v2018_v21 = vsub.f32 1.5, %v2017_v38 }
 0x3e4   : > { %v2765_v50 = vpop.eup %2764  ;;  %v2185_v13 = vadd.f32 %v3893_v53, %v2165_v18  ;;  %v2008_v11 = vsub.f32 1.5, %v2007_v1  ;;  %v1973_v22 = vadd.f32 1e-05, %v1957_v12 }
 0x3e5   : > { %v2019_v19 = vmul.f32 %v2761_v17, %v2018_v21  ;;  %v2025_v31 = vmul.f32 %v2765_v50, %v1972_v62  ;;  %vm2031_vm13 = vweird.f32 %v2765_v50 }
 0x3e6   : > { %v2201_v51 = vmax.f32 %v2185_v13, 0.0  ;;  %v2009_v46 = vmul.f32 %v2763_v48, %v2008_v11  ;;  %2766 = vrsqrt.f32 %v1973_v22  ;;  %vm2032_vm15 = vmor %vm2030_vm14, %vm2031_vm13  ;;  %vm2040_vm1 = vweird.f32 %v1973_v22 }
 0x3e7   : > { %v2023_v37 = vsel %vm2022_vm10, %v2761_v17, %v2019_v19  ;;  %v2026_v63 = vmul.f32 %v2765_v50, %v2025_v31 }
 0x3e8   : > { %2217 = vst [vmem:[%s3904_s12 + $0x8] sm:$0xff] %v2201_v51  ;;  %v2147_v25 = vmul.f32 %v2023_v37, %v3805_v9  ;;  %v2013_v39 = vsel %vm2012_vm12, %v2763_v48, %v2009_v46 }
 0x3e9   : > { %v2146_v14 = vmul.f32 %v2013_v39, %v3801_v26  ;;  %v2027_v28 = vmul.f32 0.5, %v2026_v63  ;;  %v1933_v7 = vpop.xlane.xlu0 %1932 }
 0x3ea   : > { %v2167_v45 = vmul.f32 %v3886_v5, %v2147_v25  ;;  %v1958_v42 = vmul.f32 %v1933_v7, %v2942_v27 }
 0x3eb   : > { %v2166_v3 = vmul.f32 %v3886_v5, %v2146_v14  ;;  %v2028_v4 = vsub.f32 1.5, %v2027_v28 }
 0x3ec   : > { %v2767_v16 = vpop.eup %2766  ;;  %v2187_v32 = vadd.f32 %v3893_v53, %v2167_v45  ;;  %v1974_v59 = vadd.f32 1e-05, %v1958_v42 }
 0x3ed   : > { %v2186_v9 = vadd.f32 %v3893_v53, %v2166_v3  ;;  %v2029_v61 = vmul.f32 %v2765_v50, %v2028_v4  ;;  %v2035_v26 = vmul.f32 %v2767_v16, %v1973_v22  ;;  %vm2041_vm0 = vweird.f32 %v2767_v16 }
 0x3ee   : > { %v2203_v52 = vmax.f32 %v2187_v32, 0.0  ;;  %2768 = vrsqrt.f32 %v1974_v59  ;;  %vm2042_vm2 = vmor %vm2040_vm1, %vm2041_vm0  ;;  %vm2050_vm4 = vweird.f32 %v1974_v59 }
 0x3ef   : > { %v2202_v0 = vmax.f32 %v2186_v9, 0.0  ;;  %v2033_v6 = vsel %vm2032_vm15, %v2765_v50, %v2029_v61  ;;  %v2036_v54 = vmul.f32 %v2767_v16, %v2035_v26 }
 0x3f0   : > { %2219 = vst [vmem:[%s3904_s12 + $0x18] sm:$0xff] %v2203_v52  ;;  %v2148_v8 = vmul.f32 %v2033_v6, %v3813_v34 }
 0x3f1   : > { %2218 = vst [vmem:[%s3904_s12 + $0x10] sm:$0xff] %v2202_v0  ;;  %v2037_v30 = vmul.f32 0.5, %v2036_v54  ;;  %v1935_v55 = vpop.xlane.xlu1 %1934 }
 0x3f2   : > { %v2168_v41 = vmul.f32 %v3886_v5, %v2148_v8  ;;  %v1959_v17 = vmul.f32 %v1935_v55, %v2942_v27 }
 0x3f3   : > { %v2038_v48 = vsub.f32 1.5, %v2037_v30 }
 0x3f4   : > { %v2769_v62 = vpop.eup %2768  ;;  %v2188_v44 = vadd.f32 %v3893_v53, %v2168_v41  ;;  %v1975_v10 = vadd.f32 1e-05, %v1959_v17 }
 0x3f5   : > { %v2039_v49 = vmul.f32 %v2767_v16, %v2038_v48  ;;  %v2045_v35 = vmul.f32 %v2769_v62, %v1974_v59  ;;  %vm2051_vm3 = vweird.f32 %v2769_v62 }
 0x3f6   : > { %v2204_v24 = vmax.f32 %v2188_v44, 0.0  ;;  %2770 = vrsqrt.f32 %v1975_v10  ;;  %vm2052_vm5 = vmor %vm2050_vm4, %vm2051_vm3  ;;  %vm2060_vm7 = vweird.f32 %v1975_v10 }
 0x3f7   : > { %v2043_v34 = vsel %vm2042_vm2, %v2767_v16, %v2039_v49  ;;  %v2046_v57 = vmul.f32 %v2769_v62, %v2045_v35 }
 0x3f8   : > { %2220 = vst [vmem:[%s3904_s12 + $0x20] sm:$0xff] %v2204_v24  ;;  %v2149_v2 = vmul.f32 %v2043_v34, %v3819_v60 }
 0x3f9   : > { %v2047_v38 = vmul.f32 0.5, %v2046_v57  ;;  %v1937_v40 = vpop.xlane.xlu2 %1936 }
 0x3fa   : > { %v2169_v18 = vmul.f32 %v3886_v5, %v2149_v2  ;;  %v1960_v1 = vmul.f32 %v1937_v40, %v2942_v27 }
 0x3fb   : > { %v2048_v12 = vsub.f32 1.5, %v2047_v38 }
 0x3fc   : > { %v2771_v21 = vpop.eup %2770  ;;  %v2189_v50 = vadd.f32 %v3893_v53, %v2169_v18  ;;  %v1976_v13 = vadd.f32 1e-05, %v1960_v1 }
 0x3fd   : > { %v2049_v11 = vmul.f32 %v2769_v62, %v2048_v12  ;;  %v2055_v22 = vmul.f32 %v2771_v21, %v1975_v10  ;;  %vm2061_vm6 = vweird.f32 %v2771_v21 }
 0x3fe   : > { %v2205_v19 = vmax.f32 %v2189_v50, 0.0  ;;  %2772 = vrsqrt.f32 %v1976_v13  ;;  %vm2062_vm8 = vmor %vm2060_vm7, %vm2061_vm6  ;;  %vm2070_vm10 = vweird.f32 %v1976_v13 }
 0x3ff   : > { %v2053_v60 = vsel %vm2052_vm5, %v2769_v62, %v2049_v11  ;;  %v2056_v31 = vmul.f32 %v2771_v21, %v2055_v22 }
 0x400   : > { %2221 = vst [vmem:[%s3904_s12 + $0x28] sm:$0xff] %v2205_v19  ;;  %v2150_v51 = vmul.f32 %v2053_v60, %v3825_v58 }
 0x401   : > { %v2057_v46 = vmul.f32 0.5, %v2056_v31  ;;  %v1939_v37 = vpop.xlane.xlu0 %1938 }
 0x402   : > { %v2170_v63 = vmul.f32 %v3886_v5, %v2150_v51  ;;  %v1961_v25 = vmul.f32 %v1939_v37, %v2942_v27 }
 0x403   : > { %v2058_v39 = vsub.f32 1.5, %v2057_v46 }
 0x404   : > { %v2773_v14 = vpop.eup %2772  ;;  %v2190_v28 = vadd.f32 %v3893_v53, %v2170_v63  ;;  %v1977_v7 = vadd.f32 1e-05, %v1961_v25 }
 0x405   : > { %v2059_v45 = vmul.f32 %v2771_v21, %v2058_v39  ;;  %v2065_v42 = vmul.f32 %v2773_v14, %v1976_v13  ;;  %vm2071_vm9 = vweird.f32 %v2773_v14 }
 0x406   : > { %v2206_v3 = vmax.f32 %v2190_v28, 0.0  ;;  %2774 = vrsqrt.f32 %v1977_v7  ;;  %vm2072_vm11 = vmor %vm2070_vm10, %vm2071_vm9  ;;  %vm2080_vm13 = vweird.f32 %v1977_v7 }
 0x407   : > { %v2063_v58 = vsel %vm2062_vm8, %v2771_v21, %v2059_v45  ;;  %v2066_v4 = vmul.f32 %v2773_v14, %v2065_v42 }
 0x408   : > { %2222 = vst [vmem:[%s3904_s12 + $0x30] sm:$0xff] %v2206_v3  ;;  %v2151_v16 = vmul.f32 %v2063_v58, %v3831_v33 }
 0x409   : > { %v2067_v32 = vmul.f32 0.5, %v2066_v4  ;;  %v1941_v59 = vpop.xlane.xlu1 %1940 }
 0x40a   : > { %v2171_v9 = vmul.f32 %v3886_v5, %v2151_v16  ;;  %v1962_v61 = vmul.f32 %v1941_v59, %v2942_v27 }
 0x40b   : > { %v2068_v26 = vsub.f32 1.5, %v2067_v32 }
 0x40c   : > { %v2775_v52 = vpop.eup %2774  ;;  %v2191_v0 = vadd.f32 %v3893_v53, %v2171_v9  ;;  %v1978_v6 = vadd.f32 1e-05, %v1962_v61 }
 0x40d   : > { %v2069_v54 = vmul.f32 %v2773_v14, %v2068_v26  ;;  %v2075_v8 = vmul.f32 %v2775_v52, %v1977_v7  ;;  %vm2081_vm12 = vweird.f32 %v2775_v52 }
 0x40e   : > { %v2207_v30 = vmax.f32 %v2191_v0, 0.0  ;;  %2776 = vrsqrt.f32 %v1978_v6  ;;  %vm2082_vm14 = vmor %vm2080_vm13, %vm2081_vm12  ;;  %vm2090_vm0 = vweird.f32 %v1978_v6 }
 0x40f   : > { %v2073_v33 = vsel %vm2072_vm11, %v2773_v14, %v2069_v54  ;;  %v2076_v55 = vmul.f32 %v2775_v52, %v2075_v8 }
 0x410   : > { %2223 = vst [vmem:[%s3904_s12 + $0x38] sm:$0xff] %v2207_v30  ;;  %v2152_v41 = vmul.f32 %v2073_v33, %v3837_v23 }
 0x411   : > { %v2077_v17 = vmul.f32 0.5, %v2076_v55  ;;  %v1943_v48 = vpop.xlane.xlu2 %1942 }
 0x412   : > { %v2172_v62 = vmul.f32 %v3886_v5, %v2152_v41  ;;  %v1963_v44 = vmul.f32 %v1943_v48, %v2942_v27 }
 0x413   : > { %v2078_v10 = vsub.f32 1.5, %v2077_v17 }
 0x414   : > { %v2777_v49 = vpop.eup %2776  ;;  %v2192_v35 = vadd.f32 %v3893_v53, %v2172_v62  ;;  %v1979_v24 = vadd.f32 1e-05, %v1963_v44 }
 0x415   : > { %v2079_v34 = vmul.f32 %v2775_v52, %v2078_v10  ;;  %v2085_v57 = vmul.f32 %v2777_v49, %v1978_v6  ;;  %vm2091_vm15 = vweird.f32 %v2777_v49 }
 0x416   : > { %v2208_v2 = vmax.f32 %v2192_v35, 0.0  ;;  %2778 = vrsqrt.f32 %v1979_v24  ;;  %vm2092_vm1 = vmor %vm2090_vm0, %vm2091_vm15  ;;  %vm2100_vm3 = vweird.f32 %v1979_v24 }
 0x417   : > { %v2083_v23 = vsel %vm2082_vm14, %v2775_v52, %v2079_v34  ;;  %v2086_v38 = vmul.f32 %v2777_v49, %v2085_v57 }
 0x418   : > { %2224 = vst [vmem:[%s3904_s12 + $0x40] sm:$0xff] %v2208_v2  ;;  %v2153_v40 = vmul.f32 %v2083_v23, %v3843_v29 }
 0x419   : > { %v2087_v18 = vmul.f32 0.5, %v2086_v38  ;;  %v1945_v1 = vpop.xlane.xlu0 %1944 }
 0x41a   : > { %v2173_v12 = vmul.f32 %v3886_v5, %v2153_v40  ;;  %v1964_v21 = vmul.f32 %v1945_v1, %v2942_v27 }
 0x41b   : > { %v2088_v50 = vsub.f32 1.5, %v2087_v18 }
 0x41c   : > { %v2779_v13 = vpop.eup %2778  ;;  %v2193_v11 = vadd.f32 %v3893_v53, %v2173_v12  ;;  %v1980_v22 = vadd.f32 1e-05, %v1964_v21 }
 0x41d   : > { %v2089_v19 = vmul.f32 %v2777_v49, %v2088_v50  ;;  %v2095_v60 = vmul.f32 %v2779_v13, %v1979_v24  ;;  %vm2101_vm2 = vweird.f32 %v2779_v13 }
 0x41e   : > { %v2209_v31 = vmax.f32 %v2193_v11, 0.0  ;;  %2780 = vrsqrt.f32 %v1980_v22  ;;  %vm2102_vm4 = vmor %vm2100_vm3, %vm2101_vm2  ;;  %vm2110_vm6 = vweird.f32 %v1980_v22 }
 0x41f   : > { %v2093_v29 = vsel %vm2092_vm1, %v2777_v49, %v2089_v19  ;;  %v2096_v51 = vmul.f32 %v2779_v13, %v2095_v60 }
 0x420   : > { %2225 = vst [vmem:[%s3904_s12 + $0x48] sm:$0xff] %v2209_v31  ;;  %v2154_v46 = vmul.f32 %v2093_v29, %v3849_v15 }
 0x421   : > { %v2097_v37 = vmul.f32 0.5, %v2096_v51  ;;  %v1947_v63 = vpop.xlane.xlu1 %1946 }
 0x422   : > { %v2174_v25 = vmul.f32 %v3886_v5, %v2154_v46  ;;  %v1965_v39 = vmul.f32 %v1947_v63, %v2942_v27 }
 0x423   : > { %v2098_v14 = vsub.f32 1.5, %v2097_v37 }
 0x424   : > { %v2781_v28 = vpop.eup %2780  ;;  %v2194_v7 = vadd.f32 %v3893_v53, %v2174_v25  ;;  %v1981_v45 = vadd.f32 1e-05, %v1965_v39 }
 0x425   : > { %v2099_v42 = vmul.f32 %v2779_v13, %v2098_v14  ;;  %v2105_v3 = vmul.f32 %v2781_v28, %v1980_v22  ;;  %vm2111_vm5 = vweird.f32 %v2781_v28 }
 0x426   : > { %v2210_v58 = vmax.f32 %v2194_v7, 0.0  ;;  %2782 = vrsqrt.f32 %v1981_v45  ;;  %vm2112_vm7 = vmor %vm2110_vm6, %vm2111_vm5  ;;  %vm2120_vm9 = vweird.f32 %v1981_v45 }
 0x427   : > { %v2103_v15 = vsel %vm2102_vm4, %v2779_v13, %v2099_v42  ;;  %v2106_v4 = vmul.f32 %v2781_v28, %v2105_v3 }
 0x428   : > { %2226 = vst [vmem:[%s3904_s12 + $0x50] sm:$0xff] %v2210_v58  ;;  %v2155_v16 = vmul.f32 %v2103_v15, %v3855_v47 }
 0x429   : > { %v2107_v32 = vmul.f32 0.5, %v2106_v4 }
 0x42a   : > { %v2175_v59 = vmul.f32 %v3886_v5, %v2155_v16 }
 0x42b   : > { %v2108_v9 = vsub.f32 1.5, %v2107_v32 }
 0x42c   : > { %v2783_v61 = vpop.eup %2782  ;;  %v2195_v26 = vadd.f32 %v3893_v53, %v2175_v59 }
 0x42d   : > { %v2109_v52 = vmul.f32 %v2781_v28, %v2108_v9  ;;  %v2115_v0 = vmul.f32 %v2783_v61, %v1981_v45  ;;  %vm2121_vm8 = vweird.f32 %v2783_v61 }
 0x42e   : > { %v2211_v6 = vmax.f32 %v2195_v26, 0.0  ;;  %vm2122_vm10 = vmor %vm2120_vm9, %vm2121_vm8 }
 0x42f   : > { %v2113_v54 = vsel %vm2112_vm7, %v2781_v28, %v2109_v52  ;;  %v2116_v8 = vmul.f32 %v2783_v61, %v2115_v0 }
 0x430   : > { %2227 = vst [vmem:[%s3904_s12 + $0x58] sm:$0xff] %v2211_v6  ;;  %v2156_v30 = vmul.f32 %v2113_v54, %v3861_v20 }
 0x431   : > { %v2117_v47 = vmul.f32 0.5, %v2116_v8 }
 0x432   : > { %v2176_v33 = vmul.f32 %v3886_v5, %v2156_v30 }
 0x433   : > { %v2118_v55 = vsub.f32 1.5, %v2117_v47 }
 0x434   : > { %v2196_v41 = vadd.f32 %v3893_v53, %v2176_v33 }
 0x435   : > { %v2119_v17 = vmul.f32 %v2783_v61, %v2118_v55 }
 0x436   : > { %v2212_v48 = vmax.f32 %v2196_v41, 0.0 }
 0x437   : > { %v2123_v62 = vsel %vm2122_vm10, %v2783_v61, %v2119_v17 }
 0x438   : > { %2228 = vst [vmem:[%s3904_s12 + $0x60] sm:$0xff] %v2212_v48  ;;  %v2157_v44 = vmul.f32 %v2123_v62, %v3867_v36 }
 0x43a   : > { %v2177_v10 = vmul.f32 %v3886_v5, %v2157_v44 }
 0x43b   : > { %v1949_v49 = vpop.xlane.xlu2 %1948 }
 0x43c   : > { %v2197_v20 = vadd.f32 %v3893_v53, %v2177_v10  ;;  %v1966_v35 = vmul.f32 %v1949_v49, %v2942_v27 }
 0x43e   : > { %v2213_v24 = vmax.f32 %v2197_v20, 0.0  ;;  %v1982_v34 = vadd.f32 1e-05, %v1966_v35 }
 0x440   : > { %2229 = vst [vmem:[%s3904_s12 + $0x68] sm:$0xff] %v2213_v24  ;;  %2784 = vrsqrt.f32 %v1982_v34  ;;  %vm2130_vm12 = vweird.f32 %v1982_v34 }
 0x443   : > { %v1951_v57 = vpop.xlane.xlu0 %1950 }
 0x444   : > { %v1967_v2 = vmul.f32 %v1951_v57, %v2942_v27 }
 0x446   : > { %v2785_v23 = vpop.eup %2784  ;;  %v1983_v38 = vadd.f32 1e-05, %v1967_v2 }
 0x447   : > { %v2125_v40 = vmul.f32 %v2785_v23, %v1982_v34  ;;  %vm2131_vm11 = vweird.f32 %v2785_v23 }
 0x448   : > { %2786 = vrsqrt.f32 %v1983_v38  ;;  %vm2132_vm13 = vmor %vm2130_vm12, %vm2131_vm11  ;;  %vm2140_vm15 = vweird.f32 %v1983_v38 }
 0x449   : > { %v2126_v18 = vmul.f32 %v2785_v23, %v2125_v40 }
 0x44b   : > { %v2127_v36 = vmul.f32 0.5, %v2126_v18 }
 0x44d   : > { %v2128_v1 = vsub.f32 1.5, %v2127_v36 }
 0x44e   : > { %v2787_v12 = vpop.eup %2786 }
 0x44f   : > { %v2129_v21 = vmul.f32 %v2785_v23, %v2128_v1  ;;  %v2135_v50 = vmul.f32 %v2787_v12, %v1983_v38  ;;  %vm2141_vm14 = vweird.f32 %v2787_v12 }
 0x450   : > { %vm2142_vm0 = vmor %vm2140_vm15, %vm2141_vm14 }
 0x451   : > { %v2133_v13 = vsel %vm2132_vm13, %v2785_v23, %v2129_v21  ;;  %v2136_v11 = vmul.f32 %v2787_v12, %v2135_v50 }
 0x452   : > { %v2158_v22 = vmul.f32 %v2133_v13, %v3874_v56 }
 0x453   : > { %v2137_v27 = vmul.f32 0.5, %v2136_v11 }
 0x454   : > { %v2178_v19 = vmul.f32 %v3886_v5, %v2158_v22 }
 0x455   : > { %v2138_v60 = vsub.f32 1.5, %v2137_v27 }
 0x456   : > { %v2198_v31 = vadd.f32 %v3893_v53, %v2178_v19 }
 0x457   : > { %v2139_v29 = vmul.f32 %v2787_v12, %v2138_v60 }
 0x458   : > { %v2214_v51 = vmax.f32 %v2198_v31, 0.0 }
 0x459   : > { %v2143_v46 = vsel %vm2142_vm0, %v2787_v12, %v2139_v29 }
 0x45a   : > { %2230 = vst [vmem:[%s3904_s12 + $0x70] sm:$0xff] %v2214_v51  ;;  %v2159_v37 = vmul.f32 %v2143_v46, %v3881_v43 }
 0x45c   : > { %v2179_v63 = vmul.f32 %v3886_v5, %v2159_v37 }
 0x45e   : > { %v2199_v56 = vadd.f32 %v3893_v53, %v2179_v63 }
 0x460   : > { %v2215_v25 = vmax.f32 %v2199_v56, 0.0 }
 0x462   : > { %2231 = vst [vmem:[%s3904_s12 + $0x78] sm:$0xff] %v2215_v25 }
 0x463 PF: > { %s20_s17 = sadd.s32 1, %s2826_s17   ;;  %s4019_s13 = smov %s2818_s15 }
 0x464   : > { %p17_p7 = scmp.ge.s32.totalorder %s20_s17, 6   ;;  %s4020_s14 = smov %s2822_s16 }
 0x465   : > { %s4021_s15 = smov %s4024_s18  ;;  %s4022_s16 = smov %s4028_s19 }
 0x466   :  { %19 = sbr.rel (!%p17_p7) target bundleno = 3 (0x3), region = 93 }

</bundles_post_ra>
